<compile_context>
chip_gen: v6e
topology: v6e:2x2x1
jax: 0.10.0
libtpu: 0.0.40
codegen_flags: <defaults>
</compile_context>

<pallas_src>
import functools
import math

import jax
import jax.numpy as jnp
from jax import lax
from jax.experimental import pallas as pl
from jax.experimental.pallas import tpu as pltpu


def _round_up(x, m):
    return (x + m - 1) // m * m


# ----------------------------------------------------------------------------
# Dense (tiled matmul + bias [+ relu]) kernel
# ----------------------------------------------------------------------------
def _dense_kernel(x_ref, w_ref, b_ref, o_ref, acc_ref, *, activation):
    @pl.when(pl.program_id(2) == 0)
    def _init():
        acc_ref[...] = jnp.zeros_like(acc_ref)

    acc_ref[...] += jnp.dot(x_ref[...], w_ref[...],
                            preferred_element_type=jnp.float32)

    @pl.when(pl.program_id(2) == pl.num_programs(2) - 1)
    def _finalize():
        out = acc_ref[...] + b_ref[...]
        if activation == "relu":
            out = jnp.maximum(out, 0.0)
        o_ref[...] = out.astype(o_ref.dtype)


def dense(x2d, w, b_row, activation=None, out_dtype=jnp.bfloat16,
          tm=512, tn=512, tk=512):
    """x2d: [M, K] (bf16), w: [K, N] bf16 (pre-cast at init), b_row: [1, N] f32.

    Per-generation tuning notes:
      v6e: raise tn to ~1024 (bandwidth-starved, needs more operand reuse).
      v5e: raise tk to ~1024 (amortize f32 accumulator RMW over more MXU work).
      v7x: keep ~512x512 (64 MiB VMEM per TC); working set here is ~4 MiB.
    """
    M, K = x2d.shape
    K2, N = w.shape
    assert K == K2
    # Full-dimension blocks when a dim is smaller than the tile: bypasses the
    # (8,128) rule and avoids padding + output slicing entirely.
    tk = K if K <= tk else tk
    tn = N if N <= tn else tn
    tm = M if M <= tm else tm
    assert K % tk == 0, (K, tk)   # pick tk dividing K for real configs
    assert N % tn == 0, (N, tn)

    xp = x2d if x2d.dtype == jnp.bfloat16 else x2d.astype(jnp.bfloat16)
    Mp = _round_up(M, tm)
    if Mp != M:
        xp = jnp.pad(xp, ((0, Mp - M), (0, 0)))

    out = pl.pallas_call(
        functools.partial(_dense_kernel, activation=activation),
        grid=(Mp // tm, N // tn, K // tk),
        in_specs=[
            pl.BlockSpec((tm, tk), lambda i, j, k: (i, k)),
            pl.BlockSpec((tk, tn), lambda i, j, k: (k, j)),
            pl.BlockSpec((1, tn), lambda i, j, k: (0, j)),
        ],
        out_specs=pl.BlockSpec((tm, tn), lambda i, j, k: (i, j)),
        out_shape=jax.ShapeDtypeStruct((Mp, N), out_dtype),
        scratch_shapes=[pltpu.VMEM((tm, tn), jnp.float32)],
        compiler_params=pltpu.CompilerParams(
            dimension_semantics=("parallel", "parallel", "arbitrary")),
    )(xp, w, b_row)
    return out[:M] if Mp != M else out


# ----------------------------------------------------------------------------
# Fused residual-add + LayerNorm kernel (one-pass stats, bf16 out)
# ----------------------------------------------------------------------------
def _add_ln_kernel(x_ref, r_ref, g_ref, b_ref, o_ref, *, eps):
    x = x_ref[...].astype(jnp.float32) + r_ref[...].astype(jnp.float32)
    mu = jnp.mean(x, axis=-1, keepdims=True)
    ms = jnp.mean(x * x, axis=-1, keepdims=True)
    var = jnp.maximum(ms - mu * mu, 0.0)          # one-pass E[x^2]-E[x]^2
    xn = (x - mu) * lax.rsqrt(var + eps)
    o_ref[...] = (xn * g_ref[...] + b_ref[...]).astype(o_ref.dtype)


def add_layer_norm(x2d, res2d, gamma_row, beta_row,
                   out_dtype=jnp.bfloat16, tm=512):
    """LayerNorm(x2d + res2d); x2d/res2d: [M, D], gamma/beta: [1, D]."""
    M, D = x2d.shape
    tm = M if M <= tm else tm
    Mp = _round_up(M, tm)
    if Mp != M:
        x2d = jnp.pad(x2d, ((0, Mp - M), (0, 0)))
        res2d = jnp.pad(res2d, ((0, Mp - M), (0, 0)))
    out = pl.pallas_call(
        functools.partial(_add_ln_kernel, eps=1e-5),   # nn.LayerNorm default eps
        grid=(Mp // tm,),
        in_specs=[
            pl.BlockSpec((tm, D), lambda i: (i, 0)),
            pl.BlockSpec((tm, D), lambda i: (i, 0)),
            pl.BlockSpec((1, D), lambda i: (0, 0)),
            pl.BlockSpec((1, D), lambda i: (0, 0)),
        ],
        out_specs=pl.BlockSpec((tm, D), lambda i: (i, 0)),
        out_shape=jax.ShapeDtypeStruct((Mp, D), out_dtype),
        compiler_params=pltpu.CompilerParams(dimension_semantics=("parallel",)),
    )(x2d, res2d, gamma_row, beta_row)
    return out[:M] if Mp != M else out


# ----------------------------------------------------------------------------
# Attention kernels (heads split/merged in-kernel; output written as [B,S,D])
# ----------------------------------------------------------------------------
def _mha_heads(q_all, k_all, v_all, bias, num_heads, dk, sm_scale):
    """q_all: [Sq, H*dk] bf16, k_all/v_all: [Sk, H*dk] bf16, bias: [Sq, Sk] f32.

    Returns [Sq, H*dk] f32 (concatenated per-head outputs -> one lane-dense
    store by the caller).
    """
    # TODO(synk): for long sequences switch to a flash-style online-softmax loop
    # over Sk tiles and grid over (B, head-groups, Sq-tiles); with real d_model
    # pack head-groups so the MXU contraction / output lane dims are >=128.
    outs = []
    for h in range(num_heads):
        lo, hi = h * dk, (h + 1) * dk
        # fold 1/sqrt(dk) into q (H*Sq*dk elements) instead of the score tensor
        q = (q_all[:, lo:hi].astype(jnp.float32) * sm_scale).astype(jnp.bfloat16)
        k = k_all[:, lo:hi]
        v = v_all[:, lo:hi]
        s = lax.dot_general(q, k, (((1,), (1,)), ((), ())),
                            preferred_element_type=jnp.float32)
        s = s + bias
        s = s - jnp.max(s, axis=-1, keepdims=True)
        p = jnp.exp(s)
        p = p * pl.reciprocal(jnp.sum(p, axis=-1, keepdims=True), approx=True)
        outs.append(jnp.dot(p.astype(jnp.bfloat16), v,
                            preferred_element_type=jnp.float32))
    return jnp.concatenate(outs, axis=-1)


def _self_attn_kernel(qkv_ref, kbias_ref, o_ref, *, num_heads, causal, sm_scale):
    S = qkv_ref.shape[1]
    D = qkv_ref.shape[2] // 3
    dk = D // num_heads
    qkv = qkv_ref[0]                                  # [S, 3D] bf16
    bias = jnp.broadcast_to(kbias_ref[0], (S, S))     # pad bias on key positions
    if causal:
        row = lax.broadcasted_iota(jnp.int32, (S, S), 0)
        col = lax.broadcasted_iota(jnp.int32, (S, S), 1)
        bias = jnp.where(col > row, -1e9, bias)       # causal merged into same bias
    o = _mha_heads(qkv[:, :D], qkv[:, D:2 * D], qkv[:, 2 * D:],
                   bias, num_heads, dk, sm_scale)
    o_ref[0] = o.astype(o_ref.dtype)                  # one lane-dense store over D


def _cross_attn_kernel(q_ref, kv_ref, kbias_ref, o_ref, *, num_heads, sm_scale):
    Sq, D = q_ref.shape[1], q_ref.shape[2]
    Sk = kv_ref.shape[1]
    dk = D // num_heads
    kv = kv_ref[0]                                    # [Sk, 2D] bf16
    bias = jnp.broadcast_to(kbias_ref[0], (Sq, Sk))
    o = _mha_heads(q_ref[0], kv[:, :D], kv[:, D:], bias, num_heads, dk, sm_scale)
    o_ref[0] = o.astype(o_ref.dtype)


def self_attention(qkv, kbias, num_heads, causal):
    """qkv: [B, S, 3D] bf16, kbias: [B, 1, S] f32 -> [B, S, D] bf16."""
    B, S, D3 = qkv.shape
    D = D3 // 3
    dk = D // num_heads
    return pl.pallas_call(
        functools.partial(_self_attn_kernel, num_heads=num_heads, causal=causal,
                          sm_scale=1.0 / math.sqrt(dk)),
        grid=(B,),
        in_specs=[
            pl.BlockSpec((1, S, D3), lambda b: (b, 0, 0)),
            pl.BlockSpec((1, 1, S), lambda b: (b, 0, 0)),
        ],
        out_specs=pl.BlockSpec((1, S, D), lambda b: (b, 0, 0)),
        out_shape=jax.ShapeDtypeStruct((B, S, D), jnp.bfloat16),
        compiler_params=pltpu.CompilerParams(dimension_semantics=("parallel",)),
    )(qkv, kbias)


def cross_attention(q, kv, kbias, num_heads):
    """q: [B, Sq, D] bf16, kv: [B, Sk, 2D] bf16, kbias: [B, 1, Sk] f32."""
    B, Sq, D = q.shape
    Sk = kv.shape[1]
    dk = D // num_heads
    return pl.pallas_call(
        functools.partial(_cross_attn_kernel, num_heads=num_heads,
                          sm_scale=1.0 / math.sqrt(dk)),
        grid=(B,),
        in_specs=[
            pl.BlockSpec((1, Sq, D), lambda b: (b, 0, 0)),
            pl.BlockSpec((1, Sk, 2 * D), lambda b: (b, 0, 0)),
            pl.BlockSpec((1, 1, Sk), lambda b: (b, 0, 0)),
        ],
        out_specs=pl.BlockSpec((1, Sq, D), lambda b: (b, 0, 0)),
        out_shape=jax.ShapeDtypeStruct((B, Sq, D), jnp.bfloat16),
        compiler_params=pltpu.CompilerParams(dimension_semantics=("parallel",)),
    )(q, kv, kbias)


# ----------------------------------------------------------------------------
# Transformer building blocks (thin JAX glue around the Pallas kernels)
# ----------------------------------------------------------------------------
def self_attention_block(x, kbias, p, num_heads, causal):
    B, S, D = x.shape
    # Fused QKV projection; the reshape is contiguity-preserving (no transpose).
    qkv = dense(x.reshape(B * S, D), p["w_qkv"], p["b_qkv"]).reshape(B, S, 3 * D)
    a = self_attention(qkv, kbias, num_heads, causal)            # [B, S, D] bf16
    return dense(a.reshape(B * S, D), p["wo"], p["bo"]).reshape(B, S, D)


def cross_attention_block(x_q, x_kv, kbias, p, num_heads):
    B, Sq, D = x_q.shape
    Sk = x_kv.shape[1]
    q = dense(x_q.reshape(B * Sq, D), p["wq"], p["bq"]).reshape(B, Sq, D)
    kv = dense(x_kv.reshape(B * Sk, D), p["w_kv"], p["b_kv"]).reshape(B, Sk, 2 * D)
    a = cross_attention(q, kv, kbias, num_heads)                  # [B, Sq, D] bf16
    return dense(a.reshape(B * Sq, D), p["wo"], p["bo"]).reshape(B, Sq, D)


def feed_forward(x, p):
    B, S, D = x.shape
    h = dense(x.reshape(B * S, D), p["w1"], p["b1"], activation="relu")
    return dense(h, p["w2"], p["b2"]).reshape(B, S, D)


def encoder_layer(x, enc_kbias, p, num_heads):
    B, S, D = x.shape
    a = self_attention_block(x, enc_kbias, p["mha"], num_heads, causal=False)
    x = add_layer_norm(a.reshape(B * S, D), x.reshape(B * S, D),
                       p["ln1_g"], p["ln1_b"]).reshape(B, S, D)
    f = feed_forward(x, p["ffn"])
    x = add_layer_norm(f.reshape(B * S, D), x.reshape(B * S, D),
                       p["ln2_g"], p["ln2_b"]).reshape(B, S, D)
    return x


def decoder_layer(y, enc_out, enc_kbias, dec_kbias, p, num_heads):
    B, S, D = y.shape
    a1 = self_attention_block(y, dec_kbias, p["self_mha"], num_heads, causal=True)
    y = add_layer_norm(a1.reshape(B * S, D), y.reshape(B * S, D),
                       p["ln1_g"], p["ln1_b"]).reshape(B, S, D)
    a2 = cross_attention_block(y, enc_out, enc_kbias, p["cross_mha"], num_heads)
    y = add_layer_norm(a2.reshape(B * S, D), y.reshape(B * S, D),
                       p["ln2_g"], p["ln2_b"]).reshape(B, S, D)
    f = feed_forward(y, p["ffn"])
    y = add_layer_norm(f.reshape(B * S, D), y.reshape(B * S, D),
                       p["ln3_g"], p["ln3_b"]).reshape(B, S, D)
    return y


def positional_encoding(max_len, d_model):
    pos = jnp.arange(max_len, dtype=jnp.float32)[:, None]
    i = jnp.arange(d_model, dtype=jnp.float32)[None, :]
    angle_rates = 1.0 / jnp.power(10000.0, (2.0 * jnp.floor(i / 2.0)) / d_model)
    angles = pos * angle_rates
    even = (jnp.arange(d_model) % 2 == 0)[None, :]
    return jnp.where(even, jnp.sin(angles), jnp.cos(angles))      # [max_len, d_model]


def make_key_bias(tokens, pad_token):
    # Additive bias for key positions: -1e9 on pads, 0 elsewhere. [B, 1, S] f32.
    return jnp.where(tokens == pad_token, -1e9, 0.0).astype(jnp.float32)[:, None, :]


def transformer_forward(params, enc_in, dec_in, *, num_heads, pad_token):
    d_model = params["encoder"]["emb"].shape[1]
    B, S_enc = enc_in.shape
    S_dec = dec_in.shape[1]

    enc_kbias = make_key_bias(enc_in, pad_token)   # encoder self-attn & cross-attn keys
    dec_kbias = make_key_bias(dec_in, pad_token)   # decoder self-attn (+ causal in-kernel)

    pe = params["pos_enc"]
    scale = math.sqrt(d_model)

    # ----- Encoder -----
    x = jnp.take(params["encoder"]["emb"], enc_in, axis=0) * scale + pe[:S_enc][None]
    x = x.astype(jnp.bfloat16)
    for lyr in params["encoder"]["layers"]:
        x = encoder_layer(x, enc_kbias, lyr, num_heads)
    enc_out = x

    # ----- Decoder -----
    y = jnp.take(params["decoder"]["emb"], dec_in, axis=0) * scale + pe[:S_dec][None]
    y = y.astype(jnp.bfloat16)
    for lyr in params["decoder"]["layers"]:
        y = decoder_layer(y, enc_out, enc_kbias, dec_kbias, lyr, num_heads)

    # final projection to decoder vocab (f32 logits)
    logits = dense(y.reshape(B * S_dec, d_model),
                   params["decoder"]["final_w"], params["decoder"]["final_b"],
                   out_dtype=jnp.float32)
    # TODO(synk): reference repo may apply a final softmax; raw logits returned here.
    return logits.reshape(B, S_dec, -1)


# ----------------------------------------------------------------------------
# Deterministic parameter init.
# Linear weights are stored bf16 (MXU operands) and biases as [1, N] f32 once,
# so dense() never re-pads / re-casts per forward pass.
# ----------------------------------------------------------------------------
def init_params(key, *, num_layers, d_model, num_heads, dff,
                encoder_vocab_size, decoder_vocab_size, max_len):
    keys = iter(jax.random.split(key, 4096))

    def lin(fan_in, fan_out):
        s = 1.0 / math.sqrt(fan_in)
        w = jax.random.uniform(next(keys), (fan_in, fan_out), jnp.float32, -s, s)
        b = jax.random.uniform(next(keys), (1, fan_out), jnp.float32, -s, s)
        return w.astype(jnp.bfloat16), b

    def self_mha_params():
        w_qkv, b_qkv = lin(d_model, 3 * d_model)
        wo, bo = lin(d_model, d_model)
        return {"w_qkv": w_qkv, "b_qkv": b_qkv, "wo": wo, "bo": bo}

    def cross_mha_params():
        wq, bq = lin(d_model, d_model)
        w_kv, b_kv = lin(d_model, 2 * d_model)
        wo, bo = lin(d_model, d_model)
        return {"wq": wq, "bq": bq, "w_kv": w_kv, "b_kv": b_kv, "wo": wo, "bo": bo}

    def ffn_params():
        w1, b1 = lin(d_model, dff)
        w2, b2 = lin(dff, d_model)
        return {"w1": w1, "b1": b1, "w2": w2, "b2": b2}

    def ln_params():
        return (jnp.ones((1, d_model), jnp.float32),
                jnp.zeros((1, d_model), jnp.float32))

    def enc_layer():
        g1, b1 = ln_params()
        g2, b2 = ln_params()
        return {"mha": self_mha_params(), "ffn": ffn_params(),
                "ln1_g": g1, "ln1_b": b1, "ln2_g": g2, "ln2_b": b2}

    def dec_layer():
        g1, b1 = ln_params()
        g2, b2 = ln_params()
        g3, b3 = ln_params()
        return {"self_mha": self_mha_params(), "cross_mha": cross_mha_params(),
                "ffn": ffn_params(),
                "ln1_g": g1, "ln1_b": b1, "ln2_g": g2, "ln2_b": b2,
                "ln3_g": g3, "ln3_b": b3}

    enc_emb = jax.random.normal(next(keys), (encoder_vocab_size, d_model),
                                jnp.float32) * 0.02
    dec_emb = jax.random.normal(next(keys), (decoder_vocab_size, d_model),
                                jnp.float32) * 0.02
    final_w, final_b = lin(d_model, decoder_vocab_size)

    return {
        "pos_enc": positional_encoding(max_len, d_model),
        "encoder": {"emb": enc_emb, "layers": [enc_layer() for _ in range(num_layers)]},
        "decoder": {"emb": dec_emb, "layers": [dec_layer() for _ in range(num_layers)],
                    "final_w": final_w, "final_b": final_b},
    }


# ----------------------------------------------------------------------------
# Main
# ----------------------------------------------------------------------------
if __name__ == "__main__":
    B, S_enc, S_dec = 2, 8, 8
    d_model, num_heads, dff, num_layers = 32, 4, 64, 2
    encoder_vocab_size, decoder_vocab_size = 50, 60
    pad_token, max_len = 0, 64

    key = jax.random.PRNGKey(0)
    k_enc, k_dec, k_par = jax.random.split(key, 3)

    enc_in = jax.random.randint(k_enc, (B, S_enc), 1, encoder_vocab_size).astype(jnp.int32)
    dec_in = jax.random.randint(k_dec, (B, S_dec), 1, decoder_vocab_size).astype(jnp.int32)
    enc_in = enc_in.at[:, -2:].set(pad_token)   # introduce some padding
    dec_in = dec_in.at[:, -1:].set(pad_token)

    params = init_params(
        k_par, num_layers=num_layers, d_model=d_model, num_heads=num_heads,
        dff=dff, encoder_vocab_size=encoder_vocab_size,
        decoder_vocab_size=decoder_vocab_size, max_len=max_len)

    fwd = jax.jit(functools.partial(transformer_forward,
                                    num_heads=num_heads, pad_token=pad_token))
    out = fwd(params, enc_in, dec_in)
    jax.block_until_ready(out)

    assert out.shape == (B, S_dec, decoder_vocab_size), out.shape
    assert bool(jnp.all(jnp.isfinite(out)))
    print("KERNEL_OK")
</pallas_src>

<mosaic_0001>
module attributes {stable_mosaic.version = 11 : i64} {
  func.func @_self_attn_kernel(%arg0: i32, %arg1: memref<1x8x96xbf16, #tpu.memory_space<vmem>>, %arg2: memref<1x1x8xf32, #tpu.memory_space<vmem>>, %arg3: memref<1x8x32xbf16, #tpu.memory_space<vmem>>) attributes {dimension_semantics = [#tpu.dimension_semantics<parallel>], iteration_bounds = array<i64: 2>, scalar_prefetch = 0 : i64, scratch_operands = 0 : i64, tpu.core_type = #tpu.core_type<tc>, window_params = [{transform_indices = @transform_0, window_bounds = array<i64: 1, 8, 96>}, {transform_indices = @transform_1, window_bounds = array<i64: 1, 1, 8>}, {transform_indices = @transform_2, window_bounds = array<i64: 1, 8, 32>}]} {
    %c0 = arith.constant 0 : index
    %c0_0 = arith.constant 0 : index
    %c0_1 = arith.constant 0 : index
    %0 = vector.load %arg1[%c0, %c0_0, %c0_1] : memref<1x8x96xbf16, #tpu.memory_space<vmem>>, vector<1x8x96xbf16>
    %1 = vector.shape_cast %0 : vector<1x8x96xbf16> to vector<8x96xbf16>
    %c0_2 = arith.constant 0 : index
    %c0_3 = arith.constant 0 : index
    %c0_4 = arith.constant 0 : index
    %2 = vector.load %arg2[%c0_2, %c0_3, %c0_4] : memref<1x1x8xf32, #tpu.memory_space<vmem>>, vector<1x1x8xf32>
    %3 = vector.shape_cast %2 : vector<1x1x8xf32> to vector<1x8xf32>
    %4 = vector.shape_cast %3 : vector<1x8xf32> to vector<1x8xf32>
    %5 = vector.broadcast %4 : vector<1x8xf32> to vector<8x8xf32>
    %6 = vector.extract_strided_slice %1 {offsets = [0, 0], sizes = [8, 32], strides = [1, 1]} : vector<8x96xbf16> to vector<8x32xbf16>
    %7 = vector.extract_strided_slice %1 {offsets = [0, 32], sizes = [8, 32], strides = [1, 1]} : vector<8x96xbf16> to vector<8x32xbf16>
    %8 = vector.extract_strided_slice %1 {offsets = [0, 64], sizes = [8, 32], strides = [1, 1]} : vector<8x96xbf16> to vector<8x32xbf16>
    %9 = vector.extract_strided_slice %6 {offsets = [0, 0], sizes = [8, 8], strides = [1, 1]} : vector<8x32xbf16> to vector<8x8xbf16>
    %10 = arith.extf %9 : vector<8x8xbf16> to vector<8x8xf32>
    %cst = arith.constant 0.353553385 : f32
    %11 = vector.broadcast %cst : f32 to vector<8x8xf32>
    %12 = arith.mulf %10, %11 : vector<8x8xf32>
    %13 = arith.truncf %12 : vector<8x8xf32> to vector<8x8xbf16>
    %14 = vector.extract_strided_slice %7 {offsets = [0, 0], sizes = [8, 8], strides = [1, 1]} : vector<8x32xbf16> to vector<8x8xbf16>
    %15 = vector.extract_strided_slice %8 {offsets = [0, 0], sizes = [8, 8], strides = [1, 1]} : vector<8x32xbf16> to vector<8x8xbf16>
    %cst_5 = arith.constant dense<0.000000e+00> : vector<8x8xf32>
    %16 = tpu.matmul %13, %14, %cst_5 {dimension_numbers = #tpu.dot_dimension_numbers<[1], [1], [0], [0], [0, 0, 1, 0], [], []>} : vector<8x8xbf16>, vector<8x8xbf16>, vector<8x8xf32> -> vector<8x8xf32>
    %17 = arith.addf %16, %5 : vector<8x8xf32>
    %cst_6 = arith.constant dense<0xFF800000> : vector<8xf32>
    %18 = vector.multi_reduction <maximumf>, %17, %cst_6 [1] : vector<8x8xf32> to vector<8xf32>
    %19 = vector.shape_cast %18 : vector<8xf32> to vector<8x1xf32>
    %20 = vector.broadcast %19 : vector<8x1xf32> to vector<8x8xf32>
    %21 = arith.subf %17, %20 : vector<8x8xf32>
    %22 = math.exp %21 : vector<8x8xf32>
    %cst_7 = arith.constant dense<0.000000e+00> : vector<8xf32>
    %23 = vector.multi_reduction <add>, %22, %cst_7 [1] : vector<8x8xf32> to vector<8xf32>
    %24 = vector.shape_cast %23 : vector<8xf32> to vector<8x1xf32>
    %25 = tpu.reciprocal %24 {approx = true} : vector<8x1xf32> -> vector<8x1xf32>
    %26 = vector.broadcast %25 : vector<8x1xf32> to vector<8x8xf32>
    %27 = arith.mulf %22, %26 : vector<8x8xf32>
    %28 = arith.truncf %27 : vector<8x8xf32> to vector<8x8xbf16>
    %cst_8 = arith.constant dense<0.000000e+00> : vector<8x8xf32>
    %29 = tpu.matmul %28, %15, %cst_8 {dimension_numbers = #tpu.dot_dimension_numbers<[1], [0], [0], [1], [0, 0, 1, 1], [], []>} : vector<8x8xbf16>, vector<8x8xbf16>, vector<8x8xf32> -> vector<8x8xf32>
    %30 = vector.extract_strided_slice %6 {offsets = [0, 8], sizes = [8, 8], strides = [1, 1]} : vector<8x32xbf16> to vector<8x8xbf16>
    %31 = arith.extf %30 : vector<8x8xbf16> to vector<8x8xf32>
    %cst_9 = arith.constant 0.353553385 : f32
    %32 = vector.broadcast %cst_9 : f32 to vector<8x8xf32>
    %33 = arith.mulf %31, %32 : vector<8x8xf32>
    %34 = arith.truncf %33 : vector<8x8xf32> to vector<8x8xbf16>
    %35 = vector.extract_strided_slice %7 {offsets = [0, 8], sizes = [8, 8], strides = [1, 1]} : vector<8x32xbf16> to vector<8x8xbf16>
    %36 = vector.extract_strided_slice %8 {offsets = [0, 8], sizes = [8, 8], strides = [1, 1]} : vector<8x32xbf16> to vector<8x8xbf16>
    %cst_10 = arith.constant dense<0.000000e+00> : vector<8x8xf32>
    %37 = tpu.matmul %34, %35, %cst_10 {dimension_numbers = #tpu.dot_dimension_numbers<[1], [1], [0], [0], [0, 0, 1, 0], [], []>} : vector<8x8xbf16>, vector<8x8xbf16>, vector<8x8xf32> -> vector<8x8xf32>
    %38 = arith.addf %37, %5 : vector<8x8xf32>
    %cst_11 = arith.constant dense<0xFF800000> : vector<8xf32>
    %39 = vector.multi_reduction <maximumf>, %38, %cst_11 [1] : vector<8x8xf32> to vector<8xf32>
    %40 = vector.shape_cast %39 : vector<8xf32> to vector<8x1xf32>
    %41 = vector.broadcast %40 : vector<8x1xf32> to vector<8x8xf32>
    %42 = arith.subf %38, %41 : vector<8x8xf32>
    %43 = math.exp %42 : vector<8x8xf32>
    %cst_12 = arith.constant dense<0.000000e+00> : vector<8xf32>
    %44 = vector.multi_reduction <add>, %43, %cst_12 [1] : vector<8x8xf32> to vector<8xf32>
    %45 = vector.shape_cast %44 : vector<8xf32> to vector<8x1xf32>
    %46 = tpu.reciprocal %45 {approx = true} : vector<8x1xf32> -> vector<8x1xf32>
    %47 = vector.broadcast %46 : vector<8x1xf32> to vector<8x8xf32>
    %48 = arith.mulf %43, %47 : vector<8x8xf32>
    %49 = arith.truncf %48 : vector<8x8xf32> to vector<8x8xbf16>
    %cst_13 = arith.constant dense<0.000000e+00> : vector<8x8xf32>
    %50 = tpu.matmul %49, %36, %cst_13 {dimension_numbers = #tpu.dot_dimension_numbers<[1], [0], [0], [1], [0, 0, 1, 1], [], []>} : vector<8x8xbf16>, vector<8x8xbf16>, vector<8x8xf32> -> vector<8x8xf32>
    %51 = vector.extract_strided_slice %6 {offsets = [0, 16], sizes = [8, 8], strides = [1, 1]} : vector<8x32xbf16> to vector<8x8xbf16>
    %52 = arith.extf %51 : vector<8x8xbf16> to vector<8x8xf32>
    %cst_14 = arith.constant 0.353553385 : f32
    %53 = vector.broadcast %cst_14 : f32 to vector<8x8xf32>
    %54 = arith.mulf %52, %53 : vector<8x8xf32>
    %55 = arith.truncf %54 : vector<8x8xf32> to vector<8x8xbf16>
    %56 = vector.extract_strided_slice %7 {offsets = [0, 16], sizes = [8, 8], strides = [1, 1]} : vector<8x32xbf16> to vector<8x8xbf16>
    %57 = vector.extract_strided_slice %8 {offsets = [0, 16], sizes = [8, 8], strides = [1, 1]} : vector<8x32xbf16> to vector<8x8xbf16>
    %cst_15 = arith.constant dense<0.000000e+00> : vector<8x8xf32>
    %58 = tpu.matmul %55, %56, %cst_15 {dimension_numbers = #tpu.dot_dimension_numbers<[1], [1], [0], [0], [0, 0, 1, 0], [], []>} : vector<8x8xbf16>, vector<8x8xbf16>, vector<8x8xf32> -> vector<8x8xf32>
    %59 = arith.addf %58, %5 : vector<8x8xf32>
    %cst_16 = arith.constant dense<0xFF800000> : vector<8xf32>
    %60 = vector.multi_reduction <maximumf>, %59, %cst_16 [1] : vector<8x8xf32> to vector<8xf32>
    %61 = vector.shape_cast %60 : vector<8xf32> to vector<8x1xf32>
    %62 = vector.broadcast %61 : vector<8x1xf32> to vector<8x8xf32>
    %63 = arith.subf %59, %62 : vector<8x8xf32>
    %64 = math.exp %63 : vector<8x8xf32>
    %cst_17 = arith.constant dense<0.000000e+00> : vector<8xf32>
    %65 = vector.multi_reduction <add>, %64, %cst_17 [1] : vector<8x8xf32> to vector<8xf32>
    %66 = vector.shape_cast %65 : vector<8xf32> to vector<8x1xf32>
    %67 = tpu.reciprocal %66 {approx = true} : vector<8x1xf32> -> vector<8x1xf32>
    %68 = vector.broadcast %67 : vector<8x1xf32> to vector<8x8xf32>
    %69 = arith.mulf %64, %68 : vector<8x8xf32>
    %70 = arith.truncf %69 : vector<8x8xf32> to vector<8x8xbf16>
    %cst_18 = arith.constant dense<0.000000e+00> : vector<8x8xf32>
    %71 = tpu.matmul %70, %57, %cst_18 {dimension_numbers = #tpu.dot_dimension_numbers<[1], [0], [0], [1], [0, 0, 1, 1], [], []>} : vector<8x8xbf16>, vector<8x8xbf16>, vector<8x8xf32> -> vector<8x8xf32>
    %72 = vector.extract_strided_slice %6 {offsets = [0, 24], sizes = [8, 8], strides = [1, 1]} : vector<8x32xbf16> to vector<8x8xbf16>
    %73 = arith.extf %72 : vector<8x8xbf16> to vector<8x8xf32>
    %cst_19 = arith.constant 0.353553385 : f32
    %74 = vector.broadcast %cst_19 : f32 to vector<8x8xf32>
    %75 = arith.mulf %73, %74 : vector<8x8xf32>
    %76 = arith.truncf %75 : vector<8x8xf32> to vector<8x8xbf16>
    %77 = vector.extract_strided_slice %7 {offsets = [0, 24], sizes = [8, 8], strides = [1, 1]} : vector<8x32xbf16> to vector<8x8xbf16>
    %78 = vector.extract_strided_slice %8 {offsets = [0, 24], sizes = [8, 8], strides = [1, 1]} : vector<8x32xbf16> to vector<8x8xbf16>
    %cst_20 = arith.constant dense<0.000000e+00> : vector<8x8xf32>
    %79 = tpu.matmul %76, %77, %cst_20 {dimension_numbers = #tpu.dot_dimension_numbers<[1], [1], [0], [0], [0, 0, 1, 0], [], []>} : vector<8x8xbf16>, vector<8x8xbf16>, vector<8x8xf32> -> vector<8x8xf32>
    %80 = arith.addf %79, %5 : vector<8x8xf32>
    %cst_21 = arith.constant dense<0xFF800000> : vector<8xf32>
    %81 = vector.multi_reduction <maximumf>, %80, %cst_21 [1] : vector<8x8xf32> to vector<8xf32>
    %82 = vector.shape_cast %81 : vector<8xf32> to vector<8x1xf32>
    %83 = vector.broadcast %82 : vector<8x1xf32> to vector<8x8xf32>
    %84 = arith.subf %80, %83 : vector<8x8xf32>
    %85 = math.exp %84 : vector<8x8xf32>
    %cst_22 = arith.constant dense<0.000000e+00> : vector<8xf32>
    %86 = vector.multi_reduction <add>, %85, %cst_22 [1] : vector<8x8xf32> to vector<8xf32>
    %87 = vector.shape_cast %86 : vector<8xf32> to vector<8x1xf32>
    %88 = tpu.reciprocal %87 {approx = true} : vector<8x1xf32> -> vector<8x1xf32>
    %89 = vector.broadcast %88 : vector<8x1xf32> to vector<8x8xf32>
    %90 = arith.mulf %85, %89 : vector<8x8xf32>
    %91 = arith.truncf %90 : vector<8x8xf32> to vector<8x8xbf16>
    %cst_23 = arith.constant dense<0.000000e+00> : vector<8x8xf32>
    %92 = tpu.matmul %91, %78, %cst_23 {dimension_numbers = #tpu.dot_dimension_numbers<[1], [0], [0], [1], [0, 0, 1, 1], [], []>} : vector<8x8xbf16>, vector<8x8xbf16>, vector<8x8xf32> -> vector<8x8xf32>
    %93 = tpu.concatenate %29, %50, %71, %92 in 1 : vector<8x8xf32>, vector<8x8xf32>, vector<8x8xf32>, vector<8x8xf32> -> vector<8x32xf32>
    %94 = arith.truncf %93 : vector<8x32xf32> to vector<8x32xbf16>
    %c0_24 = arith.constant 0 : index
    %c0_25 = arith.constant 0 : index
    %c0_26 = arith.constant 0 : index
    %95 = vector.load %arg3[%c0_24, %c0_25, %c0_26] : memref<1x8x32xbf16, #tpu.memory_space<vmem>>, vector<1x8x32xbf16>
    %96 = vector.shape_cast %95 : vector<1x8x32xbf16> to vector<8x32xbf16>
    %97 = vector.shape_cast %94 : vector<8x32xbf16> to vector<1x8x32xbf16>
    tpu.vector_store %arg3[%c0_24, %c0_25, %c0_26], %97 {strides = array<i32>} : memref<1x8x32xbf16, #tpu.memory_space<vmem>>, vector<1x8x32xbf16>,
    return
  }
  func.func @transform_0(%arg0: i32) -> (i32, i32, i32) {
    %c0_i32 = arith.constant 0 : i32
    %c0_i32_0 = arith.constant 0 : i32
    %c0_i32_1 = arith.constant 0 : i32
    return %arg0, %c0_i32, %c0_i32_0 : i32, i32, i32
  }
  func.func @transform_1(%arg0: i32) -> (i32, i32, i32) {
    %c0_i32 = arith.constant 0 : i32
    %c0_i32_0 = arith.constant 0 : i32
    %c0_i32_1 = arith.constant 0 : i32
    return %arg0, %c0_i32, %c0_i32_0 : i32, i32, i32
  }
  func.func @transform_2(%arg0: i32) -> (i32, i32, i32) {
    %c0_i32 = arith.constant 0 : i32
    %c0_i32_0 = arith.constant 0 : i32
    %c0_i32_1 = arith.constant 0 : i32
    return %arg0, %c0_i32, %c0_i32_0 : i32, i32, i32
  }
}

module attributes {stable_mosaic.version = 11 : i64} {
  func.func @_dense_kernel(%arg0: i32, %arg1: i32, %arg2: i32, %arg3: memref<16x32xbf16, #tpu.memory_space<vmem>>, %arg4: memref<32x32xbf16, #tpu.memory_space<vmem>>, %arg5: memref<1x32xf32, #tpu.memory_space<vmem>>, %arg6: memref<16x32xbf16, #tpu.memory_space<vmem>>, %arg7: memref<16x32xf32, #tpu.memory_space<vmem>>) attributes {dimension_semantics = [#tpu.dimension_semantics<parallel>, #tpu.dimension_semantics<parallel>, #tpu.dimension_semantics<arbitrary>], iteration_bounds = array<i64: 1, 1, 1>, scalar_prefetch = 0 : i64, scratch_operands = 1 : i64, tpu.core_type = #tpu.core_type<tc>, window_params = [{transform_indices = @transform_0, window_bounds = array<i64: 16, 32>}, {transform_indices = @transform_1, window_bounds = array<i64: 32, 32>}, {transform_indices = @transform_2, window_bounds = array<i64: 1, 32>}, {transform_indices = @transform_3, window_bounds = array<i64: 16, 32>}]} {
    %c0_i32 = arith.constant 0 : i32
    %0 = arith.cmpi eq, %arg2, %c0_i32 : i32
    %1 = arith.extui %0 : i1 to i32
    %c0_i32_0 = arith.constant 0 : i32
    %2 = arith.cmpi ne, %1, %c0_i32_0 : i32
    scf.if %2 {
      %cst_10 = arith.constant 0.000000e+00 : f32
      %12 = vector.broadcast %cst_10 : f32 to vector<16x32xf32>
      %c0_11 = arith.constant 0 : index
      %c0_12 = arith.constant 0 : index
      %13 = vector.load %arg7[%c0_11, %c0_12] : memref<16x32xf32, #tpu.memory_space<vmem>>, vector<16x32xf32>
      tpu.vector_store %arg7[%c0_11, %c0_12], %12 {strides = array<i32>} : memref<16x32xf32, #tpu.memory_space<vmem>>, vector<16x32xf32>,
    } else {
    }
    %c0 = arith.constant 0 : index
    %c0_1 = arith.constant 0 : index
    %3 = vector.load %arg7[%c0, %c0_1] : memref<16x32xf32, #tpu.memory_space<vmem>>, vector<16x32xf32>
    %c0_2 = arith.constant 0 : index
    %c0_3 = arith.constant 0 : index
    %4 = vector.load %arg3[%c0_2, %c0_3] : memref<16x32xbf16, #tpu.memory_space<vmem>>, vector<16x32xbf16>
    %c0_4 = arith.constant 0 : index
    %c0_5 = arith.constant 0 : index
    %5 = vector.load %arg4[%c0_4, %c0_5] : memref<32x32xbf16, #tpu.memory_space<vmem>>, vector<32x32xbf16>
    %cst = arith.constant dense<0.000000e+00> : vector<16x32xf32>
    %6 = tpu.matmul %4, %5, %cst {dimension_numbers = #tpu.dot_dimension_numbers<[1], [0], [0], [1], [0, 0, 1, 1], [], []>} : vector<16x32xbf16>, vector<32x32xbf16>, vector<16x32xf32> -> vector<16x32xf32>
    %7 = arith.addf %3, %6 : vector<16x32xf32>
    %c0_6 = arith.constant 0 : index
    %c0_7 = arith.constant 0 : index
    %8 = vector.load %arg7[%c0_6, %c0_7] : memref<16x32xf32, #tpu.memory_space<vmem>>, vector<16x32xf32>
    tpu.vector_store %arg7[%c0_6, %c0_7], %7 {strides = array<i32>} : memref<16x32xf32, #tpu.memory_space<vmem>>, vector<16x32xf32>,
    %c0_i32_8 = arith.constant 0 : i32
    %9 = arith.cmpi eq, %arg2, %c0_i32_8 : i32
    %10 = arith.extui %9 : i1 to i32
    %c0_i32_9 = arith.constant 0 : i32
    %11 = arith.cmpi ne, %10, %c0_i32_9 : i32
    scf.if %11 {
      %c0_10 = arith.constant 0 : index
      %c0_11 = arith.constant 0 : index
      %12 = vector.load %arg7[%c0_10, %c0_11] : memref<16x32xf32, #tpu.memory_space<vmem>>, vector<16x32xf32>
      %c0_12 = arith.constant 0 : index
      %c0_13 = arith.constant 0 : index
      %13 = vector.load %arg5[%c0_12, %c0_13] : memref<1x32xf32, #tpu.memory_space<vmem>>, vector<1x32xf32>
      %14 = vector.broadcast %13 : vector<1x32xf32> to vector<16x32xf32>
      %15 = arith.addf %12, %14 : vector<16x32xf32>
      %16 = arith.truncf %15 : vector<16x32xf32> to vector<16x32xbf16>
      %c0_14 = arith.constant 0 : index
      %c0_15 = arith.constant 0 : index
      %17 = vector.load %arg6[%c0_14, %c0_15] : memref<16x32xbf16, #tpu.memory_space<vmem>>, vector<16x32xbf16>
      tpu.vector_store %arg6[%c0_14, %c0_15], %16 {strides = array<i32>} : memref<16x32xbf16, #tpu.memory_space<vmem>>, vector<16x32xbf16>,
    } else {
    }
    return
  }
  func.func @transform_0(%arg0: i32, %arg1: i32, %arg2: i32) -> (i32, i32) {
    %c0_i32 = arith.constant 0 : i32
    return %arg0, %arg2 : i32, i32
  }
  func.func @transform_1(%arg0: i32, %arg1: i32, %arg2: i32) -> (i32, i32) {
    %c0_i32 = arith.constant 0 : i32
    return %arg2, %arg1 : i32, i32
  }
  func.func @transform_2(%arg0: i32, %arg1: i32, %arg2: i32) -> (i32, i32) {
    %c0_i32 = arith.constant 0 : i32
    %c0_i32_0 = arith.constant 0 : i32
    return %c0_i32, %arg1 : i32, i32
  }
  func.func @transform_3(%arg0: i32, %arg1: i32, %arg2: i32) -> (i32, i32) {
    %c0_i32 = arith.constant 0 : i32
    return %arg0, %arg1 : i32, i32
  }
}

module attributes {stable_mosaic.version = 11 : i64} {
  func.func @_dense_kernel(%arg0: i32, %arg1: i32, %arg2: i32, %arg3: memref<16x32xbf16, #tpu.memory_space<vmem>>, %arg4: memref<32x96xbf16, #tpu.memory_space<vmem>>, %arg5: memref<1x96xf32, #tpu.memory_space<vmem>>, %arg6: memref<16x96xbf16, #tpu.memory_space<vmem>>, %arg7: memref<16x96xf32, #tpu.memory_space<vmem>>) attributes {dimension_semantics = [#tpu.dimension_semantics<parallel>, #tpu.dimension_semantics<parallel>, #tpu.dimension_semantics<arbitrary>], iteration_bounds = array<i64: 1, 1, 1>, scalar_prefetch = 0 : i64, scratch_operands = 1 : i64, tpu.core_type = #tpu.core_type<tc>, window_params = [{transform_indices = @transform_0, window_bounds = array<i64: 16, 32>}, {transform_indices = @transform_1, window_bounds = array<i64: 32, 96>}, {transform_indices = @transform_2, window_bounds = array<i64: 1, 96>}, {transform_indices = @transform_3, window_bounds = array<i64: 16, 96>}]} {
    %c0_i32 = arith.constant 0 : i32
    %0 = arith.cmpi eq, %arg2, %c0_i32 : i32
    %1 = arith.extui %0 : i1 to i32
    %c0_i32_0 = arith.constant 0 : i32
    %2 = arith.cmpi ne, %1, %c0_i32_0 : i32
    scf.if %2 {
      %cst_10 = arith.constant 0.000000e+00 : f32
      %12 = vector.broadcast %cst_10 : f32 to vector<16x96xf32>
      %c0_11 = arith.constant 0 : index
      %c0_12 = arith.constant 0 : index
      %13 = vector.load %arg7[%c0_11, %c0_12] : memref<16x96xf32, #tpu.memory_space<vmem>>, vector<16x96xf32>
      tpu.vector_store %arg7[%c0_11, %c0_12], %12 {strides = array<i32>} : memref<16x96xf32, #tpu.memory_space<vmem>>, vector<16x96xf32>,
    } else {
    }
    %c0 = arith.constant 0 : index
    %c0_1 = arith.constant 0 : index
    %3 = vector.load %arg7[%c0, %c0_1] : memref<16x96xf32, #tpu.memory_space<vmem>>, vector<16x96xf32>
    %c0_2 = arith.constant 0 : index
    %c0_3 = arith.constant 0 : index
    %4 = vector.load %arg3[%c0_2, %c0_3] : memref<16x32xbf16, #tpu.memory_space<vmem>>, vector<16x32xbf16>
    %c0_4 = arith.constant 0 : index
    %c0_5 = arith.constant 0 : index
    %5 = vector.load %arg4[%c0_4, %c0_5] : memref<32x96xbf16, #tpu.memory_space<vmem>>, vector<32x96xbf16>
    %cst = arith.constant dense<0.000000e+00> : vector<16x96xf32>
    %6 = tpu.matmul %4, %5, %cst {dimension_numbers = #tpu.dot_dimension_numbers<[1], [0], [0], [1], [0, 0, 1, 1], [], []>} : vector<16x32xbf16>, vector<32x96xbf16>, vector<16x96xf32> -> vector<16x96xf32>
    %7 = arith.addf %3, %6 : vector<16x96xf32>
    %c0_6 = arith.constant 0 : index
    %c0_7 = arith.constant 0 : index
    %8 = vector.load %arg7[%c0_6, %c0_7] : memref<16x96xf32, #tpu.memory_space<vmem>>, vector<16x96xf32>
    tpu.vector_store %arg7[%c0_6, %c0_7], %7 {strides = array<i32>} : memref<16x96xf32, #tpu.memory_space<vmem>>, vector<16x96xf32>,
    %c0_i32_8 = arith.constant 0 : i32
    %9 = arith.cmpi eq, %arg2, %c0_i32_8 : i32
    %10 = arith.extui %9 : i1 to i32
    %c0_i32_9 = arith.constant 0 : i32
    %11 = arith.cmpi ne, %10, %c0_i32_9 : i32
    scf.if %11 {
      %c0_10 = arith.constant 0 : index
      %c0_11 = arith.constant 0 : index
      %12 = vector.load %arg7[%c0_10, %c0_11] : memref<16x96xf32, #tpu.memory_space<vmem>>, vector<16x96xf32>
      %c0_12 = arith.constant 0 : index
      %c0_13 = arith.constant 0 : index
      %13 = vector.load %arg5[%c0_12, %c0_13] : memref<1x96xf32, #tpu.memory_space<vmem>>, vector<1x96xf32>
      %14 = vector.broadcast %13 : vector<1x96xf32> to vector<16x96xf32>
      %15 = arith.addf %12, %14 : vector<16x96xf32>
      %16 = arith.truncf %15 : vector<16x96xf32> to vector<16x96xbf16>
      %c0_14 = arith.constant 0 : index
      %c0_15 = arith.constant 0 : index
      %17 = vector.load %arg6[%c0_14, %c0_15] : memref<16x96xbf16, #tpu.memory_space<vmem>>, vector<16x96xbf16>
      tpu.vector_store %arg6[%c0_14, %c0_15], %16 {strides = array<i32>} : memref<16x96xbf16, #tpu.memory_space<vmem>>, vector<16x96xbf16>,
    } else {
    }
    return
  }
  func.func @transform_0(%arg0: i32, %arg1: i32, %arg2: i32) -> (i32, i32) {
    %c0_i32 = arith.constant 0 : i32
    return %arg0, %arg2 : i32, i32
  }
  func.func @transform_1(%arg0: i32, %arg1: i32, %arg2: i32) -> (i32, i32) {
    %c0_i32 = arith.constant 0 : i32
    return %arg2, %arg1 : i32, i32
  }
  func.func @transform_2(%arg0: i32, %arg1: i32, %arg2: i32) -> (i32, i32) {
    %c0_i32 = arith.constant 0 : i32
    %c0_i32_0 = arith.constant 0 : i32
    return %c0_i32, %arg1 : i32, i32
  }
  func.func @transform_3(%arg0: i32, %arg1: i32, %arg2: i32) -> (i32, i32) {
    %c0_i32 = arith.constant 0 : i32
    return %arg0, %arg1 : i32, i32
  }
}

module attributes {stable_mosaic.version = 11 : i64} {
  func.func @_add_ln_kernel(%arg0: i32, %arg1: memref<16x32xbf16, #tpu.memory_space<vmem>>, %arg2: memref<16x32xbf16, #tpu.memory_space<vmem>>, %arg3: memref<1x32xf32, #tpu.memory_space<vmem>>, %arg4: memref<1x32xf32, #tpu.memory_space<vmem>>, %arg5: memref<16x32xbf16, #tpu.memory_space<vmem>>) attributes {dimension_semantics = [#tpu.dimension_semantics<parallel>], iteration_bounds = array<i64: 1>, scalar_prefetch = 0 : i64, scratch_operands = 0 : i64, tpu.core_type = #tpu.core_type<tc>, window_params = [{transform_indices = @transform_0, window_bounds = array<i64: 16, 32>}, {transform_indices = @transform_1, window_bounds = array<i64: 16, 32>}, {pipeline_mode = #tpu.pipeline_mode<synchronous>, transform_indices = @transform_2, window_bounds = array<i64: 1, 32>}, {pipeline_mode = #tpu.pipeline_mode<synchronous>, transform_indices = @transform_3, window_bounds = array<i64: 1, 32>}, {transform_indices = @transform_4, window_bounds = array<i64: 16, 32>}]} {
    %c0 = arith.constant 0 : index
    %c0_0 = arith.constant 0 : index
    %0 = vector.load %arg1[%c0, %c0_0] : memref<16x32xbf16, #tpu.memory_space<vmem>>, vector<16x32xbf16>
    %1 = arith.extf %0 : vector<16x32xbf16> to vector<16x32xf32>
    %c0_1 = arith.constant 0 : index
    %c0_2 = arith.constant 0 : index
    %2 = vector.load %arg2[%c0_1, %c0_2] : memref<16x32xbf16, #tpu.memory_space<vmem>>, vector<16x32xbf16>
    %3 = arith.extf %2 : vector<16x32xbf16> to vector<16x32xf32>
    %4 = arith.addf %1, %3 : vector<16x32xf32>
    %cst = arith.constant dense<0.000000e+00> : vector<16xf32>
    %5 = vector.multi_reduction <add>, %4, %cst [1] : vector<16x32xf32> to vector<16xf32>
    %6 = vector.shape_cast %5 : vector<16xf32> to vector<16x1xf32>
    %cst_3 = arith.constant 3.200000e+01 : f32
    %7 = vector.broadcast %cst_3 : f32 to vector<16x1xf32>
    %8 = arith.divf %6, %7 : vector<16x1xf32>
    %9 = arith.mulf %4, %4 : vector<16x32xf32>
    %cst_4 = arith.constant dense<0.000000e+00> : vector<16xf32>
    %10 = vector.multi_reduction <add>, %9, %cst_4 [1] : vector<16x32xf32> to vector<16xf32>
    %11 = vector.shape_cast %10 : vector<16xf32> to vector<16x1xf32>
    %cst_5 = arith.constant 3.200000e+01 : f32
    %12 = vector.broadcast %cst_5 : f32 to vector<16x1xf32>
    %13 = arith.divf %11, %12 : vector<16x1xf32>
    %14 = arith.mulf %8, %8 : vector<16x1xf32>
    %15 = arith.subf %13, %14 : vector<16x1xf32>
    %cst_6 = arith.constant 0.000000e+00 : f32
    %16 = vector.broadcast %cst_6 : f32 to vector<16x1xf32>
    %17 = arith.maximumf %15, %16 : vector<16x1xf32>
    %18 = vector.broadcast %8 : vector<16x1xf32> to vector<16x32xf32>
    %19 = arith.subf %4, %18 : vector<16x32xf32>
    %cst_7 = arith.constant 9.99999974E-6 : f32
    %20 = vector.broadcast %cst_7 : f32 to vector<16x1xf32>
    %21 = arith.addf %17, %20 : vector<16x1xf32>
    %22 = math.rsqrt %21 : vector<16x1xf32>
    %23 = vector.broadcast %22 : vector<16x1xf32> to vector<16x32xf32>
    %24 = arith.mulf %19, %23 : vector<16x32xf32>
    %c0_8 = arith.constant 0 : index
    %c0_9 = arith.constant 0 : index
    %25 = vector.load %arg3[%c0_8, %c0_9] : memref<1x32xf32, #tpu.memory_space<vmem>>, vector<1x32xf32>
    %26 = vector.broadcast %25 : vector<1x32xf32> to vector<16x32xf32>
    %27 = arith.mulf %24, %26 : vector<16x32xf32>
    %c0_10 = arith.constant 0 : index
    %c0_11 = arith.constant 0 : index
    %28 = vector.load %arg4[%c0_10, %c0_11] : memref<1x32xf32, #tpu.memory_space<vmem>>, vector<1x32xf32>
    %29 = vector.broadcast %28 : vector<1x32xf32> to vector<16x32xf32>
    %30 = arith.addf %27, %29 : vector<16x32xf32>
    %31 = arith.truncf %30 : vector<16x32xf32> to vector<16x32xbf16>
    %c0_12 = arith.constant 0 : index
    %c0_13 = arith.constant 0 : index
    %32 = vector.load %arg5[%c0_12, %c0_13] : memref<16x32xbf16, #tpu.memory_space<vmem>>, vector<16x32xbf16>
    tpu.vector_store %arg5[%c0_12, %c0_13], %31 {strides = array<i32>} : memref<16x32xbf16, #tpu.memory_space<vmem>>, vector<16x32xbf16>,
    return
  }
  func.func @transform_0(%arg0: i32) -> (i32, i32) {
    %c0_i32 = arith.constant 0 : i32
    %c0_i32_0 = arith.constant 0 : i32
    return %arg0, %c0_i32 : i32, i32
  }
  func.func @transform_1(%arg0: i32) -> (i32, i32) {
    %c0_i32 = arith.constant 0 : i32
    %c0_i32_0 = arith.constant 0 : i32
    return %arg0, %c0_i32 : i32, i32
  }
  func.func @transform_2(%arg0: i32) -> (i32, i32) {
    %c0_i32 = arith.constant 0 : i32
    %c0_i32_0 = arith.constant 0 : i32
    %c0_i32_1 = arith.constant 0 : i32
    return %c0_i32, %c0_i32_0 : i32, i32
  }
  func.func @transform_3(%arg0: i32) -> (i32, i32) {
    %c0_i32 = arith.constant 0 : i32
    %c0_i32_0 = arith.constant 0 : i32
    %c0_i32_1 = arith.constant 0 : i32
    return %c0_i32, %c0_i32_0 : i32, i32
  }
  func.func @transform_4(%arg0: i32) -> (i32, i32) {
    %c0_i32 = arith.constant 0 : i32
    %c0_i32_0 = arith.constant 0 : i32
    return %arg0, %c0_i32 : i32, i32
  }
}

module attributes {stable_mosaic.version = 11 : i64} {
  func.func @_dense_kernel(%arg0: i32, %arg1: i32, %arg2: i32, %arg3: memref<16x32xbf16, #tpu.memory_space<vmem>>, %arg4: memref<32x64xbf16, #tpu.memory_space<vmem>>, %arg5: memref<1x64xf32, #tpu.memory_space<vmem>>, %arg6: memref<16x64xbf16, #tpu.memory_space<vmem>>, %arg7: memref<16x64xf32, #tpu.memory_space<vmem>>) attributes {dimension_semantics = [#tpu.dimension_semantics<parallel>, #tpu.dimension_semantics<parallel>, #tpu.dimension_semantics<arbitrary>], iteration_bounds = array<i64: 1, 1, 1>, scalar_prefetch = 0 : i64, scratch_operands = 1 : i64, tpu.core_type = #tpu.core_type<tc>, window_params = [{transform_indices = @transform_0, window_bounds = array<i64: 16, 32>}, {transform_indices = @transform_1, window_bounds = array<i64: 32, 64>}, {transform_indices = @transform_2, window_bounds = array<i64: 1, 64>}, {transform_indices = @transform_3, window_bounds = array<i64: 16, 64>}]} {
    %c0_i32 = arith.constant 0 : i32
    %0 = arith.cmpi eq, %arg2, %c0_i32 : i32
    %1 = arith.extui %0 : i1 to i32
    %c0_i32_0 = arith.constant 0 : i32
    %2 = arith.cmpi ne, %1, %c0_i32_0 : i32
    scf.if %2 {
      %cst_10 = arith.constant 0.000000e+00 : f32
      %12 = vector.broadcast %cst_10 : f32 to vector<16x64xf32>
      %c0_11 = arith.constant 0 : index
      %c0_12 = arith.constant 0 : index
      %13 = vector.load %arg7[%c0_11, %c0_12] : memref<16x64xf32, #tpu.memory_space<vmem>>, vector<16x64xf32>
      tpu.vector_store %arg7[%c0_11, %c0_12], %12 {strides = array<i32>} : memref<16x64xf32, #tpu.memory_space<vmem>>, vector<16x64xf32>,
    } else {
    }
    %c0 = arith.constant 0 : index
    %c0_1 = arith.constant 0 : index
    %3 = vector.load %arg7[%c0, %c0_1] : memref<16x64xf32, #tpu.memory_space<vmem>>, vector<16x64xf32>
    %c0_2 = arith.constant 0 : index
    %c0_3 = arith.constant 0 : index
    %4 = vector.load %arg3[%c0_2, %c0_3] : memref<16x32xbf16, #tpu.memory_space<vmem>>, vector<16x32xbf16>
    %c0_4 = arith.constant 0 : index
    %c0_5 = arith.constant 0 : index
    %5 = vector.load %arg4[%c0_4, %c0_5] : memref<32x64xbf16, #tpu.memory_space<vmem>>, vector<32x64xbf16>
    %cst = arith.constant dense<0.000000e+00> : vector<16x64xf32>
    %6 = tpu.matmul %4, %5, %cst {dimension_numbers = #tpu.dot_dimension_numbers<[1], [0], [0], [1], [0, 0, 1, 1], [], []>} : vector<16x32xbf16>, vector<32x64xbf16>, vector<16x64xf32> -> vector<16x64xf32>
    %7 = arith.addf %3, %6 : vector<16x64xf32>
    %c0_6 = arith.constant 0 : index
    %c0_7 = arith.constant 0 : index
    %8 = vector.load %arg7[%c0_6, %c0_7] : memref<16x64xf32, #tpu.memory_space<vmem>>, vector<16x64xf32>
    tpu.vector_store %arg7[%c0_6, %c0_7], %7 {strides = array<i32>} : memref<16x64xf32, #tpu.memory_space<vmem>>, vector<16x64xf32>,
    %c0_i32_8 = arith.constant 0 : i32
    %9 = arith.cmpi eq, %arg2, %c0_i32_8 : i32
    %10 = arith.extui %9 : i1 to i32
    %c0_i32_9 = arith.constant 0 : i32
    %11 = arith.cmpi ne, %10, %c0_i32_9 : i32
    scf.if %11 {
      %c0_10 = arith.constant 0 : index
      %c0_11 = arith.constant 0 : index
      %12 = vector.load %arg7[%c0_10, %c0_11] : memref<16x64xf32, #tpu.memory_space<vmem>>, vector<16x64xf32>
      %c0_12 = arith.constant 0 : index
      %c0_13 = arith.constant 0 : index
      %13 = vector.load %arg5[%c0_12, %c0_13] : memref<1x64xf32, #tpu.memory_space<vmem>>, vector<1x64xf32>
      %14 = vector.broadcast %13 : vector<1x64xf32> to vector<16x64xf32>
      %15 = arith.addf %12, %14 : vector<16x64xf32>
      %cst_14 = arith.constant 0.000000e+00 : f32
      %16 = vector.broadcast %cst_14 : f32 to vector<16x64xf32>
      %17 = arith.maximumf %15, %16 : vector<16x64xf32>
      %18 = arith.truncf %17 : vector<16x64xf32> to vector<16x64xbf16>
      %c0_15 = arith.constant 0 : index
      %c0_16 = arith.constant 0 : index
      %19 = vector.load %arg6[%c0_15, %c0_16] : memref<16x64xbf16, #tpu.memory_space<vmem>>, vector<16x64xbf16>
      tpu.vector_store %arg6[%c0_15, %c0_16], %18 {strides = array<i32>} : memref<16x64xbf16, #tpu.memory_space<vmem>>, vector<16x64xbf16>,
    } else {
    }
    return
  }
  func.func @transform_0(%arg0: i32, %arg1: i32, %arg2: i32) -> (i32, i32) {
    %c0_i32 = arith.constant 0 : i32
    return %arg0, %arg2 : i32, i32
  }
  func.func @transform_1(%arg0: i32, %arg1: i32, %arg2: i32) -> (i32, i32) {
    %c0_i32 = arith.constant 0 : i32
    return %arg2, %arg1 : i32, i32
  }
  func.func @transform_2(%arg0: i32, %arg1: i32, %arg2: i32) -> (i32, i32) {
    %c0_i32 = arith.constant 0 : i32
    %c0_i32_0 = arith.constant 0 : i32
    return %c0_i32, %arg1 : i32, i32
  }
  func.func @transform_3(%arg0: i32, %arg1: i32, %arg2: i32) -> (i32, i32) {
    %c0_i32 = arith.constant 0 : i32
    return %arg0, %arg1 : i32, i32
  }
}

module attributes {stable_mosaic.version = 11 : i64} {
  func.func @_dense_kernel(%arg0: i32, %arg1: i32, %arg2: i32, %arg3: memref<16x64xbf16, #tpu.memory_space<vmem>>, %arg4: memref<64x32xbf16, #tpu.memory_space<vmem>>, %arg5: memref<1x32xf32, #tpu.memory_space<vmem>>, %arg6: memref<16x32xbf16, #tpu.memory_space<vmem>>, %arg7: memref<16x32xf32, #tpu.memory_space<vmem>>) attributes {dimension_semantics = [#tpu.dimension_semantics<parallel>, #tpu.dimension_semantics<parallel>, #tpu.dimension_semantics<arbitrary>], iteration_bounds = array<i64: 1, 1, 1>, scalar_prefetch = 0 : i64, scratch_operands = 1 : i64, tpu.core_type = #tpu.core_type<tc>, window_params = [{transform_indices = @transform_0, window_bounds = array<i64: 16, 64>}, {transform_indices = @transform_1, window_bounds = array<i64: 64, 32>}, {transform_indices = @transform_2, window_bounds = array<i64: 1, 32>}, {transform_indices = @transform_3, window_bounds = array<i64: 16, 32>}]} {
    %c0_i32 = arith.constant 0 : i32
    %0 = arith.cmpi eq, %arg2, %c0_i32 : i32
    %1 = arith.extui %0 : i1 to i32
    %c0_i32_0 = arith.constant 0 : i32
    %2 = arith.cmpi ne, %1, %c0_i32_0 : i32
    scf.if %2 {
      %cst_10 = arith.constant 0.000000e+00 : f32
      %12 = vector.broadcast %cst_10 : f32 to vector<16x32xf32>
      %c0_11 = arith.constant 0 : index
      %c0_12 = arith.constant 0 : index
      %13 = vector.load %arg7[%c0_11, %c0_12] : memref<16x32xf32, #tpu.memory_space<vmem>>, vector<16x32xf32>
      tpu.vector_store %arg7[%c0_11, %c0_12], %12 {strides = array<i32>} : memref<16x32xf32, #tpu.memory_space<vmem>>, vector<16x32xf32>,
    } else {
    }
    %c0 = arith.constant 0 : index
    %c0_1 = arith.constant 0 : index
    %3 = vector.load %arg7[%c0, %c0_1] : memref<16x32xf32, #tpu.memory_space<vmem>>, vector<16x32xf32>
    %c0_2 = arith.constant 0 : index
    %c0_3 = arith.constant 0 : index
    %4 = vector.load %arg3[%c0_2, %c0_3] : memref<16x64xbf16, #tpu.memory_space<vmem>>, vector<16x64xbf16>
    %c0_4 = arith.constant 0 : index
    %c0_5 = arith.constant 0 : index
    %5 = vector.load %arg4[%c0_4, %c0_5] : memref<64x32xbf16, #tpu.memory_space<vmem>>, vector<64x32xbf16>
    %cst = arith.constant dense<0.000000e+00> : vector<16x32xf32>
    %6 = tpu.matmul %4, %5, %cst {dimension_numbers = #tpu.dot_dimension_numbers<[1], [0], [0], [1], [0, 0, 1, 1], [], []>} : vector<16x64xbf16>, vector<64x32xbf16>, vector<16x32xf32> -> vector<16x32xf32>
    %7 = arith.addf %3, %6 : vector<16x32xf32>
    %c0_6 = arith.constant 0 : index
    %c0_7 = arith.constant 0 : index
    %8 = vector.load %arg7[%c0_6, %c0_7] : memref<16x32xf32, #tpu.memory_space<vmem>>, vector<16x32xf32>
    tpu.vector_store %arg7[%c0_6, %c0_7], %7 {strides = array<i32>} : memref<16x32xf32, #tpu.memory_space<vmem>>, vector<16x32xf32>,
    %c0_i32_8 = arith.constant 0 : i32
    %9 = arith.cmpi eq, %arg2, %c0_i32_8 : i32
    %10 = arith.extui %9 : i1 to i32
    %c0_i32_9 = arith.constant 0 : i32
    %11 = arith.cmpi ne, %10, %c0_i32_9 : i32
    scf.if %11 {
      %c0_10 = arith.constant 0 : index
      %c0_11 = arith.constant 0 : index
      %12 = vector.load %arg7[%c0_10, %c0_11] : memref<16x32xf32, #tpu.memory_space<vmem>>, vector<16x32xf32>
      %c0_12 = arith.constant 0 : index
      %c0_13 = arith.constant 0 : index
      %13 = vector.load %arg5[%c0_12, %c0_13] : memref<1x32xf32, #tpu.memory_space<vmem>>, vector<1x32xf32>
      %14 = vector.broadcast %13 : vector<1x32xf32> to vector<16x32xf32>
      %15 = arith.addf %12, %14 : vector<16x32xf32>
      %16 = arith.truncf %15 : vector<16x32xf32> to vector<16x32xbf16>
      %c0_14 = arith.constant 0 : index
      %c0_15 = arith.constant 0 : index
      %17 = vector.load %arg6[%c0_14, %c0_15] : memref<16x32xbf16, #tpu.memory_space<vmem>>, vector<16x32xbf16>
      tpu.vector_store %arg6[%c0_14, %c0_15], %16 {strides = array<i32>} : memref<16x32xbf16, #tpu.memory_space<vmem>>, vector<16x32xbf16>,
    } else {
    }
    return
  }
  func.func @transform_0(%arg0: i32, %arg1: i32, %arg2: i32) -> (i32, i32) {
    %c0_i32 = arith.constant 0 : i32
    return %arg0, %arg2 : i32, i32
  }
  func.func @transform_1(%arg0: i32, %arg1: i32, %arg2: i32) -> (i32, i32) {
    %c0_i32 = arith.constant 0 : i32
    return %arg2, %arg1 : i32, i32
  }
  func.func @transform_2(%arg0: i32, %arg1: i32, %arg2: i32) -> (i32, i32) {
    %c0_i32 = arith.constant 0 : i32
    %c0_i32_0 = arith.constant 0 : i32
    return %c0_i32, %arg1 : i32, i32
  }
  func.func @transform_3(%arg0: i32, %arg1: i32, %arg2: i32) -> (i32, i32) {
    %c0_i32 = arith.constant 0 : i32
    return %arg0, %arg1 : i32, i32
  }
}

module attributes {stable_mosaic.version = 11 : i64} {
  func.func @_dense_kernel(%arg0: i32, %arg1: i32, %arg2: i32, %arg3: memref<16x32xbf16, #tpu.memory_space<vmem>>, %arg4: memref<32x64xbf16, #tpu.memory_space<vmem>>, %arg5: memref<1x64xf32, #tpu.memory_space<vmem>>, %arg6: memref<16x64xbf16, #tpu.memory_space<vmem>>, %arg7: memref<16x64xf32, #tpu.memory_space<vmem>>) attributes {dimension_semantics = [#tpu.dimension_semantics<parallel>, #tpu.dimension_semantics<parallel>, #tpu.dimension_semantics<arbitrary>], iteration_bounds = array<i64: 1, 1, 1>, scalar_prefetch = 0 : i64, scratch_operands = 1 : i64, tpu.core_type = #tpu.core_type<tc>, window_params = [{transform_indices = @transform_0, window_bounds = array<i64: 16, 32>}, {transform_indices = @transform_1, window_bounds = array<i64: 32, 64>}, {transform_indices = @transform_2, window_bounds = array<i64: 1, 64>}, {transform_indices = @transform_3, window_bounds = array<i64: 16, 64>}]} {
    %c0_i32 = arith.constant 0 : i32
    %0 = arith.cmpi eq, %arg2, %c0_i32 : i32
    %1 = arith.extui %0 : i1 to i32
    %c0_i32_0 = arith.constant 0 : i32
    %2 = arith.cmpi ne, %1, %c0_i32_0 : i32
    scf.if %2 {
      %cst_10 = arith.constant 0.000000e+00 : f32
      %12 = vector.broadcast %cst_10 : f32 to vector<16x64xf32>
      %c0_11 = arith.constant 0 : index
      %c0_12 = arith.constant 0 : index
      %13 = vector.load %arg7[%c0_11, %c0_12] : memref<16x64xf32, #tpu.memory_space<vmem>>, vector<16x64xf32>
      tpu.vector_store %arg7[%c0_11, %c0_12], %12 {strides = array<i32>} : memref<16x64xf32, #tpu.memory_space<vmem>>, vector<16x64xf32>,
    } else {
    }
    %c0 = arith.constant 0 : index
    %c0_1 = arith.constant 0 : index
    %3 = vector.load %arg7[%c0, %c0_1] : memref<16x64xf32, #tpu.memory_space<vmem>>, vector<16x64xf32>
    %c0_2 = arith.constant 0 : index
    %c0_3 = arith.constant 0 : index
    %4 = vector.load %arg3[%c0_2, %c0_3] : memref<16x32xbf16, #tpu.memory_space<vmem>>, vector<16x32xbf16>
    %c0_4 = arith.constant 0 : index
    %c0_5 = arith.constant 0 : index
    %5 = vector.load %arg4[%c0_4, %c0_5] : memref<32x64xbf16, #tpu.memory_space<vmem>>, vector<32x64xbf16>
    %cst = arith.constant dense<0.000000e+00> : vector<16x64xf32>
    %6 = tpu.matmul %4, %5, %cst {dimension_numbers = #tpu.dot_dimension_numbers<[1], [0], [0], [1], [0, 0, 1, 1], [], []>} : vector<16x32xbf16>, vector<32x64xbf16>, vector<16x64xf32> -> vector<16x64xf32>
    %7 = arith.addf %3, %6 : vector<16x64xf32>
    %c0_6 = arith.constant 0 : index
    %c0_7 = arith.constant 0 : index
    %8 = vector.load %arg7[%c0_6, %c0_7] : memref<16x64xf32, #tpu.memory_space<vmem>>, vector<16x64xf32>
    tpu.vector_store %arg7[%c0_6, %c0_7], %7 {strides = array<i32>} : memref<16x64xf32, #tpu.memory_space<vmem>>, vector<16x64xf32>,
    %c0_i32_8 = arith.constant 0 : i32
    %9 = arith.cmpi eq, %arg2, %c0_i32_8 : i32
    %10 = arith.extui %9 : i1 to i32
    %c0_i32_9 = arith.constant 0 : i32
    %11 = arith.cmpi ne, %10, %c0_i32_9 : i32
    scf.if %11 {
      %c0_10 = arith.constant 0 : index
      %c0_11 = arith.constant 0 : index
      %12 = vector.load %arg7[%c0_10, %c0_11] : memref<16x64xf32, #tpu.memory_space<vmem>>, vector<16x64xf32>
      %c0_12 = arith.constant 0 : index
      %c0_13 = arith.constant 0 : index
      %13 = vector.load %arg5[%c0_12, %c0_13] : memref<1x64xf32, #tpu.memory_space<vmem>>, vector<1x64xf32>
      %14 = vector.broadcast %13 : vector<1x64xf32> to vector<16x64xf32>
      %15 = arith.addf %12, %14 : vector<16x64xf32>
      %16 = arith.truncf %15 : vector<16x64xf32> to vector<16x64xbf16>
      %c0_14 = arith.constant 0 : index
      %c0_15 = arith.constant 0 : index
      %17 = vector.load %arg6[%c0_14, %c0_15] : memref<16x64xbf16, #tpu.memory_space<vmem>>, vector<16x64xbf16>
      tpu.vector_store %arg6[%c0_14, %c0_15], %16 {strides = array<i32>} : memref<16x64xbf16, #tpu.memory_space<vmem>>, vector<16x64xbf16>,
    } else {
    }
    return
  }
  func.func @transform_0(%arg0: i32, %arg1: i32, %arg2: i32) -> (i32, i32) {
    %c0_i32 = arith.constant 0 : i32
    return %arg0, %arg2 : i32, i32
  }
  func.func @transform_1(%arg0: i32, %arg1: i32, %arg2: i32) -> (i32, i32) {
    %c0_i32 = arith.constant 0 : i32
    return %arg2, %arg1 : i32, i32
  }
  func.func @transform_2(%arg0: i32, %arg1: i32, %arg2: i32) -> (i32, i32) {
    %c0_i32 = arith.constant 0 : i32
    %c0_i32_0 = arith.constant 0 : i32
    return %c0_i32, %arg1 : i32, i32
  }
  func.func @transform_3(%arg0: i32, %arg1: i32, %arg2: i32) -> (i32, i32) {
    %c0_i32 = arith.constant 0 : i32
    return %arg0, %arg1 : i32, i32
  }
}

module attributes {stable_mosaic.version = 11 : i64} {
  func.func @_self_attn_kernel(%arg0: i32, %arg1: memref<1x8x96xbf16, #tpu.memory_space<vmem>>, %arg2: memref<1x1x8xf32, #tpu.memory_space<vmem>>, %arg3: memref<1x8x32xbf16, #tpu.memory_space<vmem>>) attributes {dimension_semantics = [#tpu.dimension_semantics<parallel>], iteration_bounds = array<i64: 2>, scalar_prefetch = 0 : i64, scratch_operands = 0 : i64, tpu.core_type = #tpu.core_type<tc>, window_params = [{transform_indices = @transform_0, window_bounds = array<i64: 1, 8, 96>}, {transform_indices = @transform_1, window_bounds = array<i64: 1, 1, 8>}, {transform_indices = @transform_2, window_bounds = array<i64: 1, 8, 32>}]} {
    %c0 = arith.constant 0 : index
    %c0_0 = arith.constant 0 : index
    %c0_1 = arith.constant 0 : index
    %0 = vector.load %arg1[%c0, %c0_0, %c0_1] : memref<1x8x96xbf16, #tpu.memory_space<vmem>>, vector<1x8x96xbf16>
    %1 = vector.shape_cast %0 : vector<1x8x96xbf16> to vector<8x96xbf16>
    %c0_2 = arith.constant 0 : index
    %c0_3 = arith.constant 0 : index
    %c0_4 = arith.constant 0 : index
    %2 = vector.load %arg2[%c0_2, %c0_3, %c0_4] : memref<1x1x8xf32, #tpu.memory_space<vmem>>, vector<1x1x8xf32>
    %3 = vector.shape_cast %2 : vector<1x1x8xf32> to vector<1x8xf32>
    %4 = vector.shape_cast %3 : vector<1x8xf32> to vector<1x8xf32>
    %5 = vector.broadcast %4 : vector<1x8xf32> to vector<8x8xf32>
    %6 = tpu.iota {dimensions = array<i32: 0>} : vector<8x8xi32>
    %7 = tpu.iota {dimensions = array<i32: 1>} : vector<8x8xi32>
    %8 = arith.cmpi sgt, %7, %6 : vector<8x8xi32>
    %cst = arith.constant -1.000000e+09 : f32
    %9 = vector.broadcast %cst : f32 to vector<8x8xf32>
    %10 = arith.select %8, %9, %5 : vector<8x8xi1>, vector<8x8xf32>
    %11 = vector.extract_strided_slice %1 {offsets = [0, 0], sizes = [8, 32], strides = [1, 1]} : vector<8x96xbf16> to vector<8x32xbf16>
    %12 = vector.extract_strided_slice %1 {offsets = [0, 32], sizes = [8, 32], strides = [1, 1]} : vector<8x96xbf16> to vector<8x32xbf16>
    %13 = vector.extract_strided_slice %1 {offsets = [0, 64], sizes = [8, 32], strides = [1, 1]} : vector<8x96xbf16> to vector<8x32xbf16>
    %14 = vector.extract_strided_slice %11 {offsets = [0, 0], sizes = [8, 8], strides = [1, 1]} : vector<8x32xbf16> to vector<8x8xbf16>
    %15 = arith.extf %14 : vector<8x8xbf16> to vector<8x8xf32>
    %cst_5 = arith.constant 0.353553385 : f32
    %16 = vector.broadcast %cst_5 : f32 to vector<8x8xf32>
    %17 = arith.mulf %15, %16 : vector<8x8xf32>
    %18 = arith.truncf %17 : vector<8x8xf32> to vector<8x8xbf16>
    %19 = vector.extract_strided_slice %12 {offsets = [0, 0], sizes = [8, 8], strides = [1, 1]} : vector<8x32xbf16> to vector<8x8xbf16>
    %20 = vector.extract_strided_slice %13 {offsets = [0, 0], sizes = [8, 8], strides = [1, 1]} : vector<8x32xbf16> to vector<8x8xbf16>
    %cst_6 = arith.constant dense<0.000000e+00> : vector<8x8xf32>
    %21 = tpu.matmul %18, %19, %cst_6 {dimension_numbers = #tpu.dot_dimension_numbers<[1], [1], [0], [0], [0, 0, 1, 0], [], []>} : vector<8x8xbf16>, vector<8x8xbf16>, vector<8x8xf32> -> vector<8x8xf32>
    %22 = arith.addf %21, %10 : vector<8x8xf32>
    %cst_7 = arith.constant dense<0xFF800000> : vector<8xf32>
    %23 = vector.multi_reduction <maximumf>, %22, %cst_7 [1] : vector<8x8xf32> to vector<8xf32>
    %24 = vector.shape_cast %23 : vector<8xf32> to vector<8x1xf32>
    %25 = vector.broadcast %24 : vector<8x1xf32> to vector<8x8xf32>
    %26 = arith.subf %22, %25 : vector<8x8xf32>
    %27 = math.exp %26 : vector<8x8xf32>
    %cst_8 = arith.constant dense<0.000000e+00> : vector<8xf32>
    %28 = vector.multi_reduction <add>, %27, %cst_8 [1] : vector<8x8xf32> to vector<8xf32>
    %29 = vector.shape_cast %28 : vector<8xf32> to vector<8x1xf32>
    %30 = tpu.reciprocal %29 {approx = true} : vector<8x1xf32> -> vector<8x1xf32>
    %31 = vector.broadcast %30 : vector<8x1xf32> to vector<8x8xf32>
    %32 = arith.mulf %27, %31 : vector<8x8xf32>
    %33 = arith.truncf %32 : vector<8x8xf32> to vector<8x8xbf16>
    %cst_9 = arith.constant dense<0.000000e+00> : vector<8x8xf32>
    %34 = tpu.matmul %33, %20, %cst_9 {dimension_numbers = #tpu.dot_dimension_numbers<[1], [0], [0], [1], [0, 0, 1, 1], [], []>} : vector<8x8xbf16>, vector<8x8xbf16>, vector<8x8xf32> -> vector<8x8xf32>
    %35 = vector.extract_strided_slice %11 {offsets = [0, 8], sizes = [8, 8], strides = [1, 1]} : vector<8x32xbf16> to vector<8x8xbf16>
    %36 = arith.extf %35 : vector<8x8xbf16> to vector<8x8xf32>
    %cst_10 = arith.constant 0.353553385 : f32
    %37 = vector.broadcast %cst_10 : f32 to vector<8x8xf32>
    %38 = arith.mulf %36, %37 : vector<8x8xf32>
    %39 = arith.truncf %38 : vector<8x8xf32> to vector<8x8xbf16>
    %40 = vector.extract_strided_slice %12 {offsets = [0, 8], sizes = [8, 8], strides = [1, 1]} : vector<8x32xbf16> to vector<8x8xbf16>
    %41 = vector.extract_strided_slice %13 {offsets = [0, 8], sizes = [8, 8], strides = [1, 1]} : vector<8x32xbf16> to vector<8x8xbf16>
    %cst_11 = arith.constant dense<0.000000e+00> : vector<8x8xf32>
    %42 = tpu.matmul %39, %40, %cst_11 {dimension_numbers = #tpu.dot_dimension_numbers<[1], [1], [0], [0], [0, 0, 1, 0], [], []>} : vector<8x8xbf16>, vector<8x8xbf16>, vector<8x8xf32> -> vector<8x8xf32>
    %43 = arith.addf %42, %10 : vector<8x8xf32>
    %cst_12 = arith.constant dense<0xFF800000> : vector<8xf32>
    %44 = vector.multi_reduction <maximumf>, %43, %cst_12 [1] : vector<8x8xf32> to vector<8xf32>
    %45 = vector.shape_cast %44 : vector<8xf32> to vector<8x1xf32>
    %46 = vector.broadcast %45 : vector<8x1xf32> to vector<8x8xf32>
    %47 = arith.subf %43, %46 : vector<8x8xf32>
    %48 = math.exp %47 : vector<8x8xf32>
    %cst_13 = arith.constant dense<0.000000e+00> : vector<8xf32>
    %49 = vector.multi_reduction <add>, %48, %cst_13 [1] : vector<8x8xf32> to vector<8xf32>
    %50 = vector.shape_cast %49 : vector<8xf32> to vector<8x1xf32>
    %51 = tpu.reciprocal %50 {approx = true} : vector<8x1xf32> -> vector<8x1xf32>
    %52 = vector.broadcast %51 : vector<8x1xf32> to vector<8x8xf32>
    %53 = arith.mulf %48, %52 : vector<8x8xf32>
    %54 = arith.truncf %53 : vector<8x8xf32> to vector<8x8xbf16>
    %cst_14 = arith.constant dense<0.000000e+00> : vector<8x8xf32>
    %55 = tpu.matmul %54, %41, %cst_14 {dimension_numbers = #tpu.dot_dimension_numbers<[1], [0], [0], [1], [0, 0, 1, 1], [], []>} : vector<8x8xbf16>, vector<8x8xbf16>, vector<8x8xf32> -> vector<8x8xf32>
    %56 = vector.extract_strided_slice %11 {offsets = [0, 16], sizes = [8, 8], strides = [1, 1]} : vector<8x32xbf16> to vector<8x8xbf16>
    %57 = arith.extf %56 : vector<8x8xbf16> to vector<8x8xf32>
    %cst_15 = arith.constant 0.353553385 : f32
    %58 = vector.broadcast %cst_15 : f32 to vector<8x8xf32>
    %59 = arith.mulf %57, %58 : vector<8x8xf32>
    %60 = arith.truncf %59 : vector<8x8xf32> to vector<8x8xbf16>
    %61 = vector.extract_strided_slice %12 {offsets = [0, 16], sizes = [8, 8], strides = [1, 1]} : vector<8x32xbf16> to vector<8x8xbf16>
    %62 = vector.extract_strided_slice %13 {offsets = [0, 16], sizes = [8, 8], strides = [1, 1]} : vector<8x32xbf16> to vector<8x8xbf16>
    %cst_16 = arith.constant dense<0.000000e+00> : vector<8x8xf32>
    %63 = tpu.matmul %60, %61, %cst_16 {dimension_numbers = #tpu.dot_dimension_numbers<[1], [1], [0], [0], [0, 0, 1, 0], [], []>} : vector<8x8xbf16>, vector<8x8xbf16>, vector<8x8xf32> -> vector<8x8xf32>
    %64 = arith.addf %63, %10 : vector<8x8xf32>
    %cst_17 = arith.constant dense<0xFF800000> : vector<8xf32>
    %65 = vector.multi_reduction <maximumf>, %64, %cst_17 [1] : vector<8x8xf32> to vector<8xf32>
    %66 = vector.shape_cast %65 : vector<8xf32> to vector<8x1xf32>
    %67 = vector.broadcast %66 : vector<8x1xf32> to vector<8x8xf32>
    %68 = arith.subf %64, %67 : vector<8x8xf32>
    %69 = math.exp %68 : vector<8x8xf32>
    %cst_18 = arith.constant dense<0.000000e+00> : vector<8xf32>
    %70 = vector.multi_reduction <add>, %69, %cst_18 [1] : vector<8x8xf32> to vector<8xf32>
    %71 = vector.shape_cast %70 : vector<8xf32> to vector<8x1xf32>
    %72 = tpu.reciprocal %71 {approx = true} : vector<8x1xf32> -> vector<8x1xf32>
    %73 = vector.broadcast %72 : vector<8x1xf32> to vector<8x8xf32>
    %74 = arith.mulf %69, %73 : vector<8x8xf32>
    %75 = arith.truncf %74 : vector<8x8xf32> to vector<8x8xbf16>
    %cst_19 = arith.constant dense<0.000000e+00> : vector<8x8xf32>
    %76 = tpu.matmul %75, %62, %cst_19 {dimension_numbers = #tpu.dot_dimension_numbers<[1], [0], [0], [1], [0, 0, 1, 1], [], []>} : vector<8x8xbf16>, vector<8x8xbf16>, vector<8x8xf32> -> vector<8x8xf32>
    %77 = vector.extract_strided_slice %11 {offsets = [0, 24], sizes = [8, 8], strides = [1, 1]} : vector<8x32xbf16> to vector<8x8xbf16>
    %78 = arith.extf %77 : vector<8x8xbf16> to vector<8x8xf32>
    %cst_20 = arith.constant 0.353553385 : f32
    %79 = vector.broadcast %cst_20 : f32 to vector<8x8xf32>
    %80 = arith.mulf %78, %79 : vector<8x8xf32>
    %81 = arith.truncf %80 : vector<8x8xf32> to vector<8x8xbf16>
    %82 = vector.extract_strided_slice %12 {offsets = [0, 24], sizes = [8, 8], strides = [1, 1]} : vector<8x32xbf16> to vector<8x8xbf16>
    %83 = vector.extract_strided_slice %13 {offsets = [0, 24], sizes = [8, 8], strides = [1, 1]} : vector<8x32xbf16> to vector<8x8xbf16>
    %cst_21 = arith.constant dense<0.000000e+00> : vector<8x8xf32>
    %84 = tpu.matmul %81, %82, %cst_21 {dimension_numbers = #tpu.dot_dimension_numbers<[1], [1], [0], [0], [0, 0, 1, 0], [], []>} : vector<8x8xbf16>, vector<8x8xbf16>, vector<8x8xf32> -> vector<8x8xf32>
    %85 = arith.addf %84, %10 : vector<8x8xf32>
    %cst_22 = arith.constant dense<0xFF800000> : vector<8xf32>
    %86 = vector.multi_reduction <maximumf>, %85, %cst_22 [1] : vector<8x8xf32> to vector<8xf32>
    %87 = vector.shape_cast %86 : vector<8xf32> to vector<8x1xf32>
    %88 = vector.broadcast %87 : vector<8x1xf32> to vector<8x8xf32>
    %89 = arith.subf %85, %88 : vector<8x8xf32>
    %90 = math.exp %89 : vector<8x8xf32>
    %cst_23 = arith.constant dense<0.000000e+00> : vector<8xf32>
    %91 = vector.multi_reduction <add>, %90, %cst_23 [1] : vector<8x8xf32> to vector<8xf32>
    %92 = vector.shape_cast %91 : vector<8xf32> to vector<8x1xf32>
    %93 = tpu.reciprocal %92 {approx = true} : vector<8x1xf32> -> vector<8x1xf32>
    %94 = vector.broadcast %93 : vector<8x1xf32> to vector<8x8xf32>
    %95 = arith.mulf %90, %94 : vector<8x8xf32>
    %96 = arith.truncf %95 : vector<8x8xf32> to vector<8x8xbf16>
    %cst_24 = arith.constant dense<0.000000e+00> : vector<8x8xf32>
    %97 = tpu.matmul %96, %83, %cst_24 {dimension_numbers = #tpu.dot_dimension_numbers<[1], [0], [0], [1], [0, 0, 1, 1], [], []>} : vector<8x8xbf16>, vector<8x8xbf16>, vector<8x8xf32> -> vector<8x8xf32>
    %98 = tpu.concatenate %34, %55, %76, %97 in 1 : vector<8x8xf32>, vector<8x8xf32>, vector<8x8xf32>, vector<8x8xf32> -> vector<8x32xf32>
    %99 = arith.truncf %98 : vector<8x32xf32> to vector<8x32xbf16>
    %c0_25 = arith.constant 0 : index
    %c0_26 = arith.constant 0 : index
    %c0_27 = arith.constant 0 : index
    %100 = vector.load %arg3[%c0_25, %c0_26, %c0_27] : memref<1x8x32xbf16, #tpu.memory_space<vmem>>, vector<1x8x32xbf16>
    %101 = vector.shape_cast %100 : vector<1x8x32xbf16> to vector<8x32xbf16>
    %102 = vector.shape_cast %99 : vector<8x32xbf16> to vector<1x8x32xbf16>
    tpu.vector_store %arg3[%c0_25, %c0_26, %c0_27], %102 {strides = array<i32>} : memref<1x8x32xbf16, #tpu.memory_space<vmem>>, vector<1x8x32xbf16>,
    return
  }
  func.func @transform_0(%arg0: i32) -> (i32, i32, i32) {
    %c0_i32 = arith.constant 0 : i32
    %c0_i32_0 = arith.constant 0 : i32
    %c0_i32_1 = arith.constant 0 : i32
    return %arg0, %c0_i32, %c0_i32_0 : i32, i32, i32
  }
  func.func @transform_1(%arg0: i32) -> (i32, i32, i32) {
    %c0_i32 = arith.constant 0 : i32
    %c0_i32_0 = arith.constant 0 : i32
    %c0_i32_1 = arith.constant 0 : i32
    return %arg0, %c0_i32, %c0_i32_0 : i32, i32, i32
  }
  func.func @transform_2(%arg0: i32) -> (i32, i32, i32) {
    %c0_i32 = arith.constant 0 : i32
    %c0_i32_0 = arith.constant 0 : i32
    %c0_i32_1 = arith.constant 0 : i32
    return %arg0, %c0_i32, %c0_i32_0 : i32, i32, i32
  }
}

module attributes {stable_mosaic.version = 11 : i64} {
  func.func @_dense_kernel(%arg0: i32, %arg1: i32, %arg2: i32, %arg3: memref<16x32xbf16, #tpu.memory_space<vmem>>, %arg4: memref<32x60xbf16, #tpu.memory_space<vmem>>, %arg5: memref<1x60xf32, #tpu.memory_space<vmem>>, %arg6: memref<16x60xf32, #tpu.memory_space<vmem>>, %arg7: memref<16x60xf32, #tpu.memory_space<vmem>>) attributes {dimension_semantics = [#tpu.dimension_semantics<parallel>, #tpu.dimension_semantics<parallel>, #tpu.dimension_semantics<arbitrary>], iteration_bounds = array<i64: 1, 1, 1>, scalar_prefetch = 0 : i64, scratch_operands = 1 : i64, tpu.core_type = #tpu.core_type<tc>, window_params = [{transform_indices = @transform_0, window_bounds = array<i64: 16, 32>}, {transform_indices = @transform_1, window_bounds = array<i64: 32, 60>}, {transform_indices = @transform_2, window_bounds = array<i64: 1, 60>}, {transform_indices = @transform_3, window_bounds = array<i64: 16, 60>}]} {
    %c0_i32 = arith.constant 0 : i32
    %0 = arith.cmpi eq, %arg2, %c0_i32 : i32
    %1 = arith.extui %0 : i1 to i32
    %c0_i32_0 = arith.constant 0 : i32
    %2 = arith.cmpi ne, %1, %c0_i32_0 : i32
    scf.if %2 {
      %cst_10 = arith.constant 0.000000e+00 : f32
      %12 = vector.broadcast %cst_10 : f32 to vector<16x60xf32>
      %c0_11 = arith.constant 0 : index
      %c0_12 = arith.constant 0 : index
      %13 = vector.load %arg7[%c0_11, %c0_12] : memref<16x60xf32, #tpu.memory_space<vmem>>, vector<16x60xf32>
      tpu.vector_store %arg7[%c0_11, %c0_12], %12 {strides = array<i32>} : memref<16x60xf32, #tpu.memory_space<vmem>>, vector<16x60xf32>,
    } else {
    }
    %c0 = arith.constant 0 : index
    %c0_1 = arith.constant 0 : index
    %3 = vector.load %arg7[%c0, %c0_1] : memref<16x60xf32, #tpu.memory_space<vmem>>, vector<16x60xf32>
    %c0_2 = arith.constant 0 : index
    %c0_3 = arith.constant 0 : index
    %4 = vector.load %arg3[%c0_2, %c0_3] : memref<16x32xbf16, #tpu.memory_space<vmem>>, vector<16x32xbf16>
    %c0_4 = arith.constant 0 : index
    %c0_5 = arith.constant 0 : index
    %5 = vector.load %arg4[%c0_4, %c0_5] : memref<32x60xbf16, #tpu.memory_space<vmem>>, vector<32x60xbf16>
    %cst = arith.constant dense<0.000000e+00> : vector<16x60xf32>
    %6 = tpu.matmul %4, %5, %cst {dimension_numbers = #tpu.dot_dimension_numbers<[1], [0], [0], [1], [0, 0, 1, 1], [], []>} : vector<16x32xbf16>, vector<32x60xbf16>, vector<16x60xf32> -> vector<16x60xf32>
    %7 = arith.addf %3, %6 : vector<16x60xf32>
    %c0_6 = arith.constant 0 : index
    %c0_7 = arith.constant 0 : index
    %8 = vector.load %arg7[%c0_6, %c0_7] : memref<16x60xf32, #tpu.memory_space<vmem>>, vector<16x60xf32>
    tpu.vector_store %arg7[%c0_6, %c0_7], %7 {strides = array<i32>} : memref<16x60xf32, #tpu.memory_space<vmem>>, vector<16x60xf32>,
    %c0_i32_8 = arith.constant 0 : i32
    %9 = arith.cmpi eq, %arg2, %c0_i32_8 : i32
    %10 = arith.extui %9 : i1 to i32
    %c0_i32_9 = arith.constant 0 : i32
    %11 = arith.cmpi ne, %10, %c0_i32_9 : i32
    scf.if %11 {
      %c0_10 = arith.constant 0 : index
      %c0_11 = arith.constant 0 : index
      %12 = vector.load %arg7[%c0_10, %c0_11] : memref<16x60xf32, #tpu.memory_space<vmem>>, vector<16x60xf32>
      %c0_12 = arith.constant 0 : index
      %c0_13 = arith.constant 0 : index
      %13 = vector.load %arg5[%c0_12, %c0_13] : memref<1x60xf32, #tpu.memory_space<vmem>>, vector<1x60xf32>
      %14 = vector.broadcast %13 : vector<1x60xf32> to vector<16x60xf32>
      %15 = arith.addf %12, %14 : vector<16x60xf32>
      %c0_14 = arith.constant 0 : index
      %c0_15 = arith.constant 0 : index
      %16 = vector.load %arg6[%c0_14, %c0_15] : memref<16x60xf32, #tpu.memory_space<vmem>>, vector<16x60xf32>
      tpu.vector_store %arg6[%c0_14, %c0_15], %15 {strides = array<i32>} : memref<16x60xf32, #tpu.memory_space<vmem>>, vector<16x60xf32>,
    } else {
    }
    return
  }
  func.func @transform_0(%arg0: i32, %arg1: i32, %arg2: i32) -> (i32, i32) {
    %c0_i32 = arith.constant 0 : i32
    return %arg0, %arg2 : i32, i32
  }
  func.func @transform_1(%arg0: i32, %arg1: i32, %arg2: i32) -> (i32, i32) {
    %c0_i32 = arith.constant 0 : i32
    return %arg2, %arg1 : i32, i32
  }
  func.func @transform_2(%arg0: i32, %arg1: i32, %arg2: i32) -> (i32, i32) {
    %c0_i32 = arith.constant 0 : i32
    %c0_i32_0 = arith.constant 0 : i32
    return %c0_i32, %arg1 : i32, i32
  }
  func.func @transform_3(%arg0: i32, %arg1: i32, %arg2: i32) -> (i32, i32) {
    %c0_i32 = arith.constant 0 : i32
    return %arg0, %arg1 : i32, i32
  }
}

module attributes {stable_mosaic.version = 11 : i64} {
  func.func @_cross_attn_kernel(%arg0: i32, %arg1: memref<1x8x32xbf16, #tpu.memory_space<vmem>>, %arg2: memref<1x8x64xbf16, #tpu.memory_space<vmem>>, %arg3: memref<1x1x8xf32, #tpu.memory_space<vmem>>, %arg4: memref<1x8x32xbf16, #tpu.memory_space<vmem>>) attributes {dimension_semantics = [#tpu.dimension_semantics<parallel>], iteration_bounds = array<i64: 2>, scalar_prefetch = 0 : i64, scratch_operands = 0 : i64, tpu.core_type = #tpu.core_type<tc>, window_params = [{transform_indices = @transform_0, window_bounds = array<i64: 1, 8, 32>}, {transform_indices = @transform_1, window_bounds = array<i64: 1, 8, 64>}, {transform_indices = @transform_2, window_bounds = array<i64: 1, 1, 8>}, {transform_indices = @transform_3, window_bounds = array<i64: 1, 8, 32>}]} {
    %c0 = arith.constant 0 : index
    %c0_0 = arith.constant 0 : index
    %c0_1 = arith.constant 0 : index
    %0 = vector.load %arg2[%c0, %c0_0, %c0_1] : memref<1x8x64xbf16, #tpu.memory_space<vmem>>, vector<1x8x64xbf16>
    %1 = vector.shape_cast %0 : vector<1x8x64xbf16> to vector<8x64xbf16>
    %c0_2 = arith.constant 0 : index
    %c0_3 = arith.constant 0 : index
    %c0_4 = arith.constant 0 : index
    %2 = vector.load %arg3[%c0_2, %c0_3, %c0_4] : memref<1x1x8xf32, #tpu.memory_space<vmem>>, vector<1x1x8xf32>
    %3 = vector.shape_cast %2 : vector<1x1x8xf32> to vector<1x8xf32>
    %4 = vector.shape_cast %3 : vector<1x8xf32> to vector<1x8xf32>
    %5 = vector.broadcast %4 : vector<1x8xf32> to vector<8x8xf32>
    %c0_5 = arith.constant 0 : index
    %c0_6 = arith.constant 0 : index
    %c0_7 = arith.constant 0 : index
    %6 = vector.load %arg1[%c0_5, %c0_6, %c0_7] : memref<1x8x32xbf16, #tpu.memory_space<vmem>>, vector<1x8x32xbf16>
    %7 = vector.shape_cast %6 : vector<1x8x32xbf16> to vector<8x32xbf16>
    %8 = vector.extract_strided_slice %1 {offsets = [0, 0], sizes = [8, 32], strides = [1, 1]} : vector<8x64xbf16> to vector<8x32xbf16>
    %9 = vector.extract_strided_slice %1 {offsets = [0, 32], sizes = [8, 32], strides = [1, 1]} : vector<8x64xbf16> to vector<8x32xbf16>
    %10 = vector.extract_strided_slice %7 {offsets = [0, 0], sizes = [8, 8], strides = [1, 1]} : vector<8x32xbf16> to vector<8x8xbf16>
    %11 = arith.extf %10 : vector<8x8xbf16> to vector<8x8xf32>
    %cst = arith.constant 0.353553385 : f32
    %12 = vector.broadcast %cst : f32 to vector<8x8xf32>
    %13 = arith.mulf %11, %12 : vector<8x8xf32>
    %14 = arith.truncf %13 : vector<8x8xf32> to vector<8x8xbf16>
    %15 = vector.extract_strided_slice %8 {offsets = [0, 0], sizes = [8, 8], strides = [1, 1]} : vector<8x32xbf16> to vector<8x8xbf16>
    %16 = vector.extract_strided_slice %9 {offsets = [0, 0], sizes = [8, 8], strides = [1, 1]} : vector<8x32xbf16> to vector<8x8xbf16>
    %cst_8 = arith.constant dense<0.000000e+00> : vector<8x8xf32>
    %17 = tpu.matmul %14, %15, %cst_8 {dimension_numbers = #tpu.dot_dimension_numbers<[1], [1], [0], [0], [0, 0, 1, 0], [], []>} : vector<8x8xbf16>, vector<8x8xbf16>, vector<8x8xf32> -> vector<8x8xf32>
    %18 = arith.addf %17, %5 : vector<8x8xf32>
    %cst_9 = arith.constant dense<0xFF800000> : vector<8xf32>
    %19 = vector.multi_reduction <maximumf>, %18, %cst_9 [1] : vector<8x8xf32> to vector<8xf32>
    %20 = vector.shape_cast %19 : vector<8xf32> to vector<8x1xf32>
    %21 = vector.broadcast %20 : vector<8x1xf32> to vector<8x8xf32>
    %22 = arith.subf %18, %21 : vector<8x8xf32>
    %23 = math.exp %22 : vector<8x8xf32>
    %cst_10 = arith.constant dense<0.000000e+00> : vector<8xf32>
    %24 = vector.multi_reduction <add>, %23, %cst_10 [1] : vector<8x8xf32> to vector<8xf32>
    %25 = vector.shape_cast %24 : vector<8xf32> to vector<8x1xf32>
    %26 = tpu.reciprocal %25 {approx = true} : vector<8x1xf32> -> vector<8x1xf32>
    %27 = vector.broadcast %26 : vector<8x1xf32> to vector<8x8xf32>
    %28 = arith.mulf %23, %27 : vector<8x8xf32>
    %29 = arith.truncf %28 : vector<8x8xf32> to vector<8x8xbf16>
    %cst_11 = arith.constant dense<0.000000e+00> : vector<8x8xf32>
    %30 = tpu.matmul %29, %16, %cst_11 {dimension_numbers = #tpu.dot_dimension_numbers<[1], [0], [0], [1], [0, 0, 1, 1], [], []>} : vector<8x8xbf16>, vector<8x8xbf16>, vector<8x8xf32> -> vector<8x8xf32>
    %31 = vector.extract_strided_slice %7 {offsets = [0, 8], sizes = [8, 8], strides = [1, 1]} : vector<8x32xbf16> to vector<8x8xbf16>
    %32 = arith.extf %31 : vector<8x8xbf16> to vector<8x8xf32>
    %cst_12 = arith.constant 0.353553385 : f32
    %33 = vector.broadcast %cst_12 : f32 to vector<8x8xf32>
    %34 = arith.mulf %32, %33 : vector<8x8xf32>
    %35 = arith.truncf %34 : vector<8x8xf32> to vector<8x8xbf16>
    %36 = vector.extract_strided_slice %8 {offsets = [0, 8], sizes = [8, 8], strides = [1, 1]} : vector<8x32xbf16> to vector<8x8xbf16>
    %37 = vector.extract_strided_slice %9 {offsets = [0, 8], sizes = [8, 8], strides = [1, 1]} : vector<8x32xbf16> to vector<8x8xbf16>
    %cst_13 = arith.constant dense<0.000000e+00> : vector<8x8xf32>
    %38 = tpu.matmul %35, %36, %cst_13 {dimension_numbers = #tpu.dot_dimension_numbers<[1], [1], [0], [0], [0, 0, 1, 0], [], []>} : vector<8x8xbf16>, vector<8x8xbf16>, vector<8x8xf32> -> vector<8x8xf32>
    %39 = arith.addf %38, %5 : vector<8x8xf32>
    %cst_14 = arith.constant dense<0xFF800000> : vector<8xf32>
    %40 = vector.multi_reduction <maximumf>, %39, %cst_14 [1] : vector<8x8xf32> to vector<8xf32>
    %41 = vector.shape_cast %40 : vector<8xf32> to vector<8x1xf32>
    %42 = vector.broadcast %41 : vector<8x1xf32> to vector<8x8xf32>
    %43 = arith.subf %39, %42 : vector<8x8xf32>
    %44 = math.exp %43 : vector<8x8xf32>
    %cst_15 = arith.constant dense<0.000000e+00> : vector<8xf32>
    %45 = vector.multi_reduction <add>, %44, %cst_15 [1] : vector<8x8xf32> to vector<8xf32>
    %46 = vector.shape_cast %45 : vector<8xf32> to vector<8x1xf32>
    %47 = tpu.reciprocal %46 {approx = true} : vector<8x1xf32> -> vector<8x1xf32>
    %48 = vector.broadcast %47 : vector<8x1xf32> to vector<8x8xf32>
    %49 = arith.mulf %44, %48 : vector<8x8xf32>
    %50 = arith.truncf %49 : vector<8x8xf32> to vector<8x8xbf16>
    %cst_16 = arith.constant dense<0.000000e+00> : vector<8x8xf32>
    %51 = tpu.matmul %50, %37, %cst_16 {dimension_numbers = #tpu.dot_dimension_numbers<[1], [0], [0], [1], [0, 0, 1, 1], [], []>} : vector<8x8xbf16>, vector<8x8xbf16>, vector<8x8xf32> -> vector<8x8xf32>
    %52 = vector.extract_strided_slice %7 {offsets = [0, 16], sizes = [8, 8], strides = [1, 1]} : vector<8x32xbf16> to vector<8x8xbf16>
    %53 = arith.extf %52 : vector<8x8xbf16> to vector<8x8xf32>
    %cst_17 = arith.constant 0.353553385 : f32
    %54 = vector.broadcast %cst_17 : f32 to vector<8x8xf32>
    %55 = arith.mulf %53, %54 : vector<8x8xf32>
    %56 = arith.truncf %55 : vector<8x8xf32> to vector<8x8xbf16>
    %57 = vector.extract_strided_slice %8 {offsets = [0, 16], sizes = [8, 8], strides = [1, 1]} : vector<8x32xbf16> to vector<8x8xbf16>
    %58 = vector.extract_strided_slice %9 {offsets = [0, 16], sizes = [8, 8], strides = [1, 1]} : vector<8x32xbf16> to vector<8x8xbf16>
    %cst_18 = arith.constant dense<0.000000e+00> : vector<8x8xf32>
    %59 = tpu.matmul %56, %57, %cst_18 {dimension_numbers = #tpu.dot_dimension_numbers<[1], [1], [0], [0], [0, 0, 1, 0], [], []>} : vector<8x8xbf16>, vector<8x8xbf16>, vector<8x8xf32> -> vector<8x8xf32>
    %60 = arith.addf %59, %5 : vector<8x8xf32>
    %cst_19 = arith.constant dense<0xFF800000> : vector<8xf32>
    %61 = vector.multi_reduction <maximumf>, %60, %cst_19 [1] : vector<8x8xf32> to vector<8xf32>
    %62 = vector.shape_cast %61 : vector<8xf32> to vector<8x1xf32>
    %63 = vector.broadcast %62 : vector<8x1xf32> to vector<8x8xf32>
    %64 = arith.subf %60, %63 : vector<8x8xf32>
    %65 = math.exp %64 : vector<8x8xf32>
    %cst_20 = arith.constant dense<0.000000e+00> : vector<8xf32>
    %66 = vector.multi_reduction <add>, %65, %cst_20 [1] : vector<8x8xf32> to vector<8xf32>
    %67 = vector.shape_cast %66 : vector<8xf32> to vector<8x1xf32>
    %68 = tpu.reciprocal %67 {approx = true} : vector<8x1xf32> -> vector<8x1xf32>
    %69 = vector.broadcast %68 : vector<8x1xf32> to vector<8x8xf32>
    %70 = arith.mulf %65, %69 : vector<8x8xf32>
    %71 = arith.truncf %70 : vector<8x8xf32> to vector<8x8xbf16>
    %cst_21 = arith.constant dense<0.000000e+00> : vector<8x8xf32>
    %72 = tpu.matmul %71, %58, %cst_21 {dimension_numbers = #tpu.dot_dimension_numbers<[1], [0], [0], [1], [0, 0, 1, 1], [], []>} : vector<8x8xbf16>, vector<8x8xbf16>, vector<8x8xf32> -> vector<8x8xf32>
    %73 = vector.extract_strided_slice %7 {offsets = [0, 24], sizes = [8, 8], strides = [1, 1]} : vector<8x32xbf16> to vector<8x8xbf16>
    %74 = arith.extf %73 : vector<8x8xbf16> to vector<8x8xf32>
    %cst_22 = arith.constant 0.353553385 : f32
    %75 = vector.broadcast %cst_22 : f32 to vector<8x8xf32>
    %76 = arith.mulf %74, %75 : vector<8x8xf32>
    %77 = arith.truncf %76 : vector<8x8xf32> to vector<8x8xbf16>
    %78 = vector.extract_strided_slice %8 {offsets = [0, 24], sizes = [8, 8], strides = [1, 1]} : vector<8x32xbf16> to vector<8x8xbf16>
    %79 = vector.extract_strided_slice %9 {offsets = [0, 24], sizes = [8, 8], strides = [1, 1]} : vector<8x32xbf16> to vector<8x8xbf16>
    %cst_23 = arith.constant dense<0.000000e+00> : vector<8x8xf32>
    %80 = tpu.matmul %77, %78, %cst_23 {dimension_numbers = #tpu.dot_dimension_numbers<[1], [1], [0], [0], [0, 0, 1, 0], [], []>} : vector<8x8xbf16>, vector<8x8xbf16>, vector<8x8xf32> -> vector<8x8xf32>
    %81 = arith.addf %80, %5 : vector<8x8xf32>
    %cst_24 = arith.constant dense<0xFF800000> : vector<8xf32>
    %82 = vector.multi_reduction <maximumf>, %81, %cst_24 [1] : vector<8x8xf32> to vector<8xf32>
    %83 = vector.shape_cast %82 : vector<8xf32> to vector<8x1xf32>
    %84 = vector.broadcast %83 : vector<8x1xf32> to vector<8x8xf32>
    %85 = arith.subf %81, %84 : vector<8x8xf32>
    %86 = math.exp %85 : vector<8x8xf32>
    %cst_25 = arith.constant dense<0.000000e+00> : vector<8xf32>
    %87 = vector.multi_reduction <add>, %86, %cst_25 [1] : vector<8x8xf32> to vector<8xf32>
    %88 = vector.shape_cast %87 : vector<8xf32> to vector<8x1xf32>
    %89 = tpu.reciprocal %88 {approx = true} : vector<8x1xf32> -> vector<8x1xf32>
    %90 = vector.broadcast %89 : vector<8x1xf32> to vector<8x8xf32>
    %91 = arith.mulf %86, %90 : vector<8x8xf32>
    %92 = arith.truncf %91 : vector<8x8xf32> to vector<8x8xbf16>
    %cst_26 = arith.constant dense<0.000000e+00> : vector<8x8xf32>
    %93 = tpu.matmul %92, %79, %cst_26 {dimension_numbers = #tpu.dot_dimension_numbers<[1], [0], [0], [1], [0, 0, 1, 1], [], []>} : vector<8x8xbf16>, vector<8x8xbf16>, vector<8x8xf32> -> vector<8x8xf32>
    %94 = tpu.concatenate %30, %51, %72, %93 in 1 : vector<8x8xf32>, vector<8x8xf32>, vector<8x8xf32>, vector<8x8xf32> -> vector<8x32xf32>
    %95 = arith.truncf %94 : vector<8x32xf32> to vector<8x32xbf16>
    %c0_27 = arith.constant 0 : index
    %c0_28 = arith.constant 0 : index
    %c0_29 = arith.constant 0 : index
    %96 = vector.load %arg4[%c0_27, %c0_28, %c0_29] : memref<1x8x32xbf16, #tpu.memory_space<vmem>>, vector<1x8x32xbf16>
    %97 = vector.shape_cast %96 : vector<1x8x32xbf16> to vector<8x32xbf16>
    %98 = vector.shape_cast %95 : vector<8x32xbf16> to vector<1x8x32xbf16>
    tpu.vector_store %arg4[%c0_27, %c0_28, %c0_29], %98 {strides = array<i32>} : memref<1x8x32xbf16, #tpu.memory_space<vmem>>, vector<1x8x32xbf16>,
    return
  }
  func.func @transform_0(%arg0: i32) -> (i32, i32, i32) {
    %c0_i32 = arith.constant 0 : i32
    %c0_i32_0 = arith.constant 0 : i32
    %c0_i32_1 = arith.constant 0 : i32
    return %arg0, %c0_i32, %c0_i32_0 : i32, i32, i32
  }
  func.func @transform_1(%arg0: i32) -> (i32, i32, i32) {
    %c0_i32 = arith.constant 0 : i32
    %c0_i32_0 = arith.constant 0 : i32
    %c0_i32_1 = arith.constant 0 : i32
    return %arg0, %c0_i32, %c0_i32_0 : i32, i32, i32
  }
  func.func @transform_2(%arg0: i32) -> (i32, i32, i32) {
    %c0_i32 = arith.constant 0 : i32
    %c0_i32_0 = arith.constant 0 : i32
    %c0_i32_1 = arith.constant 0 : i32
    return %arg0, %c0_i32, %c0_i32_0 : i32, i32, i32
  }
  func.func @transform_3(%arg0: i32) -> (i32, i32, i32) {
    %c0_i32 = arith.constant 0 : i32
    %c0_i32_0 = arith.constant 0 : i32
    %c0_i32_1 = arith.constant 0 : i32
    return %arg0, %c0_i32, %c0_i32_0 : i32, i32, i32
  }
}

</mosaic_0001>

<bundles_post_ra>
// kernel: transformer_forward.42
= control target key start
LH: loop header
LB: loop body
LE: loop exit
PB: predicated region body
PF: predicated region fallthrough
CT: control target
= control target key end

     0   :  { %vm27_vm0 = vcmask 261120   ;;  %vm87_vm1 = vcmask 257024   ;;  %s155_s0 = inlined_call_operand.vmem [shape: bf16[16,32], index: 0, kind: input, shape index: {}]   ;;  %s156_s1 = inlined_call_operand.vmem [shape: bf16[16,32], index: 1, kind: input, shape index: {}]   ;;  %s157_s2 = inlined_call_operand.vmem [shape: f32[1,32], index: 2, kind: input, shape index: {}]   ;;  %s158_s3 = inlined_call_operand.vmem [shape: f32[1,32], index: 3, kind: input, shape index: {}]   ;;  %s159_s4 = inlined_call_operand.vmem [shape: bf16[16,32], index: 4, kind: output, shape index: {}]  }
   0x1   :  { %v101_v0 = vld [vmem:[%s155_s0] sm:$0xff]  }
   0x2   :  { %v105_v1 = vld [vmem:[%s156_s1] sm:$0xff]   ;;  %v102_v2 = vunpack.c.l.bf16 %v101_v0  ;;  %v103_v4 = vunpack.c.h.bf16 %v101_v0 }
   0x3   :  { %v106_v3 = vunpack.c.l.bf16 %v105_v1  ;;  %v107_v5 = vunpack.c.h.bf16 %v105_v1  ;;  %v94_v32 = vld [vmem:[%s157_s2] ss:$0 sm:$0xff] }
   0x4   :  { %v95_v34 = vld [vmem:[%s158_s3] ss:$0 sm:$0xff] }
   0x5   :  { %v25_v6 = vadd.f32 %v106_v3, %v102_v2  ;;  %v26_v7 = vadd.f32 %v107_v5, %v103_v4 }
   0x7   :  { %v28_v8 = vsel %vm27_vm0, %v25_v6, 0.0  ;;  %v37_v9 = vmul.f32 %v25_v6, %v25_v6  ;;  %v38_v10 = vmul.f32 %v26_v7, %v26_v7  ;;  %v31_v12 = vsel %vm27_vm0, %v26_v7, 0.0 }
   0x8   :  { %29 = vadd.xlane.f32.xlu0 %v28_v8 }
   0x9   :  { %v39_v11 = vsel %vm27_vm0, %v37_v9, 0.0  ;;  %v42_v13 = vsel %vm27_vm0, %v38_v10, 0.0 }
   0xa   :  { %40 = vadd.xlane.f32.xlu1 %v39_v11 }
   0xc   :  { %32 = vadd.xlane.f32.xlu0 %v31_v12 }
   0xe   :  { %43 = vadd.xlane.f32.xlu1 %v42_v13 }
  0x91   :  { %v30_v14 = vpop.xlane.xlu0 %29 }
  0x92   :  { %v35_v15 = vmul.f32 0.03125, %v30_v14 }
  0x93   :  { %v41_v16 = vpop.xlane.xlu1 %40 }
  0x94   :  { %v47_v17 = vmul.f32 %v35_v15, %v35_v15  ;;  %v45_v18 = vmul.f32 0.03125, %v41_v16  ;;  %v53_v30 = vsub.f32 %v25_v6, %v35_v15 }
  0x95   :  { %v33_v19 = vpop.xlane.xlu0 %32 }
  0x96   :  { %v49_v20 = vsub.f32 %v45_v18, %v47_v17  ;;  %v36_v21 = vmul.f32 0.03125, %v33_v19 }
  0x97   :  { %v44_v22 = vpop.xlane.xlu1 %43 }
  0x98   :  { %v51_v23 = vmax.f32 %v49_v20, 0.0  ;;  %v48_v24 = vmul.f32 %v36_v21, %v36_v21  ;;  %v46_v25 = vmul.f32 0.03125, %v44_v22  ;;  %v54_v36 = vsub.f32 %v26_v7, %v36_v21 }
  0x9a   :  { %v55_v26 = vadd.f32 1e-05, %v51_v23  ;;  %v50_v27 = vsub.f32 %v46_v25, %v48_v24 }
  0x9c   :  { %108 = vrsqrt.f32 %v55_v26  ;;  %v52_v28 = vmax.f32 %v50_v27, 0.0 }
  0x9e   :  { %v56_v29 = vadd.f32 1e-05, %v52_v28 }
  0xa0   :  { %110 = vrsqrt.f32 %v56_v29 }
  0xa9   :  { %v109_v31 = vpop.eup %108 }
  0xaa   :  { %v59_v33 = vmul.f32 %v109_v31, %v53_v30 }
  0xac   :  { %v68_v35 = vmul.f32 %v94_v32, %v59_v33 }
  0xad   :  { %v111_v37 = vpop.eup %110 }
  0xae   :  { %v77_v38 = vadd.f32 %v95_v34, %v68_v35  ;;  %v60_v39 = vmul.f32 %v111_v37, %v54_v36 }
  0xb0   :  { %v98_v40 = vpack.c.bf16 %v77_v38, %v77_v38  ;;  %v69_v41 = vmul.f32 %v94_v32, %v60_v39 }
  0xb2   :  { %88 = vst.msk [vmem:[%s159_s4] sm:$0xf] %vm87_vm1, %v98_v40  ;;  %v78_v42 = vadd.f32 %v95_v34, %v69_v41 }
  0xb4   :  { %v99_v43 = vpack.c.bf16 %v78_v42, %v78_v42 }
  0xb6   :  { %89 = vst.msk [vmem:[%s159_s4 + $0x4] sm:$0xf] %vm87_vm1, %v99_v43 }

// kernel: transformer_forward.41
= control target key start
LH: loop header
LB: loop body
LE: loop exit
PB: predicated region body
PF: predicated region fallthrough
CT: control target
= control target key end

     0   :  { %vm19_vm0 = vcmask 261120   ;;  %v150_v0 = vmov 0.0   ;;  %vm151_vm1 = vmmov 0   ;;  %vm118_vm2 = vcmask 257024   ;;  %s195_s1 = inlined_call_operand.vmem [shape: bf16[32,32], index: 1, kind: input, shape index: {}]   ;;  %s196_s0 = inlined_call_operand.vmem [shape: bf16[16,32], index: 0, kind: input, shape index: {}]   ;;  %s197_s2 = inlined_call_operand.vmem [shape: f32[1,32], index: 2, kind: input, shape index: {}]   ;;  %s198_s3 = inlined_call_operand.vmem [shape: bf16[16,32], index: 3, kind: output, shape index: {}]  }
   0x1   :  { %137 = vmatprep.subr.bf16.mxu0 %v150_v0  ;;  %v147_v1 = vld [vmem:[%s195_s1 + $0x8] sm:$0xff]   ;;  %141 = vmatprep.mubr.msk.bf16.mxu0 %vm151_vm1, %v150_v0  ;;  %20 = vst.msk [vmem:[#allocation2] sm:$0xff] %vm19_vm0, %v150_v0  ;;  %21 = vst.msk [vmem:[#allocation2 + $0x8] sm:$0xff] %vm19_vm0, %v150_v0  ;;  %v148_v2 = vld [vmem:[%s195_s1] sm:$0xff]  }
   0x2   :  { %138 = vmatpush3.bf16.msra.mxu0 %v147_v1  ;;  %v149_v3 = vld [vmem:[%s196_s0] sm:$0xff]  }
   0x3   :  { %139 = vmatprep.subr.bf16.mxu0 %v150_v0  ;;  %v129_v12 = vld [vmem:[%s197_s2] ss:$0 sm:$0xff] }
   0x6   :  { %140 = vmatpush3.bf16.msra.mxu0 %v148_v2 }
   0x8   :  { %v22_v4 = vld [vmem:[#allocation2] sm:$0xff]  ;;  %v23_v8 = vld [vmem:[#allocation2 + $0x8] sm:$0xff] }
   0x9   :  { %142 = vmatmul.mubr.msk.bf16.vlgmr.msra.gmra.mxu0 %vm19_vm0, %v149_v3 }
  0xc9   :  { %v85_v5 = vpop.f32.mrf.mxu0 }
  0xca   :  { %v92_v6 = vadd.f32 %v85_v5, %v22_v4 }
  0xcb   :  { %v143_v7 = vpop.f32.mrf.mxu0 }
  0xcc   :  { %94 = vst.msk [vmem:[#allocation2] sm:$0xff] %vm19_vm0, %v92_v6 }
  0xcd   :  { %v88_v9 = vpop.f32.mrf.mxu0 }
  0xce   :  { %v93_v10 = vadd.f32 %v88_v9, %v23_v8 }
  0xcf   :  { %v144_v11 = vpop.f32.mrf.mxu0 }
  0xd0   :  { %95 = vst.msk [vmem:[#allocation2 + $0x8] sm:$0xff] %vm19_vm0, %v93_v10 }
  0xd3   :  { %v99_v13 = vld [vmem:[#allocation2] sm:$0xff] }
  0xd4   :  { %v108_v14 = vadd.f32 %v129_v12, %v99_v13 }
  0xd6   :  { %v132_v15 = vpack.c.bf16 %v108_v14, %v108_v14 }
  0xd7   :  { %v100_v16 = vld [vmem:[#allocation2 + $0x8] sm:$0xff] }
  0xd8   :  { %119 = vst.msk [vmem:[%s198_s3] sm:$0xf] %vm118_vm2, %v132_v15  ;;  %v109_v17 = vadd.f32 %v129_v12, %v100_v16 }
  0xda   :  { %v133_v18 = vpack.c.bf16 %v109_v17, %v109_v17 }
  0xdc   :  { %120 = vst.msk [vmem:[%s198_s3 + $0x4] sm:$0xf] %vm118_vm2, %v133_v18 }

// kernel: transformer_forward.39
= control target key start
LH: loop header
LB: loop body
LE: loop exit
PB: predicated region body
PF: predicated region fallthrough
CT: control target
= control target key end

     0   :  { %vm19_vm0 = vcmask 785408   ;;  %v151_v0 = vmov 0.0   ;;  %vm152_vm1 = vmmov 0   ;;  %vm47_vm2 = vcmask 261120   ;;  %s195_s1 = inlined_call_operand.vmem [shape: bf16[32,96], index: 1, kind: input, shape index: {}]   ;;  %s196_s0 = inlined_call_operand.vmem [shape: bf16[16,32], index: 0, kind: input, shape index: {}]   ;;  %s197_s2 = inlined_call_operand.vmem [shape: f32[1,96], index: 2, kind: input, shape index: {}]   ;;  %s198_s3 = inlined_call_operand.vmem [shape: bf16[16,96], index: 3, kind: output, shape index: {}]  }
   0x1   :  { %138 = vmatprep.subr.bf16.mxu0 %v151_v0  ;;  %v148_v1 = vld [vmem:[%s195_s1 + $0x8] sm:$0xff]   ;;  %142 = vmatprep.mubr.msk.bf16.mxu0 %vm152_vm1, %v151_v0  ;;  %20 = vst.msk [vmem:[#allocation2] sm:$0xff] %vm19_vm0, %v151_v0  ;;  %21 = vst.msk [vmem:[#allocation2 + $0x8] sm:$0xff] %vm19_vm0, %v151_v0  ;;  %v149_v2 = vld [vmem:[%s195_s1] sm:$0xff]   ;;  %vm119_vm3 = vcmask 781312  }
   0x2   :  { %139 = vmatpush3.bf16.msra.mxu0 %v148_v1  ;;  %v150_v3 = vld [vmem:[%s196_s0] sm:$0xff]  }
   0x3   :  { %140 = vmatprep.subr.bf16.mxu0 %v151_v0  ;;  %v130_v12 = vld [vmem:[%s197_s2] ss:$0 sm:$0xff] }
   0x6   :  { %141 = vmatpush3.bf16.msra.mxu0 %v149_v2 }
   0x8   :  { %v22_v4 = vld [vmem:[#allocation2] sm:$0xff]  ;;  %v23_v8 = vld [vmem:[#allocation2 + $0x8] sm:$0xff] }
   0x9   :  { %143 = vmatmul.mubr.msk.bf16.vlgmr.msra.gmra.mxu0 %vm47_vm2, %v150_v3 }
  0xc9   :  { %v85_v5 = vpop.f32.mrf.mxu0 }
  0xca   :  { %v92_v6 = vadd.f32 %v85_v5, %v22_v4 }
  0xcb   :  { %v144_v7 = vpop.f32.mrf.mxu0 }
  0xcc   :  { %95 = vst.msk [vmem:[#allocation2] sm:$0xff] %vm19_vm0, %v92_v6 }
  0xcd   :  { %v88_v9 = vpop.f32.mrf.mxu0 }
  0xce   :  { %v93_v10 = vadd.f32 %v88_v9, %v23_v8 }
  0xcf   :  { %v145_v11 = vpop.f32.mrf.mxu0 }
  0xd0   :  { %96 = vst.msk [vmem:[#allocation2 + $0x8] sm:$0xff] %vm19_vm0, %v93_v10 }
  0xd3   :  { %v100_v13 = vld [vmem:[#allocation2] sm:$0xff] }
  0xd4   :  { %v109_v14 = vadd.f32 %v130_v12, %v100_v13 }
  0xd6   :  { %v133_v15 = vpack.c.bf16 %v109_v14, %v109_v14 }
  0xd7   :  { %v101_v16 = vld [vmem:[#allocation2 + $0x8] sm:$0xff] }
  0xd8   :  { %120 = vst.msk [vmem:[%s198_s3] sm:$0xf] %vm119_vm3, %v133_v15  ;;  %v110_v17 = vadd.f32 %v130_v12, %v101_v16 }
  0xda   :  { %v134_v18 = vpack.c.bf16 %v110_v17, %v110_v17 }
  0xdc   :  { %121 = vst.msk [vmem:[%s198_s3 + $0x4] sm:$0xf] %vm119_vm3, %v134_v18 }

// kernel: transformer_forward.40
= control target key start
LH: loop header
LB: loop body
LE: loop exit
PB: predicated region body
PF: predicated region fallthrough
CT: control target
= control target key end

     0   :  { %s854_s9 = smov 0   ;;  %s950_s0 = inlined_call_operand.vmem [shape: bf16[2,8,96], index: 0, kind: input, shape index: {}]   ;;  %s951_s1 = inlined_call_operand.vmem [shape: f32[2,1,8], index: 1, kind: input, shape index: {}]   ;;  %s952_s2 = inlined_call_operand.vmem [shape: bf16[2,8,32], index: 2, kind: output, shape index: {}]  }
   0x1 LB: > { %s691_s10 = sadd.s32 4294967295, %s821_s9   ;;  %p695_p0 = scmp.ge.s32.totalorder %s821_s9, 1  ;;  %s821_s9 = sphi %s854_s9, %s12_s9  }
   0x2   : > { %p119_p1 = scmp.lt.s32.totalorder %s821_s9, 3 }
   0x4   : > { %p120_p2 = pnand %p695_p0, %p119_p1 }
   0x5   : > { %p142_p3 = scmp.lt.s32.totalorder (!%p120_p2), %s691_s10, 1  ;;  %s825_s15 = smov (!%p120_p2), 96  }
   0x6   : > { %123 = sbr.rel (%p120_p2) target bundleno = 1539 (0x603), region = 28  ;;  %s826_s16 = smov (!%p120_p2), 64  }
   0x7   : > { %s827_s17 = smov (!%p120_p2), 88   ;;  %s828_s21 = smov (!%p120_p2), 72  }
   0x8   : > { %s829_s22 = smov (!%p120_p2), 120   ;;  %s830_s23 = smov (!%p120_p2), 80  }
   0x9   : > { %s831_s24 = smov (!%p120_p2), 112   ;;  %s832_s25 = smov (!%p120_p2), 104  }
   0xa   : > { %s833_s26 = smov (!%p120_p2), 56   ;;  %s834_s27 = smov (!%p120_p2), 48  }
   0xb   : > { %v823_v0 = vmov 0.0   ;;  %vm824_vm0 = vmmov 0   ;;  %s954_s10 = smov (!%p142_p3, %s691_s10), 1  ;;  %vm170_vm1 = vcmask 64512   ;;  %vm234_vm2 = vcmask 1043456   ;;  %s835_s28 = smov 40  }
   0xc   : > { %726 = vmatprep.subr.bf16.mxu0 %v823_v0  ;;  %728 = vmatprep.mubr.msk.bf16.mxu0 %vm824_vm0, %v823_v0  ;;  %s696_s11 = sshll.u32 %s954_s10, 2  ;;  %s148_s20 = scalar_lea.vmem %s951_s1, %s954_s10  ;;  %vm622_vm3 = vcmask 130048   ;;  %vm624_vm4 = vcmask 195584   ;;  %vm627_vm5 = vcmask 257024  }
   0xd   : > { %732 = vmatprep.subr.bf16.mxu1 %v823_v0  ;;  %734 = vmatprep.mubr.msk.bf16.mxu1 %vm824_vm0, %v823_v0  ;;  %s145_s14 = scalar_lea.vmem %s950_s0, %s696_s11  ;;  %v890_v8 = vld [vmem:[%s148_s20] ss:$0 sm:$0xff]  ;;  %s836_s29 = smov 8  }
   0xe   : > { %v154_v1 = vld [vmem:[%s145_s14] sm:$0xf]  ;;  %s837_s30 = smov 16   ;;  %s838_s3 = smov 24  }
   0xf   : > { %v876_v2 = vcombine.low %v154_v1, %v154_v1  ;;  %v162_v3 = vunpack.c.l.bf16 %v154_v1  ;;  %s152_s6 = scalar_lea.vmem %s952_s2, %s696_s11 }
  0x11   : > { %168 = vrot.lane.b32.xlu0 %v876_v2, %s825_s15  ;;  %v163_v6 = vmul.f32 0.35355338, %v162_v3  ;;  %229 = vrot.lane.b32.xlu1 %v876_v2, %s826_s16 }
  0x13   : > { %v164_v7 = vpack.c.bf16 %v163_v6, %v163_v6 }
  0x15   : > { %281 = vrot.lane.b32.xlu1 %v876_v2, %s827_s17 }
  0x83   : > { %v169_v4 = vpop.permute.xlu0 %168  ;;  %v230_v15 = vpop.permute.xlu1 %229 }
  0x84   : > { %v175_v5 = vsel %vm170_vm1, %v169_v4, 0  ;;  %v236_v16 = vsel %vm234_vm2, %v230_v15, 0 }
  0x85   : > { %727 = vmatpush3.bf16.xpose.msra.mxu0 %v175_v5  ;;  %733 = vmatpush3.bf16.msra.mxu1 %v236_v16 }
  0x86   : > { %744 = vmatprep.subr.bf16.mxu0 %v823_v0  ;;  %738 = vmatprep.subr.bf16.mxu1 %v823_v0 }
  0x87   : > { %v282_v22 = vpop.permute.xlu1 %281 }
  0x88   : > { %v287_v28 = vsel %vm170_vm1, %v282_v22, 0 }
  0x8c   : > { %729 = vmatmul.mubr.msk.bf16.vlgmr.msra.gmra.mxu0 %vm170_vm1, %v164_v7 }
  0x8d   : > { %746 = vmatprep.mubr.msk.bf16.mxu0 %vm824_vm0, %v823_v0 }
 0x14c   : > { %v211_v9 = vpop.f32.mrf.mxu0 }
 0x14d   : > { %v212_v10 = vadd.f32 %v890_v8, %v211_v9 }
 0x14e   : > { %v730_v11 = vpop.f32.mrf.mxu0 }
 0x14f   : > { %v217_v12 = vsel %vm170_vm1, %v212_v10, -inf }
 0x150   : > { %218 = vmax.xlane.f32.xlu0 %v217_v12  ;;  %v214_v13 = vpop.f32.mrf.mxu0 }
 0x152   : > { %v731_v14 = vpop.f32.mrf.mxu0 }
 0x166   : > { %501 = vrot.lane.b32.xlu0 %v876_v2, %s828_s21 }
 0x1d9   : > { %v219_v17 = vpop.xlane.xlu0 %218 }
 0x1da   : > { %v220_v18 = vsub.f32 %v212_v10, %v219_v17 }
 0x1dc   : > { %v221_v19 = vmul.f32 1.442695, %v220_v18 }
 0x1dd   : > { %v502_v31 = vpop.permute.xlu0 %501 }
 0x1de   : > { %799 = vpow2.f32 %v221_v19  ;;  %v507_v33 = vsel %vm170_vm1, %v502_v31, 0 }
 0x1eb   : > { %v800_v20 = vpop.eup %799 }
 0x1ec   : > { %v223_v21 = vsel %vm170_vm1, %v800_v20, 0.0 }
 0x1ed   : > { %224 = vadd.xlane.f32.xlu1 %v223_v21 }
 0x1fe   : > { %279 = vrot.lane.b32.xlu1 %v164_v7, %s829_s22 }
 0x202   : > { %391 = vrot.lane.b32.xlu1 %v876_v2, %s830_s23 }
 0x206   : > { %389 = vrot.lane.b32.xlu1 %v164_v7, %s831_s24 }
 0x20a   : > { %499 = vrot.lane.b32.xlu1 %v164_v7, %s832_s25 }
 0x276   : > { %v225_v23 = vpop.xlane.xlu1 %224 }
 0x277   : > { %801 = vrcp.f32 %v225_v23 }
 0x27a   : > { %v280_v26 = vpop.permute.xlu1 %279 }
 0x27e   : > { %v392_v29 = vpop.permute.xlu1 %391 }
 0x27f   : > { %v397_v30 = vsel %vm170_vm1, %v392_v29, 0 }
 0x282   : > { %v390_v32 = vpop.permute.xlu1 %389 }
 0x284   : > { %v802_v24 = vpop.eup %801 }
 0x285   : > { %v227_v25 = vmul.f32 %v802_v24, %v800_v20 }
 0x286   : > { %v500_v34 = vpop.permute.xlu1 %499 }
 0x287   : > { %v228_v27 = vpack.c.bf16 %v227_v25, %v227_v25 }
 0x289   : > { %735 = vmatmul.mubr.msk.bf16.vlgmr.msra.gmra.mxu1 %vm170_vm1, %v228_v27 }
 0x28a   : > { %739 = vmatpush3.bf16.xpose.msra.mxu1 %v287_v28  ;;  %740 = vmatprep.mubr.msk.bf16.mxu1 %vm824_vm0, %v823_v0 }
 0x28b   : > { %750 = vmatprep.subr.bf16.mxu1 %v823_v0 }
 0x291   : > { %741 = vmatmul.mubr.msk.bf16.vlgmr.msra.gmra.mxu1 %vm170_vm1, %v280_v26 }
 0x292   : > { %751 = vmatpush3.bf16.xpose.msra.mxu1 %v397_v30  ;;  %752 = vmatprep.mubr.msk.bf16.mxu1 %vm824_vm0, %v823_v0 }
 0x293   : > { %762 = vmatprep.subr.bf16.mxu1 %v823_v0 }
 0x299   : > { %753 = vmatmul.mubr.msk.bf16.vlgmr.msra.gmra.mxu1 %vm170_vm1, %v390_v32 }
 0x29a   : > { %763 = vmatpush3.bf16.xpose.msra.mxu1 %v507_v33  ;;  %764 = vmatprep.mubr.msk.bf16.mxu1 %vm824_vm0, %v823_v0 }
 0x2a1   : > { %765 = vmatmul.mubr.msk.bf16.vlgmr.msra.gmra.mxu1 %vm170_vm1, %v500_v34 }
 0x349   : > { %v914_v35 = vpop.f32.mrf.mxu1 }
 0x34b   : > { %v736_v36 = vpop.f32.mrf.mxu1 }
 0x34d   : > { %v275_v37 = vpop.f32.mrf.mxu1 }
 0x34f   : > { %v737_v38 = vpop.f32.mrf.mxu1 }
 0x351   : > { %v323_v39 = vpop.f32.mrf.mxu1 }
 0x352   : > { %v324_v40 = vadd.f32 %v890_v8, %v323_v39 }
 0x353   : > { %v742_v41 = vpop.f32.mrf.mxu1 }
 0x354   : > { %v329_v42 = vsel %vm170_vm1, %v324_v40, -inf }
 0x355   : > { %330 = vmax.xlane.f32.xlu1 %v329_v42  ;;  %v326_v43 = vpop.f32.mrf.mxu1 }
 0x357   : > { %v743_v44 = vpop.f32.mrf.mxu1 }
 0x359   : > { %v433_v45 = vpop.f32.mrf.mxu1 }
 0x35a   : > { %v434_v46 = vadd.f32 %v890_v8, %v433_v45 }
 0x35b   : > { %v754_v47 = vpop.f32.mrf.mxu1 }
 0x35c   : > { %v439_v48 = vsel %vm170_vm1, %v434_v46, -inf }
 0x35d   : > { %440 = vmax.xlane.f32.xlu0 %v439_v48  ;;  %v436_v49 = vpop.f32.mrf.mxu1 }
 0x35f   : > { %v755_v50 = vpop.f32.mrf.mxu1 }
 0x361   : > { %v543_v51 = vpop.f32.mrf.mxu1 }
 0x362   : > { %v544_v52 = vadd.f32 %v890_v8, %v543_v51 }
 0x363   : > { %v766_v53 = vpop.f32.mrf.mxu1 }
 0x364   : > { %v549_v54 = vsel %vm170_vm1, %v544_v52, -inf }
 0x365   : > { %550 = vmax.xlane.f32.xlu1 %v549_v54  ;;  %v546_v55 = vpop.f32.mrf.mxu1 }
 0x367   : > { %v767_v56 = vpop.f32.mrf.mxu1 }
 0x3de   : > { %v331_v57 = vpop.xlane.xlu1 %330 }
 0x3df   : > { %v332_v58 = vsub.f32 %v324_v40, %v331_v57 }
 0x3e1   : > { %v333_v59 = vmul.f32 1.442695, %v332_v58 }
 0x3e3   : > { %803 = vpow2.f32 %v333_v59 }
 0x3e6   : > { %v441_v5 = vpop.xlane.xlu0 %440 }
 0x3e7   : > { %v442_v6 = vsub.f32 %v434_v46, %v441_v5 }
 0x3e9   : > { %v443_v7 = vmul.f32 1.442695, %v442_v6 }
 0x3ee   : > { %v551_v60 = vpop.xlane.xlu1 %550 }
 0x3ef   : > { %v552_v61 = vsub.f32 %v544_v52, %v551_v60 }
 0x3f0   : > { %v804_v62 = vpop.eup %803 }
 0x3f1   : > { %v553_v63 = vmul.f32 1.442695, %v552_v61  ;;  %v335_v1 = vsel %vm170_vm1, %v804_v62, 0.0 }
 0x3f2   : > { %336 = vadd.xlane.f32.xlu1 %v335_v1 }
 0x3f3   : > { %805 = vpow2.f32 %v553_v63 }
 0x3f4   : > { %807 = vpow2.f32 %v443_v7 }
 0x400   : > { %v806_v3 = vpop.eup %805 }
 0x401   : > { %v555_v4 = vsel %vm170_vm1, %v806_v3, 0.0  ;;  %v808_v8 = vpop.eup %807 }
 0x402   : > { %556 = vadd.xlane.f32.xlu0 %v555_v4  ;;  %v445_v9 = vsel %vm170_vm1, %v808_v8, 0.0 }
 0x403   : > { %341 = vrot.lane.b32.xlu1 %v876_v2, %s833_s26 }
 0x418   : > { %451 = vrot.lane.b32.xlu0 %v876_v2, %s834_s27 }
 0x427   : > { %446 = vadd.xlane.f32.xlu1 %v445_v9 }
 0x438   : > { %561 = vrot.lane.b32.xlu1 %v876_v2, %s835_s28 }
 0x47b   : > { %v337_v10 = vpop.xlane.xlu1 %336 }
 0x47c   : > { %809 = vrcp.f32 %v337_v10 }
 0x47f   : > { %v342_v11 = vpop.permute.xlu1 %341 }
 0x480   : > { %v347_v12 = vsel %vm234_vm2, %v342_v11, 0 }
 0x481   : > { %745 = vmatpush3.bf16.msra.mxu0 %v347_v12 }
 0x482   : > { %756 = vmatprep.subr.bf16.mxu0 %v823_v0 }
 0x489   : > { %v810_v13 = vpop.eup %809 }
 0x48a   : > { %v339_v14 = vmul.f32 %v810_v13, %v804_v62 }
 0x48b   : > { %v557_v15 = vpop.xlane.xlu0 %556 }
 0x48c   : > { %v340_v16 = vpack.c.bf16 %v339_v14, %v339_v14 }
 0x48e   : > { %747 = vmatmul.mubr.msk.bf16.vlgmr.msra.gmra.mxu0 %vm170_vm1, %v340_v16 }
 0x48f   : > { %v452_v17 = vpop.permute.xlu0 %451  ;;  %758 = vmatprep.mubr.msk.bf16.mxu0 %vm824_vm0, %v823_v0 }
 0x490   : > { %v457_v2 = vsel %vm234_vm2, %v452_v17, 0 }
 0x491   : > { %757 = vmatpush3.bf16.msra.mxu0 %v457_v2 }
 0x492   : > { %768 = vmatprep.subr.bf16.mxu0 %v823_v0 }
 0x4b0   : > { %v447_v18 = vpop.xlane.xlu1 %446 }
 0x4b1   : > { %811 = vrcp.f32 %v447_v18 }
 0x4b2   : > { %813 = vrcp.f32 %v557_v15 }
 0x4b4   : > { %v562_v20 = vpop.permute.xlu1 %561 }
 0x4b5   : > { %v567_v22 = vsel %vm234_vm2, %v562_v20, 0 }
 0x4be   : > { %v812_v19 = vpop.eup %811 }
 0x4bf   : > { %v449_v21 = vmul.f32 %v812_v19, %v808_v8  ;;  %v814_v24 = vpop.eup %813 }
 0x4c0   : > { %v559_v25 = vmul.f32 %v814_v24, %v806_v3 }
 0x4c1   : > { %v450_v23 = vpack.c.bf16 %v449_v21, %v449_v21 }
 0x4c2   : > { %v560_v26 = vpack.c.bf16 %v559_v25, %v559_v25 }
 0x4c3   : > { %759 = vmatmul.mubr.msk.bf16.vlgmr.msra.gmra.mxu0 %vm170_vm1, %v450_v23 }
 0x4c4   : > { %769 = vmatpush3.bf16.msra.mxu0 %v567_v22  ;;  %770 = vmatprep.mubr.msk.bf16.mxu0 %vm824_vm0, %v823_v0 }
 0x4cb   : > { %771 = vmatmul.mubr.msk.bf16.vlgmr.msra.gmra.mxu0 %vm170_vm1, %v560_v26 }
 0x54e   : > { %v383_v27 = vpop.f32.mrf.mxu0 }
 0x54f   : > { %610 = vrot.lane.b32.xlu1 %v383_v27, %s836_s29 }
 0x550   : > { %v748_v28 = vpop.f32.mrf.mxu0 }
 0x552   : > { %v386_v29 = vpop.f32.mrf.mxu0 }
 0x554   : > { %v749_v30 = vpop.f32.mrf.mxu0 }
 0x583   : > { %v493_v31 = vpop.f32.mrf.mxu0 }
 0x584   : > { %614 = vrot.lane.b32.xlu0 %v493_v31, %s837_s30 }
 0x585   : > { %v760_v32 = vpop.f32.mrf.mxu0 }
 0x587   : > { %v496_v33 = vpop.f32.mrf.mxu0 }
 0x589   : > { %v761_v34 = vpop.f32.mrf.mxu0 }
 0x58b   : > { %v603_v36 = vpop.f32.mrf.mxu0 }
 0x58c   : > { %618 = vrot.lane.b32.xlu1 %v603_v36, %s838_s3 }
 0x58d   : > { %v772_v0 = vpop.f32.mrf.mxu0 }
 0x58f   : > { %v606_v37 = vpop.f32.mrf.mxu0 }
 0x591   : > { %v773_v38 = vpop.f32.mrf.mxu0 }
 0x5c1   : > { %v611_v39 = vpop.permute.xlu1 %610 }
 0x5c2   : > { %v621_v41 = vsel %vm170_vm1, %v914_v35, %v611_v39 }
 0x5f6   : > { %v615_v40 = vpop.permute.xlu0 %614 }
 0x5f7   : > { %v623_v42 = vsel %vm622_vm3, %v621_v41, %v615_v40 }
 0x5fe   : > { %v619_v43 = vpop.permute.xlu1 %618 }
 0x5ff   : > { %v625_v44 = vsel %vm624_vm4, %v623_v42, %v619_v43 }
 0x600   : > { %v626_v45 = vpack.c.bf16 %v625_v44, %v625_v44 }
 0x602   : > { %628 = vst.msk [vmem:[%s152_s6] sm:$0xf] %vm627_vm5, %v626_v45 }
 0x603 PF: > { %s12_s9 = sadd.s32 1, %s821_s9  }
 0x604   : > { %p9_p4 = scmp.ge.s32.totalorder %s12_s9, 4  }
 0x606   :  { %11 = sbr.rel (!%p9_p4) target bundleno = 1 (0x1), region = 61 }

// kernel: transformer_forward.43
= control target key start
LH: loop header
LB: loop body
LE: loop exit
PB: predicated region body
PF: predicated region fallthrough
CT: control target
= control target key end

     0   :  { %vm19_vm0 = vcmask 523264   ;;  %v153_v0 = vmov 0.0   ;;  %vm154_vm1 = vmmov 0   ;;  %vm47_vm2 = vcmask 261120   ;;  %s197_s1 = inlined_call_operand.vmem [shape: bf16[32,64], index: 1, kind: input, shape index: {}]   ;;  %s198_s0 = inlined_call_operand.vmem [shape: bf16[16,32], index: 0, kind: input, shape index: {}]   ;;  %s199_s2 = inlined_call_operand.vmem [shape: f32[1,64], index: 2, kind: input, shape index: {}]   ;;  %s200_s3 = inlined_call_operand.vmem [shape: bf16[16,64], index: 3, kind: output, shape index: {}]  }
   0x1   :  { %140 = vmatprep.subr.bf16.mxu0 %v153_v0  ;;  %v150_v1 = vld [vmem:[%s197_s1 + $0x8] sm:$0xff]   ;;  %144 = vmatprep.mubr.msk.bf16.mxu0 %vm154_vm1, %v153_v0  ;;  %20 = vst.msk [vmem:[#allocation2] sm:$0xff] %vm19_vm0, %v153_v0  ;;  %21 = vst.msk [vmem:[#allocation2 + $0x8] sm:$0xff] %vm19_vm0, %v153_v0  ;;  %v151_v2 = vld [vmem:[%s197_s1] sm:$0xff]   ;;  %vm121_vm3 = vcmask 519168  }
   0x2   :  { %141 = vmatpush3.bf16.msra.mxu0 %v150_v1  ;;  %v152_v3 = vld [vmem:[%s198_s0] sm:$0xff]  }
   0x3   :  { %142 = vmatprep.subr.bf16.mxu0 %v153_v0  ;;  %v132_v12 = vld [vmem:[%s199_s2] ss:$0 sm:$0xff] }
   0x6   :  { %143 = vmatpush3.bf16.msra.mxu0 %v151_v2 }
   0x8   :  { %v22_v4 = vld [vmem:[#allocation2] sm:$0xff]  ;;  %v23_v8 = vld [vmem:[#allocation2 + $0x8] sm:$0xff] }
   0x9   :  { %145 = vmatmul.mubr.msk.bf16.vlgmr.msra.gmra.mxu0 %vm47_vm2, %v152_v3 }
  0xc9   :  { %v85_v5 = vpop.f32.mrf.mxu0 }
  0xca   :  { %v92_v6 = vadd.f32 %v85_v5, %v22_v4 }
  0xcb   :  { %v146_v7 = vpop.f32.mrf.mxu0 }
  0xcc   :  { %95 = vst.msk [vmem:[#allocation2] sm:$0xff] %vm19_vm0, %v92_v6 }
  0xcd   :  { %v88_v9 = vpop.f32.mrf.mxu0 }
  0xce   :  { %v93_v10 = vadd.f32 %v88_v9, %v23_v8 }
  0xcf   :  { %v147_v11 = vpop.f32.mrf.mxu0 }
  0xd0   :  { %96 = vst.msk [vmem:[#allocation2 + $0x8] sm:$0xff] %vm19_vm0, %v93_v10 }
  0xd3   :  { %v100_v13 = vld [vmem:[#allocation2] sm:$0xff] }
  0xd4   :  { %v109_v14 = vadd.f32 %v132_v12, %v100_v13 }
  0xd6   :  { %v111_v15 = vmax.f32 %v109_v14, 0.0 }
  0xd7   :  { %v101_v16 = vld [vmem:[#allocation2 + $0x8] sm:$0xff] }
  0xd8   :  { %v135_v17 = vpack.c.bf16 %v111_v15, %v111_v15  ;;  %v110_v18 = vadd.f32 %v132_v12, %v101_v16 }
  0xda   :  { %122 = vst.msk [vmem:[%s200_s3] sm:$0xf] %vm121_vm3, %v135_v17  ;;  %v112_v19 = vmax.f32 %v110_v18, 0.0 }
  0xdc   :  { %v136_v20 = vpack.c.bf16 %v112_v19, %v112_v19 }
  0xde   :  { %123 = vst.msk [vmem:[%s200_s3 + $0x4] sm:$0xf] %vm121_vm3, %v136_v20 }

// kernel: transformer_forward.44
= control target key start
LH: loop header
LB: loop body
LE: loop exit
PB: predicated region body
PF: predicated region fallthrough
CT: control target
= control target key end

     0   :  { %vm19_vm0 = vcmask 261120   ;;  %v177_v0 = vmov 0.0   ;;  %vm178_vm1 = vmmov 0   ;;  %vm63_vm2 = vcmask 523264   ;;  %s227_s1 = inlined_call_operand.vmem [shape: bf16[64,32], index: 1, kind: input, shape index: {}]   ;;  %s228_s0 = inlined_call_operand.vmem [shape: bf16[16,64], index: 0, kind: input, shape index: {}]   ;;  %s229_s2 = inlined_call_operand.vmem [shape: f32[1,32], index: 2, kind: input, shape index: {}]   ;;  %s230_s3 = inlined_call_operand.vmem [shape: bf16[16,32], index: 3, kind: output, shape index: {}]  }
   0x1   :  { %158 = vmatprep.subr.bf16.mxu0 %v177_v0  ;;  %v172_v1 = vld [vmem:[%s227_s1 + $0x18] sm:$0xff]   ;;  %166 = vmatprep.mubr.msk.bf16.mxu0 %vm178_vm1, %v177_v0  ;;  %20 = vst.msk [vmem:[#allocation2] sm:$0xff] %vm19_vm0, %v177_v0  ;;  %21 = vst.msk [vmem:[#allocation2 + $0x8] sm:$0xff] %vm19_vm0, %v177_v0  ;;  %v173_v2 = vld [vmem:[%s227_s1 + $0x10] sm:$0xff]   ;;  %vm135_vm3 = vcmask 257024  }
   0x2   :  { %159 = vmatpush3.bf16.msra.mxu0 %v172_v1  ;;  %v174_v3 = vld [vmem:[%s227_s1 + $0x8] sm:$0xff]   ;;  %v175_v4 = vld [vmem:[%s227_s1] sm:$0xff]  }
   0x3   :  { %160 = vmatprep.subr.bf16.mxu0 %v177_v0  ;;  %v176_v5 = vld [vmem:[%s228_s0] sm:$0xff]  }
   0x4   :  { %v148_v14 = vld [vmem:[%s229_s2] ss:$0 sm:$0xff] }
   0x6   :  { %161 = vmatpush3.bf16.msra.mxu0 %v173_v2 }
   0x7   :  { %162 = vmatprep.subr.bf16.mxu0 %v177_v0 }
   0x8   :  { %v22_v6 = vld [vmem:[#allocation2] sm:$0xff]  ;;  %v23_v10 = vld [vmem:[#allocation2 + $0x8] sm:$0xff] }
   0xa   :  { %163 = vmatpush3.bf16.msra.mxu0 %v174_v3 }
   0xb   :  { %164 = vmatprep.subr.bf16.mxu0 %v177_v0 }
   0xe   :  { %165 = vmatpush3.bf16.msra.mxu0 %v175_v4 }
  0x11   :  { %167 = vmatmul.mubr.msk.bf16.vlgmr.msra.gmra.mxu0 %vm63_vm2, %v176_v5 }
  0xd1   :  { %v101_v7 = vpop.f32.mrf.mxu0 }
  0xd2   :  { %v108_v8 = vadd.f32 %v101_v7, %v22_v6 }
  0xd3   :  { %v168_v9 = vpop.f32.mrf.mxu0 }
  0xd4   :  { %111 = vst.msk [vmem:[#allocation2] sm:$0xff] %vm19_vm0, %v108_v8 }
  0xd5   :  { %v104_v11 = vpop.f32.mrf.mxu0 }
  0xd6   :  { %v109_v12 = vadd.f32 %v104_v11, %v23_v10 }
  0xd7   :  { %v169_v13 = vpop.f32.mrf.mxu0 }
  0xd8   :  { %112 = vst.msk [vmem:[#allocation2 + $0x8] sm:$0xff] %vm19_vm0, %v109_v12 }
  0xdb   :  { %v116_v15 = vld [vmem:[#allocation2] sm:$0xff] }
  0xdc   :  { %v125_v16 = vadd.f32 %v148_v14, %v116_v15 }
  0xde   :  { %v151_v17 = vpack.c.bf16 %v125_v16, %v125_v16 }
  0xdf   :  { %v117_v18 = vld [vmem:[#allocation2 + $0x8] sm:$0xff] }
  0xe0   :  { %136 = vst.msk [vmem:[%s230_s3] sm:$0xf] %vm135_vm3, %v151_v17  ;;  %v126_v19 = vadd.f32 %v148_v14, %v117_v18 }
  0xe2   :  { %v152_v20 = vpack.c.bf16 %v126_v19, %v126_v19 }
  0xe4   :  { %137 = vst.msk [vmem:[%s230_s3 + $0x4] sm:$0xf] %vm135_vm3, %v152_v20 }

// kernel: transformer_forward.58
= control target key start
LH: loop header
LB: loop body
LE: loop exit
PB: predicated region body
PF: predicated region fallthrough
CT: control target
= control target key end

     0   :  { %vm19_vm0 = vcmask 523264   ;;  %v151_v0 = vmov 0.0   ;;  %vm152_vm1 = vmmov 0   ;;  %vm47_vm2 = vcmask 261120   ;;  %s195_s1 = inlined_call_operand.vmem [shape: bf16[32,64], index: 1, kind: input, shape index: {}]   ;;  %s196_s0 = inlined_call_operand.vmem [shape: bf16[16,32], index: 0, kind: input, shape index: {}]   ;;  %s197_s2 = inlined_call_operand.vmem [shape: f32[1,64], index: 2, kind: input, shape index: {}]   ;;  %s198_s3 = inlined_call_operand.vmem [shape: bf16[16,64], index: 3, kind: output, shape index: {}]  }
   0x1   :  { %138 = vmatprep.subr.bf16.mxu0 %v151_v0  ;;  %v148_v1 = vld [vmem:[%s195_s1 + $0x8] sm:$0xff]   ;;  %142 = vmatprep.mubr.msk.bf16.mxu0 %vm152_vm1, %v151_v0  ;;  %20 = vst.msk [vmem:[#allocation2] sm:$0xff] %vm19_vm0, %v151_v0  ;;  %21 = vst.msk [vmem:[#allocation2 + $0x8] sm:$0xff] %vm19_vm0, %v151_v0  ;;  %v149_v2 = vld [vmem:[%s195_s1] sm:$0xff]   ;;  %vm119_vm3 = vcmask 519168  }
   0x2   :  { %139 = vmatpush3.bf16.msra.mxu0 %v148_v1  ;;  %v150_v3 = vld [vmem:[%s196_s0] sm:$0xff]  }
   0x3   :  { %140 = vmatprep.subr.bf16.mxu0 %v151_v0  ;;  %v130_v12 = vld [vmem:[%s197_s2] ss:$0 sm:$0xff] }
   0x6   :  { %141 = vmatpush3.bf16.msra.mxu0 %v149_v2 }
   0x8   :  { %v22_v4 = vld [vmem:[#allocation2] sm:$0xff]  ;;  %v23_v8 = vld [vmem:[#allocation2 + $0x8] sm:$0xff] }
   0x9   :  { %143 = vmatmul.mubr.msk.bf16.vlgmr.msra.gmra.mxu0 %vm47_vm2, %v150_v3 }
  0xc9   :  { %v85_v5 = vpop.f32.mrf.mxu0 }
  0xca   :  { %v92_v6 = vadd.f32 %v85_v5, %v22_v4 }
  0xcb   :  { %v144_v7 = vpop.f32.mrf.mxu0 }
  0xcc   :  { %95 = vst.msk [vmem:[#allocation2] sm:$0xff] %vm19_vm0, %v92_v6 }
  0xcd   :  { %v88_v9 = vpop.f32.mrf.mxu0 }
  0xce   :  { %v93_v10 = vadd.f32 %v88_v9, %v23_v8 }
  0xcf   :  { %v145_v11 = vpop.f32.mrf.mxu0 }
  0xd0   :  { %96 = vst.msk [vmem:[#allocation2 + $0x8] sm:$0xff] %vm19_vm0, %v93_v10 }
  0xd3   :  { %v100_v13 = vld [vmem:[#allocation2] sm:$0xff] }
  0xd4   :  { %v109_v14 = vadd.f32 %v130_v12, %v100_v13 }
  0xd6   :  { %v133_v15 = vpack.c.bf16 %v109_v14, %v109_v14 }
  0xd7   :  { %v101_v16 = vld [vmem:[#allocation2 + $0x8] sm:$0xff] }
  0xd8   :  { %120 = vst.msk [vmem:[%s198_s3] sm:$0xf] %vm119_vm3, %v133_v15  ;;  %v110_v17 = vadd.f32 %v130_v12, %v101_v16 }
  0xda   :  { %v134_v18 = vpack.c.bf16 %v110_v17, %v110_v17 }
  0xdc   :  { %121 = vst.msk [vmem:[%s198_s3 + $0x4] sm:$0xf] %vm119_vm3, %v134_v18 }

// kernel: transformer_forward.54
= control target key start
LH: loop header
LB: loop body
LE: loop exit
PB: predicated region body
PF: predicated region fallthrough
CT: control target
= control target key end

     0   :  { %s860_s9 = smov 0   ;;  %s956_s0 = inlined_call_operand.vmem [shape: bf16[2,8,96], index: 0, kind: input, shape index: {}]   ;;  %s957_s1 = inlined_call_operand.vmem [shape: f32[2,1,8], index: 1, kind: input, shape index: {}]   ;;  %s958_s2 = inlined_call_operand.vmem [shape: bf16[2,8,32], index: 2, kind: output, shape index: {}]  }
   0x1 LB: > { %s697_s10 = sadd.s32 4294967295, %s827_s9   ;;  %p701_p0 = scmp.ge.s32.totalorder %s827_s9, 1  ;;  %s827_s9 = sphi %s860_s9, %s12_s9  }
   0x2   : > { %p119_p1 = scmp.lt.s32.totalorder %s827_s9, 3 }
   0x4   : > { %p120_p2 = pnand %p701_p0, %p119_p1 }
   0x5   : > { %p142_p3 = scmp.lt.s32.totalorder (!%p120_p2), %s697_s10, 1  ;;  %s831_s15 = smov (!%p120_p2), 96  }
   0x6   : > { %123 = sbr.rel (%p120_p2) target bundleno = 1539 (0x603), region = 28  ;;  %s832_s16 = smov (!%p120_p2), 64  }
   0x7   : > { %s833_s17 = smov (!%p120_p2), 88   ;;  %s834_s21 = smov (!%p120_p2), 72  }
   0x8   : > { %s835_s22 = smov (!%p120_p2), 120   ;;  %s836_s23 = smov (!%p120_p2), 80  }
   0x9   : > { %s837_s24 = smov (!%p120_p2), 112   ;;  %s838_s25 = smov (!%p120_p2), 104  }
   0xa   : > { %s839_s26 = smov (!%p120_p2), 56   ;;  %s840_s27 = smov (!%p120_p2), 48  }
   0xb   : > { %v829_v0 = vmov 0.0   ;;  %vm830_vm0 = vmmov 0   ;;  %s960_s10 = smov (!%p142_p3, %s697_s10), 1  ;;  %vm176_vm1 = vcmask 64512   ;;  %v162_v8 = vlaneseq  ;;  %s841_s28 = smov 40  }
   0xc   : > { %732 = vmatprep.subr.bf16.mxu0 %v829_v0  ;;  %734 = vmatprep.mubr.msk.bf16.mxu0 %vm830_vm0, %v829_v0  ;;  %s702_s11 = sshll.u32 %s960_s10, 2  ;;  %s148_s20 = scalar_lea.vmem %s957_s1, %s960_s10  ;;  %vm240_vm3 = vcmask 1043456   ;;  %vm628_vm4 = vcmask 130048   ;;  %vm630_vm5 = vcmask 195584   ;;  %vm633_vm6 = vcmask 257024  }
   0xd   : > { %738 = vmatprep.subr.bf16.mxu1 %v829_v0  ;;  %740 = vmatprep.mubr.msk.bf16.mxu1 %vm830_vm0, %v829_v0  ;;  %s145_s14 = scalar_lea.vmem %s956_s0, %s702_s11  ;;  %v163_v9 = vshrl.u32 %v162_v8, 7  ;;  %v165_v10 = vand.u32 127, %v162_v8  ;;  %v704_v11 = vld [vmem:[%s148_s20] ss:$0 sm:$0xff]  ;;  %s842_s29 = smov 8  }
   0xe   : > { %v154_v1 = vld [vmem:[%s145_s14] sm:$0xf]  ;;  %s843_s30 = smov 16   ;;  %s844_s3 = smov 24  }
   0xf   : > { %v882_v2 = vcombine.low %v154_v1, %v154_v1  ;;  %v168_v3 = vunpack.c.l.bf16 %v154_v1  ;;  %vm166_vm2 = vcmp.gt.s32.totalorder %v165_v10, %v163_v9  ;;  %s152_s6 = scalar_lea.vmem %s958_s2, %s702_s11 }
  0x10   : > { %v896_v12 = vsel %vm166_vm2, -1e+09, %v704_v11 }
  0x11   : > { %174 = vrot.lane.b32.xlu0 %v882_v2, %s831_s15  ;;  %v169_v6 = vmul.f32 0.35355338, %v168_v3  ;;  %235 = vrot.lane.b32.xlu1 %v882_v2, %s832_s16 }
  0x13   : > { %v170_v7 = vpack.c.bf16 %v169_v6, %v169_v6 }
  0x15   : > { %287 = vrot.lane.b32.xlu1 %v882_v2, %s833_s17 }
  0x83   : > { %v175_v4 = vpop.permute.xlu0 %174  ;;  %v236_v19 = vpop.permute.xlu1 %235 }
  0x84   : > { %v181_v5 = vsel %vm176_vm1, %v175_v4, 0  ;;  %v242_v20 = vsel %vm240_vm3, %v236_v19, 0 }
  0x85   : > { %733 = vmatpush3.bf16.xpose.msra.mxu0 %v181_v5  ;;  %739 = vmatpush3.bf16.msra.mxu1 %v242_v20 }
  0x86   : > { %750 = vmatprep.subr.bf16.mxu0 %v829_v0  ;;  %744 = vmatprep.subr.bf16.mxu1 %v829_v0 }
  0x87   : > { %v288_v26 = vpop.permute.xlu1 %287 }
  0x88   : > { %v293_v32 = vsel %vm176_vm1, %v288_v26, 0 }
  0x8c   : > { %735 = vmatmul.mubr.msk.bf16.vlgmr.msra.gmra.mxu0 %vm176_vm1, %v170_v7 }
  0x8d   : > { %752 = vmatprep.mubr.msk.bf16.mxu0 %vm830_vm0, %v829_v0 }
 0x14c   : > { %v217_v13 = vpop.f32.mrf.mxu0 }
 0x14d   : > { %v218_v14 = vadd.f32 %v217_v13, %v896_v12 }
 0x14e   : > { %v736_v15 = vpop.f32.mrf.mxu0 }
 0x14f   : > { %v223_v16 = vsel %vm176_vm1, %v218_v14, -inf }
 0x150   : > { %224 = vmax.xlane.f32.xlu0 %v223_v16  ;;  %v220_v17 = vpop.f32.mrf.mxu0 }
 0x152   : > { %v737_v18 = vpop.f32.mrf.mxu0 }
 0x166   : > { %507 = vrot.lane.b32.xlu0 %v882_v2, %s834_s21 }
 0x1d9   : > { %v225_v21 = vpop.xlane.xlu0 %224 }
 0x1da   : > { %v226_v22 = vsub.f32 %v218_v14, %v225_v21 }
 0x1dc   : > { %v227_v23 = vmul.f32 1.442695, %v226_v22 }
 0x1dd   : > { %v508_v35 = vpop.permute.xlu0 %507 }
 0x1de   : > { %805 = vpow2.f32 %v227_v23  ;;  %v513_v37 = vsel %vm176_vm1, %v508_v35, 0 }
 0x1eb   : > { %v806_v24 = vpop.eup %805 }
 0x1ec   : > { %v229_v25 = vsel %vm176_vm1, %v806_v24, 0.0 }
 0x1ed   : > { %230 = vadd.xlane.f32.xlu1 %v229_v25 }
 0x1fe   : > { %285 = vrot.lane.b32.xlu1 %v170_v7, %s835_s22 }
 0x202   : > { %397 = vrot.lane.b32.xlu1 %v882_v2, %s836_s23 }
 0x206   : > { %395 = vrot.lane.b32.xlu1 %v170_v7, %s837_s24 }
 0x20a   : > { %505 = vrot.lane.b32.xlu1 %v170_v7, %s838_s25 }
 0x276   : > { %v231_v27 = vpop.xlane.xlu1 %230 }
 0x277   : > { %807 = vrcp.f32 %v231_v27 }
 0x27a   : > { %v286_v30 = vpop.permute.xlu1 %285 }
 0x27e   : > { %v398_v33 = vpop.permute.xlu1 %397 }
 0x27f   : > { %v403_v34 = vsel %vm176_vm1, %v398_v33, 0 }
 0x282   : > { %v396_v36 = vpop.permute.xlu1 %395 }
 0x284   : > { %v808_v28 = vpop.eup %807 }
 0x285   : > { %v233_v29 = vmul.f32 %v808_v28, %v806_v24 }
 0x286   : > { %v506_v38 = vpop.permute.xlu1 %505 }
 0x287   : > { %v234_v31 = vpack.c.bf16 %v233_v29, %v233_v29 }
 0x289   : > { %741 = vmatmul.mubr.msk.bf16.vlgmr.msra.gmra.mxu1 %vm176_vm1, %v234_v31 }
 0x28a   : > { %745 = vmatpush3.bf16.xpose.msra.mxu1 %v293_v32  ;;  %746 = vmatprep.mubr.msk.bf16.mxu1 %vm830_vm0, %v829_v0 }
 0x28b   : > { %756 = vmatprep.subr.bf16.mxu1 %v829_v0 }
 0x291   : > { %747 = vmatmul.mubr.msk.bf16.vlgmr.msra.gmra.mxu1 %vm176_vm1, %v286_v30 }
 0x292   : > { %757 = vmatpush3.bf16.xpose.msra.mxu1 %v403_v34  ;;  %758 = vmatprep.mubr.msk.bf16.mxu1 %vm830_vm0, %v829_v0 }
 0x293   : > { %768 = vmatprep.subr.bf16.mxu1 %v829_v0 }
 0x299   : > { %759 = vmatmul.mubr.msk.bf16.vlgmr.msra.gmra.mxu1 %vm176_vm1, %v396_v36 }
 0x29a   : > { %769 = vmatpush3.bf16.xpose.msra.mxu1 %v513_v37  ;;  %770 = vmatprep.mubr.msk.bf16.mxu1 %vm830_vm0, %v829_v0 }
 0x2a1   : > { %771 = vmatmul.mubr.msk.bf16.vlgmr.msra.gmra.mxu1 %vm176_vm1, %v506_v38 }
 0x349   : > { %v920_v39 = vpop.f32.mrf.mxu1 }
 0x34b   : > { %v742_v40 = vpop.f32.mrf.mxu1 }
 0x34d   : > { %v281_v41 = vpop.f32.mrf.mxu1 }
 0x34f   : > { %v743_v42 = vpop.f32.mrf.mxu1 }
 0x351   : > { %v329_v43 = vpop.f32.mrf.mxu1 }
 0x352   : > { %v330_v44 = vadd.f32 %v329_v43, %v896_v12 }
 0x353   : > { %v748_v45 = vpop.f32.mrf.mxu1 }
 0x354   : > { %v335_v46 = vsel %vm176_vm1, %v330_v44, -inf }
 0x355   : > { %336 = vmax.xlane.f32.xlu1 %v335_v46  ;;  %v332_v47 = vpop.f32.mrf.mxu1 }
 0x357   : > { %v749_v48 = vpop.f32.mrf.mxu1 }
 0x359   : > { %v439_v49 = vpop.f32.mrf.mxu1 }
 0x35a   : > { %v440_v50 = vadd.f32 %v439_v49, %v896_v12 }
 0x35b   : > { %v760_v51 = vpop.f32.mrf.mxu1 }
 0x35c   : > { %v445_v52 = vsel %vm176_vm1, %v440_v50, -inf }
 0x35d   : > { %446 = vmax.xlane.f32.xlu0 %v445_v52  ;;  %v442_v53 = vpop.f32.mrf.mxu1 }
 0x35f   : > { %v761_v54 = vpop.f32.mrf.mxu1 }
 0x361   : > { %v549_v55 = vpop.f32.mrf.mxu1 }
 0x362   : > { %v550_v56 = vadd.f32 %v549_v55, %v896_v12 }
 0x363   : > { %v772_v57 = vpop.f32.mrf.mxu1 }
 0x364   : > { %v555_v58 = vsel %vm176_vm1, %v550_v56, -inf }
 0x365   : > { %556 = vmax.xlane.f32.xlu1 %v555_v58  ;;  %v552_v59 = vpop.f32.mrf.mxu1 }
 0x367   : > { %v773_v60 = vpop.f32.mrf.mxu1 }
 0x3de   : > { %v337_v61 = vpop.xlane.xlu1 %336 }
 0x3df   : > { %v338_v62 = vsub.f32 %v330_v44, %v337_v61 }
 0x3e1   : > { %v339_v63 = vmul.f32 1.442695, %v338_v62 }
 0x3e3   : > { %809 = vpow2.f32 %v339_v63 }
 0x3e6   : > { %v447_v9 = vpop.xlane.xlu0 %446 }
 0x3e7   : > { %v448_v10 = vsub.f32 %v440_v50, %v447_v9 }
 0x3e9   : > { %v449_v11 = vmul.f32 1.442695, %v448_v10 }
 0x3ee   : > { %v557_v1 = vpop.xlane.xlu1 %556 }
 0x3ef   : > { %v558_v3 = vsub.f32 %v550_v56, %v557_v1 }
 0x3f0   : > { %v810_v4 = vpop.eup %809 }
 0x3f1   : > { %v559_v5 = vmul.f32 1.442695, %v558_v3  ;;  %v341_v6 = vsel %vm176_vm1, %v810_v4, 0.0 }
 0x3f2   : > { %342 = vadd.xlane.f32.xlu1 %v341_v6 }
 0x3f3   : > { %811 = vpow2.f32 %v559_v5 }
 0x3f4   : > { %813 = vpow2.f32 %v449_v11 }
 0x400   : > { %v812_v7 = vpop.eup %811 }
 0x401   : > { %v561_v8 = vsel %vm176_vm1, %v812_v7, 0.0  ;;  %v814_v12 = vpop.eup %813 }
 0x402   : > { %562 = vadd.xlane.f32.xlu0 %v561_v8  ;;  %v451_v13 = vsel %vm176_vm1, %v814_v12, 0.0 }
 0x403   : > { %347 = vrot.lane.b32.xlu1 %v882_v2, %s839_s26 }
 0x418   : > { %457 = vrot.lane.b32.xlu0 %v882_v2, %s840_s27 }
 0x427   : > { %452 = vadd.xlane.f32.xlu1 %v451_v13 }
 0x438   : > { %567 = vrot.lane.b32.xlu1 %v882_v2, %s841_s28 }
 0x47b   : > { %v343_v14 = vpop.xlane.xlu1 %342 }
 0x47c   : > { %815 = vrcp.f32 %v343_v14 }
 0x47f   : > { %v348_v15 = vpop.permute.xlu1 %347 }
 0x480   : > { %v353_v16 = vsel %vm240_vm3, %v348_v15, 0 }
 0x481   : > { %751 = vmatpush3.bf16.msra.mxu0 %v353_v16 }
 0x482   : > { %762 = vmatprep.subr.bf16.mxu0 %v829_v0 }
 0x489   : > { %v816_v17 = vpop.eup %815 }
 0x48a   : > { %v345_v18 = vmul.f32 %v816_v17, %v810_v4 }
 0x48b   : > { %v563_v19 = vpop.xlane.xlu0 %562 }
 0x48c   : > { %v346_v20 = vpack.c.bf16 %v345_v18, %v345_v18 }
 0x48e   : > { %753 = vmatmul.mubr.msk.bf16.vlgmr.msra.gmra.mxu0 %vm176_vm1, %v346_v20 }
 0x48f   : > { %v458_v21 = vpop.permute.xlu0 %457  ;;  %764 = vmatprep.mubr.msk.bf16.mxu0 %vm830_vm0, %v829_v0 }
 0x490   : > { %v463_v2 = vsel %vm240_vm3, %v458_v21, 0 }
 0x491   : > { %763 = vmatpush3.bf16.msra.mxu0 %v463_v2 }
 0x492   : > { %774 = vmatprep.subr.bf16.mxu0 %v829_v0 }
 0x4b0   : > { %v453_v22 = vpop.xlane.xlu1 %452 }
 0x4b1   : > { %817 = vrcp.f32 %v453_v22 }
 0x4b2   : > { %819 = vrcp.f32 %v563_v19 }
 0x4b4   : > { %v568_v24 = vpop.permute.xlu1 %567 }
 0x4b5   : > { %v573_v26 = vsel %vm240_vm3, %v568_v24, 0 }
 0x4be   : > { %v818_v23 = vpop.eup %817 }
 0x4bf   : > { %v455_v25 = vmul.f32 %v818_v23, %v814_v12  ;;  %v820_v28 = vpop.eup %819 }
 0x4c0   : > { %v565_v29 = vmul.f32 %v820_v28, %v812_v7 }
 0x4c1   : > { %v456_v27 = vpack.c.bf16 %v455_v25, %v455_v25 }
 0x4c2   : > { %v566_v30 = vpack.c.bf16 %v565_v29, %v565_v29 }
 0x4c3   : > { %765 = vmatmul.mubr.msk.bf16.vlgmr.msra.gmra.mxu0 %vm176_vm1, %v456_v27 }
 0x4c4   : > { %775 = vmatpush3.bf16.msra.mxu0 %v573_v26  ;;  %776 = vmatprep.mubr.msk.bf16.mxu0 %vm830_vm0, %v829_v0 }
 0x4cb   : > { %777 = vmatmul.mubr.msk.bf16.vlgmr.msra.gmra.mxu0 %vm176_vm1, %v566_v30 }
 0x54e   : > { %v389_v31 = vpop.f32.mrf.mxu0 }
 0x54f   : > { %616 = vrot.lane.b32.xlu1 %v389_v31, %s842_s29 }
 0x550   : > { %v754_v32 = vpop.f32.mrf.mxu0 }
 0x552   : > { %v392_v33 = vpop.f32.mrf.mxu0 }
 0x554   : > { %v755_v34 = vpop.f32.mrf.mxu0 }
 0x583   : > { %v499_v35 = vpop.f32.mrf.mxu0 }
 0x584   : > { %620 = vrot.lane.b32.xlu0 %v499_v35, %s843_s30 }
 0x585   : > { %v766_v36 = vpop.f32.mrf.mxu0 }
 0x587   : > { %v502_v37 = vpop.f32.mrf.mxu0 }
 0x589   : > { %v767_v38 = vpop.f32.mrf.mxu0 }
 0x58b   : > { %v609_v40 = vpop.f32.mrf.mxu0 }
 0x58c   : > { %624 = vrot.lane.b32.xlu1 %v609_v40, %s844_s3 }
 0x58d   : > { %v778_v0 = vpop.f32.mrf.mxu0 }
 0x58f   : > { %v612_v41 = vpop.f32.mrf.mxu0 }
 0x591   : > { %v779_v42 = vpop.f32.mrf.mxu0 }
 0x5c1   : > { %v617_v43 = vpop.permute.xlu1 %616 }
 0x5c2   : > { %v627_v45 = vsel %vm176_vm1, %v920_v39, %v617_v43 }
 0x5f6   : > { %v621_v44 = vpop.permute.xlu0 %620 }
 0x5f7   : > { %v629_v46 = vsel %vm628_vm4, %v627_v45, %v621_v44 }
 0x5fe   : > { %v625_v47 = vpop.permute.xlu1 %624 }
 0x5ff   : > { %v631_v48 = vsel %vm630_vm5, %v629_v46, %v625_v47 }
 0x600   : > { %v632_v49 = vpack.c.bf16 %v631_v48, %v631_v48 }
 0x602   : > { %634 = vst.msk [vmem:[%s152_s6] sm:$0xf] %vm633_vm6, %v632_v49 }
 0x603 PF: > { %s12_s9 = sadd.s32 1, %s827_s9  }
 0x604   : > { %p9_p4 = scmp.ge.s32.totalorder %s12_s9, 4  }
 0x606   :  { %11 = sbr.rel (!%p9_p4) target bundleno = 1 (0x1), region = 61 }

// kernel: transformer_forward.77
= control target key start
LH: loop header
LB: loop body
LE: loop exit
PB: predicated region body
PF: predicated region fallthrough
CT: control target
= control target key end

     0   :  { %v176_v1 = vmov 0.0   ;;  %vm177_vm0 = vmmov 0   ;;  %vm20_vm1 = vcmask 490496   ;;  %s222_s0 = inlined_call_operand.vmem [shape: bf16[16,32], index: 0, kind: input, shape index: {}]   ;;  %s223_s1 = inlined_call_operand.vmem [shape: bf16[32,60], index: 1, kind: input, shape index: {}]   ;;  %s224_s2 = inlined_call_operand.vmem [shape: f32[1,60], index: 2, kind: input, shape index: {}]   ;;  %s225_s3 = inlined_call_operand.hbm [shape: f32[16,60], index: 3, kind: output, shape index: {}]  }
   0x1   :  { %v151_v0 = vld [vmem:[%s223_s1 + $0x8] sm:$0xff]   ;;  %138 = vmatprep.subr.bf16.mxu0 %v176_v1  ;;  %v152_v2 = vld [vmem:[%s223_s1] sm:$0xff]   ;;  %142 = vmatprep.mubr.msk.bf16.mxu0 %vm177_vm0, %v176_v1 }
   0x2   :  { %139 = vmatpush3.bf16.msra.mxu0 %v151_v0 }
   0x3   :  { %140 = vmatprep.subr.bf16.mxu0 %v176_v1 }
   0x4   :  { %8 = vsyncpa [#allocation4], 0  ;;  %21 = vst.msk [vmem:[#allocation2] sm:$0xff] %vm20_vm1, %v176_v1  ;;  %v153_v3 = vld [vmem:[%s222_s0] sm:$0xff]   ;;  %vm48_vm2 = vcmask 261120   ;;  %s178_s0 = smov [#allocation3]  }
   0x5   :  { %22 = vst.msk [vmem:[#allocation2 + $0x8] sm:$0xff] %vm20_vm1, %v176_v1  ;;  %v134_v12 = vld [vmem:[%s224_s2] ss:$0 sm:$0xff]  ;;  %s119_s19 = sshll.u32 %s178_s0, 4  ;;  %s120_s19 = int_to_ptr.vmem [resolvable:$true] %s119_s19 }
   0x6   :  { %141 = vmatpush3.bf16.msra.mxu0 %v152_v2  ;;  %s154_s20 = scalar_lea.vmem %s120_s19, 256  ;;  %p159_p1 = scmp.lt.s32.totalorder %s120_s19, %s120_s19 }
   0x7   :  { %p155_p0 = scmp.ne.s32.totalorder %s120_s19, %s154_s20  ;;  %p160_p2 = scmp.lt.s32.totalorder %s154_s20, %s154_s20 }
   0x9   :  { %143 = vmatmul.mubr.msk.bf16.vlgmr.msra.gmra.mxu0 %vm48_vm2, %v153_v3  ;;  %p161_p3 = por %p160_p2, %p159_p1 }
   0xb   :  { %v23_v4 = vld [vmem:[#allocation2] sm:$0xff]  ;;  %p162_p4 = pnand %p161_p3, %p155_p0 }
   0xc   :  { %v24_v8 = vld [vmem:[#allocation2 + $0x8] sm:$0xff] }
  0xc9   :  { %v86_v5 = vpop.f32.mrf.mxu0 }
  0xca   :  { %v93_v6 = vadd.f32 %v86_v5, %v23_v4 }
  0xcb   :  { %v144_v7 = vpop.f32.mrf.mxu0 }
  0xcc   :  { %96 = vst.msk [vmem:[#allocation2] sm:$0xff] %vm20_vm1, %v93_v6 }
  0xcd   :  { %v89_v9 = vpop.f32.mrf.mxu0 }
  0xce   :  { %v94_v10 = vadd.f32 %v89_v9, %v24_v8 }
  0xcf   :  { %v145_v11 = vpop.f32.mrf.mxu0 }
  0xd0   :  { %97 = vst.msk [vmem:[#allocation2 + $0x8] sm:$0xff] %vm20_vm1, %v94_v10 }
  0xd3   :  { %v101_v13 = vld [vmem:[#allocation2] sm:$0xff] }
  0xd4   :  { %v110_v14 = vadd.f32 %v134_v12, %v101_v13 }
  0xd6   :  { %112 = vst.msk [vmem:[#allocation3] sm:$0xff] %vm20_vm1, %v110_v14 }
  0xd7   :  { %v102_v15 = vld [vmem:[#allocation2 + $0x8] sm:$0xff] }
  0xd8   :  { %v111_v16 = vadd.f32 %v134_v12, %v102_v15 }
  0xda   :  { %113 = vst.msk [vmem:[#allocation3 + $0x8] sm:$0xff] %vm20_vm1, %v111_v16 }
  0xdb   :  { %165 = shalt.err (!%p162_p4)
}
  0xdc   :  { %s179_s21 = smov 128   ;;  %s180_s2 = smov 8  }
  0xdd   :  { %125 = dma.vmem_to_hbm [thread:$0]  %s120_s19, 256, %s225_s3, [#allocation4], %s179_s21, %s179_s21, %s180_s2  }
  0xde   :  { %174 = dma.done.wait [#allocation4], 256  }
  0xdf   :  { %175 = vsyncadd [#allocation4], 4294967040 }
  0xe0   :  { %129 = vsyncpa [#allocation4], 1 }

// kernel: transformer_forward.59
= control target key start
LH: loop header
LB: loop body
LE: loop exit
PB: predicated region body
PF: predicated region fallthrough
CT: control target
= control target key end

     0   :  { %s907_s12 = smov 0   ;;  %s1002_s0 = inlined_call_operand.vmem [shape: bf16[2,8,32], index: 0, kind: input, shape index: {}]   ;;  %s1003_s1 = inlined_call_operand.vmem [shape: bf16[2,8,64], index: 1, kind: input, shape index: {}]   ;;  %s1004_s2 = inlined_call_operand.vmem [shape: f32[2,1,8], index: 2, kind: input, shape index: {}]   ;;  %s1005_s3 = inlined_call_operand.vmem [shape: bf16[2,8,32], index: 3, kind: output, shape index: {}]  }
   0x1 LB: > { %s746_s13 = sadd.s32 4294967295, %s873_s12   ;;  %p750_p0 = scmp.ge.s32.totalorder %s873_s12, 1  ;;  %s873_s12 = sphi %s907_s12, %s13_s12  }
   0x2   : > { %p153_p1 = scmp.lt.s32.totalorder %s873_s12, 3 }
   0x4   : > { %p154_p2 = pnand %p750_p0, %p153_p1 }
   0x5   : > { %p182_p3 = scmp.lt.s32.totalorder (!%p154_p2), %s746_s13, 1  ;;  %s877_s24 = smov (!%p154_p2), 96  }
   0x6   : > { %157 = sbr.rel (%p154_p2) target bundleno = 1377 (0x561), region = 32  ;;  %s878_s25 = smov (!%p154_p2), 120  }
   0x7   : > { %s879_s26 = smov (!%p154_p2), 112   ;;  %s880_s27 = smov (!%p154_p2), 104  }
   0x8   : > { %s881_s28 = smov (!%p154_p2), 88   ;;  %s882_s29 = smov (!%p154_p2), 72  }
   0x9   : > { %s883_s30 = smov (!%p154_p2), 80   ;;  %s884_s4 = smov (!%p154_p2), 8  }
   0xa   : > { %s885_s5 = smov (!%p154_p2), 16   ;;  %s886_s6 = smov (!%p154_p2), 24  }
   0xb   : > { %v875_v0 = vmov 0.0   ;;  %vm876_vm0 = vmmov 0   ;;  %s1007_s13 = smov (!%p182_p3, %s746_s13), 1  ;;  %vm210_vm1 = vcmask 64512   ;;  %vm277_vm2 = vcmask 1043456  }
   0xc   : > { %782 = vmatprep.subr.bf16.mxu0 %v875_v0  ;;  %784 = vmatprep.mubr.msk.bf16.mxu0 %vm876_vm0, %v875_v0  ;;  %s921_s14 = sshll.u32 %s1007_s13, 2  ;;  %s192_s23 = scalar_lea.vmem %s1004_s2, %s1007_s13  ;;  %vm665_vm3 = vcmask 130048   ;;  %vm667_vm4 = vcmask 195584   ;;  %vm670_vm5 = vcmask 257024  }
   0xd   : > { %788 = vmatprep.subr.bf16.mxu1 %v875_v0  ;;  %790 = vmatprep.mubr.msk.bf16.mxu1 %vm876_vm0, %v875_v0  ;;  %s185_s17 = scalar_lea.vmem %s1002_s0, %s921_s14  ;;  %s189_s20 = scalar_lea.vmem %s1003_s1, %s921_s14  ;;  %v939_v7 = vld [vmem:[%s192_s23] ss:$0 sm:$0xff] }
   0xe   : > { %v198_v1 = vld [vmem:[%s189_s20] sm:$0xf]  ;;  %s196_s9 = scalar_lea.vmem %s1005_s3, %s921_s14 }
   0xf   : > { %v206_v2 = vld [vmem:[%s185_s17] sm:$0xf]  ;;  %v215_v4 = vsel %vm210_vm1, %v198_v1, 0  ;;  %v943_v14 = vcombine.low %v198_v1, %v198_v1 }
  0x10   : > { %v207_v3 = vunpack.c.l.bf16 %v206_v2  ;;  %783 = vmatpush3.bf16.xpose.msra.mxu0 %v215_v4 }
  0x11   : > { %800 = vmatprep.subr.bf16.mxu0 %v875_v0  ;;  %272 = vrot.lane.b32.xlu1 %v943_v14, %s877_s24 }
  0x12   : > { %v208_v5 = vmul.f32 0.35355338, %v207_v3 }
  0x14   : > { %v209_v6 = vpack.c.bf16 %v208_v5, %v208_v5 }
  0x15   : > { %324 = vrot.lane.b32.xlu1 %v943_v14, %s878_s25 }
  0x17   : > { %785 = vmatmul.mubr.msk.bf16.vlgmr.msra.gmra.mxu0 %vm210_vm1, %v209_v6 }
  0x18   : > { %802 = vmatprep.mubr.msk.bf16.mxu0 %vm876_vm0, %v875_v0 }
  0x19   : > { %434 = vrot.lane.b32.xlu1 %v943_v14, %s879_s26 }
  0x1d   : > { %432 = vrot.lane.b32.xlu1 %v209_v6, %s879_s26 }
  0x21   : > { %544 = vrot.lane.b32.xlu1 %v943_v14, %s880_s27 }
  0x25   : > { %542 = vrot.lane.b32.xlu1 %v209_v6, %s880_s27 }
  0x83   : > { %v273_v20 = vpop.permute.xlu1 %272 }
  0x84   : > { %v279_v21 = vsel %vm277_vm2, %v273_v20, 0 }
  0x85   : > { %789 = vmatpush3.bf16.msra.mxu1 %v279_v21 }
  0x86   : > { %794 = vmatprep.subr.bf16.mxu1 %v875_v0 }
  0x87   : > { %v325_v24 = vpop.permute.xlu1 %324 }
  0x88   : > { %v330_v26 = vsel %vm210_vm1, %v325_v24, 0 }
  0x8b   : > { %v435_v28 = vpop.permute.xlu1 %434 }
  0x8c   : > { %v440_v31 = vsel %vm210_vm1, %v435_v28, 0 }
  0x8f   : > { %v433_v30 = vpop.permute.xlu1 %432 }
  0x93   : > { %v545_v32 = vpop.permute.xlu1 %544 }
  0x94   : > { %v550_v33 = vsel %vm210_vm1, %v545_v32, 0 }
  0x97   : > { %v543_v34 = vpop.permute.xlu1 %542 }
  0xd7   : > { %v251_v8 = vpop.f32.mrf.mxu0 }
  0xd8   : > { %v252_v9 = vadd.f32 %v939_v7, %v251_v8 }
  0xd9   : > { %v786_v10 = vpop.f32.mrf.mxu0 }
  0xda   : > { %v257_v11 = vsel %vm210_vm1, %v252_v9, -inf }
  0xdb   : > { %258 = vmax.xlane.f32.xlu0 %v257_v11  ;;  %v254_v12 = vpop.f32.mrf.mxu0 }
  0xdd   : > { %v787_v13 = vpop.f32.mrf.mxu0 }
 0x164   : > { %v259_v15 = vpop.xlane.xlu0 %258 }
 0x165   : > { %v260_v16 = vsub.f32 %v252_v9, %v259_v15 }
 0x167   : > { %v261_v17 = vmul.f32 1.442695, %v260_v16 }
 0x169   : > { %851 = vpow2.f32 %v261_v17 }
 0x176   : > { %v852_v18 = vpop.eup %851 }
 0x177   : > { %v263_v19 = vsel %vm210_vm1, %v852_v18, 0.0 }
 0x178   : > { %264 = vadd.xlane.f32.xlu0 %v263_v19 }
 0x18e   : > { %322 = vrot.lane.b32.xlu0 %v209_v6, %s878_s25 }
 0x201   : > { %v265_v22 = vpop.xlane.xlu0 %264 }
 0x202   : > { %853 = vrcp.f32 %v265_v22 }
 0x205   : > { %v323_v29 = vpop.permute.xlu0 %322 }
 0x20f   : > { %v854_v23 = vpop.eup %853 }
 0x210   : > { %v267_v25 = vmul.f32 %v854_v23, %v852_v18 }
 0x212   : > { %v268_v27 = vpack.c.bf16 %v267_v25, %v267_v25 }
 0x214   : > { %791 = vmatmul.mubr.msk.bf16.vlgmr.msra.gmra.mxu1 %vm210_vm1, %v268_v27 }
 0x215   : > { %795 = vmatpush3.bf16.xpose.msra.mxu1 %v330_v26  ;;  %796 = vmatprep.mubr.msk.bf16.mxu1 %vm876_vm0, %v875_v0 }
 0x216   : > { %806 = vmatprep.subr.bf16.mxu1 %v875_v0 }
 0x21c   : > { %797 = vmatmul.mubr.msk.bf16.vlgmr.msra.gmra.mxu1 %vm210_vm1, %v323_v29 }
 0x21d   : > { %807 = vmatpush3.bf16.xpose.msra.mxu1 %v440_v31  ;;  %808 = vmatprep.mubr.msk.bf16.mxu1 %vm876_vm0, %v875_v0 }
 0x21e   : > { %818 = vmatprep.subr.bf16.mxu1 %v875_v0 }
 0x224   : > { %809 = vmatmul.mubr.msk.bf16.vlgmr.msra.gmra.mxu1 %vm210_vm1, %v433_v30 }
 0x225   : > { %819 = vmatpush3.bf16.xpose.msra.mxu1 %v550_v33  ;;  %820 = vmatprep.mubr.msk.bf16.mxu1 %vm876_vm0, %v875_v0 }
 0x22c   : > { %821 = vmatmul.mubr.msk.bf16.vlgmr.msra.gmra.mxu1 %vm210_vm1, %v543_v34 }
 0x2d4   : > { %v967_v35 = vpop.f32.mrf.mxu1 }
 0x2d6   : > { %v792_v36 = vpop.f32.mrf.mxu1 }
 0x2d8   : > { %v318_v37 = vpop.f32.mrf.mxu1 }
 0x2da   : > { %v793_v38 = vpop.f32.mrf.mxu1 }
 0x2dc   : > { %v366_v39 = vpop.f32.mrf.mxu1 }
 0x2dd   : > { %v367_v40 = vadd.f32 %v939_v7, %v366_v39 }
 0x2de   : > { %v798_v41 = vpop.f32.mrf.mxu1 }
 0x2df   : > { %v372_v42 = vsel %vm210_vm1, %v367_v40, -inf }
 0x2e0   : > { %373 = vmax.xlane.f32.xlu1 %v372_v42  ;;  %v369_v43 = vpop.f32.mrf.mxu1 }
 0x2e2   : > { %v799_v44 = vpop.f32.mrf.mxu1 }
 0x2e4   : > { %v476_v45 = vpop.f32.mrf.mxu1 }
 0x2e5   : > { %v477_v46 = vadd.f32 %v939_v7, %v476_v45 }
 0x2e6   : > { %v810_v47 = vpop.f32.mrf.mxu1 }
 0x2e7   : > { %v482_v48 = vsel %vm210_vm1, %v477_v46, -inf }
 0x2e8   : > { %483 = vmax.xlane.f32.xlu0 %v482_v48  ;;  %v479_v49 = vpop.f32.mrf.mxu1 }
 0x2ea   : > { %v811_v50 = vpop.f32.mrf.mxu1 }
 0x2ec   : > { %v586_v51 = vpop.f32.mrf.mxu1 }
 0x2ed   : > { %v587_v52 = vadd.f32 %v939_v7, %v586_v51 }
 0x2ee   : > { %v822_v53 = vpop.f32.mrf.mxu1 }
 0x2ef   : > { %v592_v54 = vsel %vm210_vm1, %v587_v52, -inf }
 0x2f0   : > { %593 = vmax.xlane.f32.xlu1 %v592_v54  ;;  %v589_v55 = vpop.f32.mrf.mxu1 }
 0x2f2   : > { %v823_v56 = vpop.f32.mrf.mxu1 }
 0x301   : > { %384 = vrot.lane.b32.xlu1 %v943_v14, %s881_s28 }
 0x369   : > { %v374_v57 = vpop.xlane.xlu1 %373 }
 0x36a   : > { %v375_v58 = vsub.f32 %v367_v40, %v374_v57 }
 0x36c   : > { %v376_v59 = vmul.f32 1.442695, %v375_v58 }
 0x36e   : > { %855 = vpow2.f32 %v376_v59 }
 0x371   : > { %v484_v60 = vpop.xlane.xlu0 %483 }
 0x372   : > { %v485_v61 = vsub.f32 %v477_v46, %v484_v60 }
 0x374   : > { %v486_v62 = vmul.f32 1.442695, %v485_v61 }
 0x376   : > { %857 = vpow2.f32 %v486_v62 }
 0x379   : > { %v594_v63 = vpop.xlane.xlu1 %593 }
 0x37a   : > { %v595_v1 = vsub.f32 %v587_v52, %v594_v63 }
 0x37b   : > { %v856_v2 = vpop.eup %855 }
 0x37c   : > { %v596_v3 = vmul.f32 1.442695, %v595_v1  ;;  %v378_v4 = vsel %vm210_vm1, %v856_v2, 0.0 }
 0x37d   : > { %379 = vadd.xlane.f32.xlu0 %v378_v4  ;;  %v385_v5 = vpop.permute.xlu1 %384 }
 0x37e   : > { %859 = vpow2.f32 %v596_v3  ;;  %v390_v6 = vsel %vm277_vm2, %v385_v5, 0 }
 0x37f   : > { %801 = vmatpush3.bf16.msra.mxu0 %v390_v6 }
 0x380   : > { %812 = vmatprep.subr.bf16.mxu0 %v875_v0 }
 0x383   : > { %v858_v7 = vpop.eup %857 }
 0x384   : > { %v488_v8 = vsel %vm210_vm1, %v858_v7, 0.0 }
 0x385   : > { %489 = vadd.xlane.f32.xlu1 %v488_v8 }
 0x38b   : > { %v860_v9 = vpop.eup %859 }
 0x38c   : > { %v598_v10 = vsel %vm210_vm1, %v860_v9, 0.0 }
 0x38d   : > { %599 = vadd.xlane.f32.xlu0 %v598_v10 }
 0x396   : > { %604 = vrot.lane.b32.xlu1 %v943_v14, %s882_s29 }
 0x3a3   : > { %494 = vrot.lane.b32.xlu0 %v943_v14, %s883_s30 }
 0x406   : > { %v380_v11 = vpop.xlane.xlu0 %379 }
 0x407   : > { %861 = vrcp.f32 %v380_v11 }
 0x40e   : > { %v490_v12 = vpop.xlane.xlu1 %489 }
 0x40f   : > { %863 = vrcp.f32 %v490_v12 }
 0x412   : > { %v605_v14 = vpop.permute.xlu1 %604 }
 0x413   : > { %v610_v23 = vsel %vm277_vm2, %v605_v14, 0 }
 0x414   : > { %v862_v13 = vpop.eup %861 }
 0x415   : > { %v382_v15 = vmul.f32 %v862_v13, %v856_v2 }
 0x416   : > { %v600_v16 = vpop.xlane.xlu0 %599 }
 0x417   : > { %865 = vrcp.f32 %v600_v16  ;;  %v383_v17 = vpack.c.bf16 %v382_v15, %v382_v15 }
 0x419   : > { %803 = vmatmul.mubr.msk.bf16.vlgmr.msra.gmra.mxu0 %vm210_vm1, %v383_v17 }
 0x41a   : > { %v495_v18 = vpop.permute.xlu0 %494  ;;  %814 = vmatprep.mubr.msk.bf16.mxu0 %vm876_vm0, %v875_v0 }
 0x41b   : > { %v500_v19 = vsel %vm277_vm2, %v495_v18, 0 }
 0x41c   : > { %v864_v20 = vpop.eup %863  ;;  %813 = vmatpush3.bf16.msra.mxu0 %v500_v19 }
 0x41d   : > { %v492_v21 = vmul.f32 %v864_v20, %v858_v7  ;;  %824 = vmatprep.subr.bf16.mxu0 %v875_v0 }
 0x41f   : > { %v493_v22 = vpack.c.bf16 %v492_v21, %v492_v21 }
 0x421   : > { %815 = vmatmul.mubr.msk.bf16.vlgmr.msra.gmra.mxu0 %vm210_vm1, %v493_v22 }
 0x422   : > { %825 = vmatpush3.bf16.msra.mxu0 %v610_v23  ;;  %826 = vmatprep.mubr.msk.bf16.mxu0 %vm876_vm0, %v875_v0 }
 0x424   : > { %v866_v24 = vpop.eup %865 }
 0x425   : > { %v602_v25 = vmul.f32 %v866_v24, %v860_v9 }
 0x427   : > { %v603_v26 = vpack.c.bf16 %v602_v25, %v602_v25 }
 0x429   : > { %827 = vmatmul.mubr.msk.bf16.vlgmr.msra.gmra.mxu0 %vm210_vm1, %v603_v26 }
 0x4d9   : > { %v426_v27 = vpop.f32.mrf.mxu0 }
 0x4da   : > { %653 = vrot.lane.b32.xlu1 %v426_v27, %s884_s4 }
 0x4db   : > { %v804_v28 = vpop.f32.mrf.mxu0 }
 0x4dd   : > { %v429_v29 = vpop.f32.mrf.mxu0 }
 0x4df   : > { %v805_v30 = vpop.f32.mrf.mxu0 }
 0x4e1   : > { %v536_v31 = vpop.f32.mrf.mxu0 }
 0x4e2   : > { %657 = vrot.lane.b32.xlu0 %v536_v31, %s885_s5 }
 0x4e3   : > { %v816_v32 = vpop.f32.mrf.mxu0 }
 0x4e5   : > { %v539_v33 = vpop.f32.mrf.mxu0 }
 0x4e7   : > { %v817_v34 = vpop.f32.mrf.mxu0 }
 0x4e9   : > { %v646_v36 = vpop.f32.mrf.mxu0 }
 0x4ea   : > { %661 = vrot.lane.b32.xlu1 %v646_v36, %s886_s6 }
 0x4eb   : > { %v828_v0 = vpop.f32.mrf.mxu0 }
 0x4ed   : > { %v649_v37 = vpop.f32.mrf.mxu0 }
 0x4ef   : > { %v829_v38 = vpop.f32.mrf.mxu0 }
 0x54c   : > { %v654_v39 = vpop.permute.xlu1 %653 }
 0x54d   : > { %v664_v41 = vsel %vm210_vm1, %v967_v35, %v654_v39 }
 0x554   : > { %v658_v40 = vpop.permute.xlu0 %657 }
 0x555   : > { %v666_v42 = vsel %vm665_vm3, %v664_v41, %v658_v40 }
 0x55c   : > { %v662_v43 = vpop.permute.xlu1 %661 }
 0x55d   : > { %v668_v44 = vsel %vm667_vm4, %v666_v42, %v662_v43 }
 0x55e   : > { %v669_v45 = vpack.c.bf16 %v668_v44, %v668_v44 }
 0x560   : > { %671 = vst.msk [vmem:[%s196_s9] sm:$0xf] %vm670_vm5, %v669_v45 }
 0x561 PF: > { %s13_s12 = sadd.s32 1, %s873_s12  }
 0x562   : > { %p10_p4 = scmp.ge.s32.totalorder %s13_s12, 4  }
 0x564   :  { %12 = sbr.rel (!%p10_p4) target bundleno = 1 (0x1), region = 68 }

</bundles_post_ra>
